<compile_context>
chip_gen: v7x
topology: tpu7x:2x2x1
jax: 0.10.0
libtpu: 0.0.40
codegen_flags: <defaults>
</compile_context>

<pallas_src>
import numpy as np
import jax
import jax.numpy as jnp
from jax.experimental import pallas as pl
from jax.experimental.pallas import tpu as pltpu

LANE = 128
_EPS = 1e-5  # F.layer_norm default eps, no affine params (matches the reference)


def _ceil_to(v, m):
    return ((v + m - 1) // m) * m


def _pad_axis(a, axis, target):
    amt = target - a.shape[axis]
    if amt <= 0:
        return a
    cfg = [(0, 0)] * a.ndim
    cfg[axis] = (0, amt)
    return jnp.pad(a, cfg)


# ----------------------------------------------------------------------------
# Fused Pallas kernel (parent fc+LN+proj -> argmax -> all child levels)
# ----------------------------------------------------------------------------
def make_fused_kernel(num_parents, num_parents_pad, proj_pad, child_counts, child_pads):
    P = num_parents
    Ppad = num_parents_pad
    L = len(child_counts)

    def kernel(x_ref, pwfc_ref, pbfc_ref, pwproj_ref, pbproj_ref, *refs):
        child_refs = refs[: 4 * L]
        out_refs = refs[4 * L:]
        parent_logits_ref, parent_proj_ref = out_refs[0], out_refs[1]

        x = x_ref[...]                       # (tB, D), bf16 (or f32 in exact mode)
        tB = x.shape[0]

        # ---- parent classifier: fc -> LayerNorm (no affine) -> proj ----------
        logits = (jnp.dot(x, pwfc_ref[...], preferred_element_type=jnp.float32)
                  + pbfc_ref[...])                          # (tB, Ppad) f32
        lane_ids = jax.lax.broadcasted_iota(jnp.int32, (tB, Ppad), 1)
        valid = lane_ids < P
        logits = jnp.where(valid, logits, 0.0)
        inv_p = 1.0 / P
        mean = jnp.sum(logits, axis=-1, keepdims=True) * inv_p
        cent = jnp.where(valid, logits - mean, 0.0)
        var = jnp.sum(cent * cent, axis=-1, keepdims=True) * inv_p
        ln_p = cent * jax.lax.rsqrt(var + _EPS)             # zero in padded lanes
        parent_logits_ref[...] = ln_p
        parent_proj_ref[...] = (jnp.dot(ln_p.astype(pwproj_ref.dtype), pwproj_ref[...],
                                        preferred_element_type=jnp.float32)
                                + pbproj_ref[...])

        # ---- argmax over the P valid lanes (softmax & LN are monotone) -------
        # Lane-index-as-float min trick: exact while Ppad < 2**24 (f32 integers).
        masked = jnp.where(valid, ln_p, -jnp.inf)
        row_max = jnp.max(masked, axis=-1, keepdims=True)
        cand = jnp.where(masked == row_max, lane_ids.astype(jnp.float32), float(Ppad))
        parent_class = jnp.min(cand, axis=-1, keepdims=True).astype(jnp.int32)  # (tB,1)

        # one-hot over parents: child proj-bias selection becomes one MXU matmul
        onehot = (lane_ids == parent_class).astype(jnp.float32)        # (tB, Ppad)

        # ---- child levels: dense all-parent matmul, then mask-select ---------
        for l in range(L):
            C = child_counts[l]
            Cpad = child_pads[l]
            wfc_ref, bfc_ref, wproj_ref, bproj_ref = child_refs[4 * l: 4 * (l + 1)]
            clogits_ref, cproj_ref = out_refs[2 + 2 * l], out_refs[3 + 2 * l]

            # logits for ALL parents: block p of width Cpad is parent p's fc.
            wide = (jnp.dot(x, wfc_ref[...], preferred_element_type=jnp.float32)
                    + bfc_ref[...])                         # (tB, P*Cpad) f32
            c_ids = jax.lax.broadcasted_iota(jnp.int32, (tB, P * Cpad), 1)
            off = c_ids - parent_class * Cpad
            sel_m = jnp.logical_and(off >= 0, off < C)      # selected parent's C cols
            sel = jnp.where(sel_m, wide, 0.0)

            # masked LayerNorm over the C valid columns of the selected block
            inv_c = 1.0 / C
            c_mean = jnp.sum(sel, axis=-1, keepdims=True) * inv_c
            c_cent = jnp.where(sel_m, sel - c_mean, 0.0)
            c_var = jnp.sum(c_cent * c_cent, axis=-1, keepdims=True) * inv_c
            ln_w = c_cent * jax.lax.rsqrt(c_var + _EPS)     # nonzero only in sel block

            # compact (tB, Cpad) logits via lane-aligned block tree-sum
            blocks = [ln_w[:, p * Cpad:(p + 1) * Cpad] for p in range(P)]
            while len(blocks) > 1:
                nxt = [blocks[a] + blocks[a + 1] for a in range(0, len(blocks) - 1, 2)]
                if len(blocks) % 2:
                    nxt.append(blocks[-1])
                blocks = nxt
            clogits_ref[...] = blocks[0]

            # proj: single wide matmul against vertically stacked per-parent weights,
            # plus the selected parent's bias via the one-hot matmul.
            proj = jnp.dot(ln_w.astype(wproj_ref.dtype), wproj_ref[...],
                           preferred_element_type=jnp.float32)
            bsel = jnp.dot(onehot, bproj_ref[...], preferred_element_type=jnp.float32)
            cproj_ref[...] = proj + bsel

    return kernel


# ----------------------------------------------------------------------------
# Host-side parameter packing (pad to 128 lanes, stack per-parent weights,
# cast matmul weights to `weight_dtype`; biases stay f32 — they are added to
# the f32 accumulator).
# ----------------------------------------------------------------------------
def pack_params(params, weight_dtype=jnp.bfloat16):
    p = params["parent"]
    D, P = p["wfc"].shape
    E = p["wproj"].shape[1]
    Ppad = _ceil_to(P, LANE)
    Epad = _ceil_to(E, LANE)
    packed = dict(
        num_parents=P, proj_embed_dim=E, Ppad=Ppad, Epad=Epad,
        weight_dtype=weight_dtype,
        pwfc=_pad_axis(p["wfc"], 1, Ppad).astype(weight_dtype),              # (D, Ppad)
        pbfc=_pad_axis(p["bfc"], 1, Ppad),                                   # (1, Ppad)
        pwproj=_pad_axis(_pad_axis(p["wproj"], 0, Ppad), 1, Epad).astype(weight_dtype),
        pbproj=_pad_axis(p["bproj"], 1, Epad),                               # (1, Epad)
        children=[],
    )
    for cp in params["children"]:
        P_, D_, C = cp["wfc"].shape
        Cpad = _ceil_to(C, LANE)
        wfc = jnp.transpose(_pad_axis(cp["wfc"], 2, Cpad), (1, 0, 2)).reshape(D_, P * Cpad)
        bfc = jnp.transpose(_pad_axis(cp["bfc"], 2, Cpad), (1, 0, 2)).reshape(1, P * Cpad)
        wproj = _pad_axis(_pad_axis(cp["wproj"], 1, Cpad), 2, Epad).reshape(P * Cpad, Epad)
        bproj2d = _pad_axis(_pad_axis(cp["bproj"][:, 0, :], 0, Ppad), 1, Epad)  # (Ppad, Epad)
        packed["children"].append(dict(
            wfc=wfc.astype(weight_dtype), bfc=bfc,
            wproj=wproj.astype(weight_dtype), bproj2d=bproj2d,
            num_children=C, Cpad=Cpad))
    return packed


def _pick_tile_b(B):
    Bp8 = _ceil_to(B, 8)
    if Bp8 >= 512:
        return 256                       # big-batch: amortize per-step overhead (v6e)
    if Bp8 >= 256:
        return 128
    if Bp8 >= 16:
        return max(8, (Bp8 // 2) // 8 * 8)   # expose >=2 grid steps (v7x megacore)
    return Bp8


# ----------------------------------------------------------------------------
# Forward wrapper (single pallas_call for the whole hierarchy)
# ----------------------------------------------------------------------------
def hierarchical_classifier_forward(packed, x):
    B, D = x.shape
    P = packed["num_parents"]
    E = packed["proj_embed_dim"]
    Ppad, Epad = packed["Ppad"], packed["Epad"]
    wdt = packed["weight_dtype"]
    counts = tuple(c["num_children"] for c in packed["children"])
    cpads = tuple(c["Cpad"] for c in packed["children"])
    L = len(counts)

    tile_B = _pick_tile_b(B)
    B_pad = _ceil_to(B, tile_B)
    x_pad = x.astype(wdt)
    if B_pad != B:
        x_pad = jnp.pad(x_pad, ((0, B_pad - B), (0, 0)))

    kernel = make_fused_kernel(P, Ppad, Epad, counts, cpads)

    args = [x_pad, packed["pwfc"], packed["pbfc"], packed["pwproj"], packed["pbproj"]]
    out_shape = [jax.ShapeDtypeStruct((B_pad, Ppad), jnp.float32),
                 jax.ShapeDtypeStruct((B_pad, Epad), jnp.float32)]
    for cp in packed["children"]:
        args += [cp["wfc"], cp["bfc"], cp["wproj"], cp["bproj2d"]]
        out_shape += [jax.ShapeDtypeStruct((B_pad, cp["Cpad"]), jnp.float32),
                      jax.ShapeDtypeStruct((B_pad, Epad), jnp.float32)]

    # --- VMEM budget (weights + double-buffered x/out tiles + f32 temporaries) ---
    wb = jnp.dtype(wdt).itemsize
    need = (D * Ppad * wb + Ppad * 4 + Ppad * Epad * wb + Epad * 4
            + 2 * tile_B * D * wb
            + 2 * tile_B * 4 * (Ppad + Epad))
    wide_max = Ppad
    for Cpad in cpads:
        need += (D * P * Cpad * wb + P * Cpad * 4
                 + P * Cpad * Epad * wb + Ppad * Epad * 4
                 + 2 * tile_B * 4 * (Cpad + Epad))
        wide_max = max(wide_max, P * Cpad)
    need += 5 * tile_B * wide_max * 4                 # in-kernel f32 temporaries
    vmem_limit = int(min(max(2 * need, 32 << 20) + (4 << 20), 64 << 20))

    def build_specs(buffered):
        def const_spec(shape):
            # Constant-index weight blocks: single-buffer them (they never change
            # across the batch grid) to halve resident weight VMEM.
            if buffered:
                return pl.BlockSpec(shape, lambda i: (0, 0), pipeline_mode=pl.Buffered(1))
            return pl.BlockSpec(shape, lambda i: (0, 0))

        in_specs = [pl.BlockSpec((tile_B, D), lambda i: (i, 0)),
                    const_spec((D, Ppad)), const_spec((1, Ppad)),
                    const_spec((Ppad, Epad)), const_spec((1, Epad))]
        out_specs = [pl.BlockSpec((tile_B, Ppad), lambda i: (i, 0)),
                     pl.BlockSpec((tile_B, Epad), lambda i: (i, 0))]
        for Cpad in cpads:
            in_specs += [const_spec((D, P * Cpad)), const_spec((1, P * Cpad)),
                         const_spec((P * Cpad, Epad)), const_spec((Ppad, Epad))]
            out_specs += [pl.BlockSpec((tile_B, Cpad), lambda i: (i, 0)),
                          pl.BlockSpec((tile_B, Epad), lambda i: (i, 0))]
        return in_specs, out_specs

    def run(buffered):
        in_specs, out_specs = build_specs(buffered)
        return pl.pallas_call(
            kernel,
            out_shape=tuple(out_shape),
            grid=(B_pad // tile_B,),
            in_specs=in_specs,
            out_specs=tuple(out_specs),
            compiler_params=pltpu.CompilerParams(
                dimension_semantics=("parallel",),
                vmem_limit_bytes=vmem_limit),
        )(*args)

    try:
        outs = run(True)
    except Exception:
        # pipeline_mode=pl.Buffered(1) not supported on this jax build -> default
        # double-buffered weight blocks (correctness unaffected).
        outs = run(False)

    parent_logits = outs[0][:B, :P]
    parent_proj = outs[1][:B, :E]
    child_logits = [outs[2 + 2 * l][:B, :counts[l]] for l in range(L)]
    child_projs = [outs[3 + 2 * l][:B, :E] for l in range(L)]
    return parent_logits, child_logits, parent_proj, child_projs


# ----------------------------------------------------------------------------
# Parameter construction (trunc_normal(std=2e-5) weights, zero biases)
# ----------------------------------------------------------------------------
def trunc_normal(key, shape, std=2e-5):
    return jax.random.truncated_normal(key, -2.0, 2.0, shape, jnp.float32) * std


def make_params(key, input_dim, num_parents, proj_embed_dim, num_children_per_parent):
    keys = jax.random.split(key, 2 + 2 * len(num_children_per_parent))
    params = {}
    params["parent"] = dict(
        wfc=trunc_normal(keys[0], (input_dim, num_parents)),
        bfc=jnp.zeros((1, num_parents), jnp.float32),
        wproj=trunc_normal(keys[1], (num_parents, proj_embed_dim)),
        bproj=jnp.zeros((1, proj_embed_dim), jnp.float32),
    )
    params["children"] = []
    for i, c in enumerate(num_children_per_parent):
        k_fc, k_pr = keys[2 + 2 * i], keys[3 + 2 * i]
        params["children"].append(dict(
            wfc=trunc_normal(k_fc, (num_parents, input_dim, c)),
            bfc=jnp.zeros((num_parents, 1, c), jnp.float32),
            wproj=trunc_normal(k_pr, (num_parents, c, proj_embed_dim)),
            bproj=jnp.zeros((num_parents, 1, proj_embed_dim), jnp.float32),
        ))
    return params


# ----------------------------------------------------------------------------
# Pure-JAX reference (same math as the PyTorch module, eval mode). matmul_dtype
# lets us validate the bf16 kernel at matched matmul precision; f32 reproduces
# the PyTorch forward exactly.
# ----------------------------------------------------------------------------
def reference_forward(params, x, matmul_dtype=jnp.float32):
    md = matmul_dtype

    def ln(v):
        m = jnp.mean(v, axis=-1, keepdims=True)
        var = jnp.mean((v - m) ** 2, axis=-1, keepdims=True)
        return (v - m) * jax.lax.rsqrt(var + _EPS)

    B = x.shape[0]
    xm = x.astype(md)
    p = params["parent"]
    p_logits = ln(jnp.dot(xm, p["wfc"].astype(md),
                          preferred_element_type=jnp.float32) + p["bfc"])
    p_proj = jnp.dot(p_logits.astype(md), p["wproj"].astype(md),
                     preferred_element_type=jnp.float32) + p["bproj"]
    pc = jnp.argmax(jax.nn.softmax(p_logits, axis=1), axis=1)

    child_logits, child_projs = [], []
    rows = jnp.arange(B)
    for cp in params["children"]:
        la = jnp.einsum("bd,pdc->bpc", xm, cp["wfc"].astype(md),
                        preferred_element_type=jnp.float32) + cp["bfc"][:, 0, :][None]
        la = ln(la)
        sel = la[rows, pc]                      # (B, C) — per-sample parent selection
        wsel = cp["wproj"][pc].astype(md)       # (B, C, E)
        bsel = cp["bproj"][pc][:, 0, :]         # (B, E)
        child_logits.append(sel)
        child_projs.append(jnp.einsum("bc,bce->be", sel.astype(md), wsel,
                                      preferred_element_type=jnp.float32) + bsel)
    return p_logits, child_logits, p_proj, child_projs


def _check(got, ref, rtol, atol):
    g_pl, g_cl, g_pp, g_cp = got
    r_pl, r_cl, r_pp, r_cp = ref
    np.testing.assert_allclose(np.asarray(g_pl), np.asarray(r_pl), rtol=rtol, atol=atol)
    np.testing.assert_allclose(np.asarray(g_pp), np.asarray(r_pp), rtol=rtol, atol=atol)
    for a, b in zip(g_cl, r_cl):
        np.testing.assert_allclose(np.asarray(a), np.asarray(b), rtol=rtol, atol=atol)
    for a, b in zip(g_cp, r_cp):
        np.testing.assert_allclose(np.asarray(a), np.asarray(b), rtol=rtol, atol=atol)


# ----------------------------------------------------------------------------
if __name__ == "__main__":
    B = 2
    input_dim = 32
    num_parents = 4
    proj_embed_dim = 16
    num_children_per_parent = [6, 10]
    drop_path = 0.1  # head_drop / .drop: identity in eval mode

    key = jax.random.PRNGKey(0)
    k_params, k_x = jax.random.split(key)
    params = make_params(k_params, input_dim, num_parents, proj_embed_dim,
                         num_children_per_parent)
    x = jax.random.normal(k_x, (B, input_dim), jnp.float32)

    # Exact-precision path (f32 weights) — validates PyTorch-equivalent math.
    packed_f32 = pack_params(params, weight_dtype=jnp.float32)
    out_f32 = hierarchical_classifier_forward(packed_f32, x)

    # Performance path (bf16 weights / activations on the MXU, f32 accumulate).
    packed_bf16 = pack_params(params, weight_dtype=jnp.bfloat16)
    out_bf16 = hierarchical_classifier_forward(packed_bf16, x)

    for leaf in jax.tree_util.tree_leaves((out_f32, out_bf16)):
        jax.block_until_ready(leaf)

    for out in (out_f32, out_bf16):
        p_l, c_l, p_p, c_p = out
        assert p_l.shape == (B, num_parents)
        assert p_p.shape == (B, proj_embed_dim)
        for i, c in enumerate(num_children_per_parent):
            assert c_l[i].shape == (B, c)
            assert c_p[i].shape == (B, proj_embed_dim)

    # Correctness: f32 kernel vs exact f32 reference; bf16 kernel vs a reference
    # run at matched (bf16-input, f32-accumulate) matmul precision.
    _check(out_f32, reference_forward(params, x, jnp.float32), rtol=1e-3, atol=1e-5)
    _check(out_bf16, reference_forward(params, x, jnp.bfloat16), rtol=1e-2, atol=1e-6)

    print("KERNEL_OK")
</pallas_src>

<mosaic_0001>
module attributes {stable_mosaic.version = 11 : i64} {
  func.func @kernel(%arg0: i32, %arg1: memref<8x32xf32, #tpu.memory_space<vmem>>, %arg2: memref<32x128xf32, #tpu.memory_space<vmem>>, %arg3: memref<1x128xf32, #tpu.memory_space<vmem>>, %arg4: memref<128x128xf32, #tpu.memory_space<vmem>>, %arg5: memref<1x128xf32, #tpu.memory_space<vmem>>, %arg6: memref<32x512xf32, #tpu.memory_space<vmem>>, %arg7: memref<1x512xf32, #tpu.memory_space<vmem>>, %arg8: memref<512x128xf32, #tpu.memory_space<vmem>>, %arg9: memref<128x128xf32, #tpu.memory_space<vmem>>, %arg10: memref<32x512xf32, #tpu.memory_space<vmem>>, %arg11: memref<1x512xf32, #tpu.memory_space<vmem>>, %arg12: memref<512x128xf32, #tpu.memory_space<vmem>>, %arg13: memref<128x128xf32, #tpu.memory_space<vmem>>, %arg14: memref<8x128xf32, #tpu.memory_space<vmem>>, %arg15: memref<8x128xf32, #tpu.memory_space<vmem>>, %arg16: memref<8x128xf32, #tpu.memory_space<vmem>>, %arg17: memref<8x128xf32, #tpu.memory_space<vmem>>, %arg18: memref<8x128xf32, #tpu.memory_space<vmem>>, %arg19: memref<8x128xf32, #tpu.memory_space<vmem>>) attributes {dimension_semantics = [#tpu.dimension_semantics<parallel>], iteration_bounds = array<i64: 1>, scalar_prefetch = 0 : i64, scratch_operands = 0 : i64, tpu.core_type = #tpu.core_type<tc>, window_params = [{transform_indices = @transform_0, window_bounds = array<i64: 8, 32>}, {pipeline_mode = #tpu.pipeline_mode<synchronous>, transform_indices = @transform_1, window_bounds = array<i64: 32, 128>}, {pipeline_mode = #tpu.pipeline_mode<synchronous>, transform_indices = @transform_2, window_bounds = array<i64: 1, 128>}, {pipeline_mode = #tpu.pipeline_mode<synchronous>, transform_indices = @transform_3, window_bounds = array<i64: 128, 128>}, {pipeline_mode = #tpu.pipeline_mode<synchronous>, transform_indices = @transform_4, window_bounds = array<i64: 1, 128>}, {pipeline_mode = #tpu.pipeline_mode<synchronous>, transform_indices = @transform_5, window_bounds = array<i64: 32, 512>}, {pipeline_mode = #tpu.pipeline_mode<synchronous>, transform_indices = @transform_6, window_bounds = array<i64: 1, 512>}, {pipeline_mode = #tpu.pipeline_mode<synchronous>, transform_indices = @transform_7, window_bounds = array<i64: 512, 128>}, {pipeline_mode = #tpu.pipeline_mode<synchronous>, transform_indices = @transform_8, window_bounds = array<i64: 128, 128>}, {pipeline_mode = #tpu.pipeline_mode<synchronous>, transform_indices = @transform_9, window_bounds = array<i64: 32, 512>}, {pipeline_mode = #tpu.pipeline_mode<synchronous>, transform_indices = @transform_10, window_bounds = array<i64: 1, 512>}, {pipeline_mode = #tpu.pipeline_mode<synchronous>, transform_indices = @transform_11, window_bounds = array<i64: 512, 128>}, {pipeline_mode = #tpu.pipeline_mode<synchronous>, transform_indices = @transform_12, window_bounds = array<i64: 128, 128>}, {transform_indices = @transform_13, window_bounds = array<i64: 8, 128>}, {transform_indices = @transform_14, window_bounds = array<i64: 8, 128>}, {transform_indices = @transform_15, window_bounds = array<i64: 8, 128>}, {transform_indices = @transform_16, window_bounds = array<i64: 8, 128>}, {transform_indices = @transform_17, window_bounds = array<i64: 8, 128>}, {transform_indices = @transform_18, window_bounds = array<i64: 8, 128>}]} {
    %c0 = arith.constant 0 : index
    %c0_0 = arith.constant 0 : index
    %0 = vector.load %arg1[%c0, %c0_0] : memref<8x32xf32, #tpu.memory_space<vmem>>, vector<8x32xf32>
    %c0_1 = arith.constant 0 : index
    %c0_2 = arith.constant 0 : index
    %1 = vector.load %arg2[%c0_1, %c0_2] : memref<32x128xf32, #tpu.memory_space<vmem>>, vector<32x128xf32>
    %cst = arith.constant dense<0.000000e+00> : vector<8x128xf32>
    %2 = tpu.matmul %0, %1, %cst {dimension_numbers = #tpu.dot_dimension_numbers<[1], [0], [0], [1], [0, 0, 1, 1], [], []>} : vector<8x32xf32>, vector<32x128xf32>, vector<8x128xf32> -> vector<8x128xf32>
    %c0_3 = arith.constant 0 : index
    %c0_4 = arith.constant 0 : index
    %3 = vector.load %arg3[%c0_3, %c0_4] : memref<1x128xf32, #tpu.memory_space<vmem>>, vector<1x128xf32>
    %4 = vector.broadcast %3 : vector<1x128xf32> to vector<8x128xf32>
    %5 = arith.addf %2, %4 : vector<8x128xf32>
    %6 = tpu.iota {dimensions = array<i32: 1>} : vector<8x128xi32>
    %c4_i32 = arith.constant 4 : i32
    %7 = vector.broadcast %c4_i32 : i32 to vector<8x128xi32>
    %8 = arith.cmpi slt, %6, %7 : vector<8x128xi32>
    %cst_5 = arith.constant 0.000000e+00 : f32
    %9 = vector.broadcast %cst_5 : f32 to vector<8x128xf32>
    %10 = arith.select %8, %5, %9 : vector<8x128xi1>, vector<8x128xf32>
    %cst_6 = arith.constant dense<0.000000e+00> : vector<8xf32>
    %11 = vector.multi_reduction <add>, %10, %cst_6 [1] : vector<8x128xf32> to vector<8xf32>
    %12 = vector.shape_cast %11 : vector<8xf32> to vector<8x1xf32>
    %cst_7 = arith.constant 2.500000e-01 : f32
    %13 = vector.broadcast %cst_7 : f32 to vector<8x1xf32>
    %14 = arith.mulf %12, %13 : vector<8x1xf32>
    %15 = vector.broadcast %14 : vector<8x1xf32> to vector<8x128xf32>
    %16 = arith.subf %10, %15 : vector<8x128xf32>
    %cst_8 = arith.constant 0.000000e+00 : f32
    %17 = vector.broadcast %cst_8 : f32 to vector<8x128xf32>
    %18 = arith.select %8, %16, %17 : vector<8x128xi1>, vector<8x128xf32>
    %19 = arith.mulf %18, %18 : vector<8x128xf32>
    %cst_9 = arith.constant dense<0.000000e+00> : vector<8xf32>
    %20 = vector.multi_reduction <add>, %19, %cst_9 [1] : vector<8x128xf32> to vector<8xf32>
    %21 = vector.shape_cast %20 : vector<8xf32> to vector<8x1xf32>
    %cst_10 = arith.constant 2.500000e-01 : f32
    %22 = vector.broadcast %cst_10 : f32 to vector<8x1xf32>
    %23 = arith.mulf %21, %22 : vector<8x1xf32>
    %cst_11 = arith.constant 9.99999974E-6 : f32
    %24 = vector.broadcast %cst_11 : f32 to vector<8x1xf32>
    %25 = arith.addf %23, %24 : vector<8x1xf32>
    %26 = math.rsqrt %25 : vector<8x1xf32>
    %27 = vector.broadcast %26 : vector<8x1xf32> to vector<8x128xf32>
    %28 = arith.mulf %18, %27 : vector<8x128xf32>
    %c0_12 = arith.constant 0 : index
    %c0_13 = arith.constant 0 : index
    %29 = vector.load %arg14[%c0_12, %c0_13] : memref<8x128xf32, #tpu.memory_space<vmem>>, vector<8x128xf32>
    tpu.vector_store %arg14[%c0_12, %c0_13], %28 {strides = array<i32>} : memref<8x128xf32, #tpu.memory_space<vmem>>, vector<8x128xf32>,
    %c0_14 = arith.constant 0 : index
    %c0_15 = arith.constant 0 : index
    %30 = vector.load %arg4[%c0_14, %c0_15] : memref<128x128xf32, #tpu.memory_space<vmem>>, vector<128x128xf32>
    %cst_16 = arith.constant dense<0.000000e+00> : vector<8x128xf32>
    %31 = tpu.matmul %28, %30, %cst_16 {dimension_numbers = #tpu.dot_dimension_numbers<[1], [0], [0], [1], [0, 0, 1, 1], [], []>} : vector<8x128xf32>, vector<128x128xf32>, vector<8x128xf32> -> vector<8x128xf32>
    %c0_17 = arith.constant 0 : index
    %c0_18 = arith.constant 0 : index
    %32 = vector.load %arg5[%c0_17, %c0_18] : memref<1x128xf32, #tpu.memory_space<vmem>>, vector<1x128xf32>
    %33 = vector.broadcast %32 : vector<1x128xf32> to vector<8x128xf32>
    %34 = arith.addf %31, %33 : vector<8x128xf32>
    %c0_19 = arith.constant 0 : index
    %c0_20 = arith.constant 0 : index
    %35 = vector.load %arg15[%c0_19, %c0_20] : memref<8x128xf32, #tpu.memory_space<vmem>>, vector<8x128xf32>
    tpu.vector_store %arg15[%c0_19, %c0_20], %34 {strides = array<i32>} : memref<8x128xf32, #tpu.memory_space<vmem>>, vector<8x128xf32>,
    %cst_21 = arith.constant 0xFF800000 : f32
    %36 = vector.broadcast %cst_21 : f32 to vector<8x128xf32>
    %37 = arith.select %8, %28, %36 : vector<8x128xi1>, vector<8x128xf32>
    %cst_22 = arith.constant dense<0xFF800000> : vector<8xf32>
    %38 = vector.multi_reduction <maximumf>, %37, %cst_22 [1] : vector<8x128xf32> to vector<8xf32>
    %39 = vector.shape_cast %38 : vector<8xf32> to vector<8x1xf32>
    %40 = vector.broadcast %39 : vector<8x1xf32> to vector<8x128xf32>
    %41 = arith.cmpf oeq, %37, %40 : vector<8x128xf32>
    %42 = arith.sitofp %6 : vector<8x128xi32> to vector<8x128xf32>
    %cst_23 = arith.constant 1.280000e+02 : f32
    %43 = vector.broadcast %cst_23 : f32 to vector<8x128xf32>
    %44 = arith.select %41, %42, %43 : vector<8x128xi1>, vector<8x128xf32>
    %cst_24 = arith.constant dense<0x7F800000> : vector<8xf32>
    %45 = vector.multi_reduction <minimumf>, %44, %cst_24 [1] : vector<8x128xf32> to vector<8xf32>
    %46 = vector.shape_cast %45 : vector<8xf32> to vector<8x1xf32>
    %47 = arith.fptosi %46 : vector<8x1xf32> to vector<8x1xi32>
    %48 = vector.broadcast %47 : vector<8x1xi32> to vector<8x128xi32>
    %49 = arith.cmpi eq, %6, %48 : vector<8x128xi32>
    %50 = arith.extui %49 : vector<8x128xi1> to vector<8x128xi32>
    %51 = arith.sitofp %50 : vector<8x128xi32> to vector<8x128xf32>
    %c0_25 = arith.constant 0 : index
    %c0_26 = arith.constant 0 : index
    %52 = vector.load %arg6[%c0_25, %c0_26] : memref<32x512xf32, #tpu.memory_space<vmem>>, vector<32x512xf32>
    %cst_27 = arith.constant dense<0.000000e+00> : vector<8x512xf32>
    %53 = tpu.matmul %0, %52, %cst_27 {dimension_numbers = #tpu.dot_dimension_numbers<[1], [0], [0], [1], [0, 0, 1, 1], [], []>} : vector<8x32xf32>, vector<32x512xf32>, vector<8x512xf32> -> vector<8x512xf32>
    %c0_28 = arith.constant 0 : index
    %c0_29 = arith.constant 0 : index
    %54 = vector.load %arg7[%c0_28, %c0_29] : memref<1x512xf32, #tpu.memory_space<vmem>>, vector<1x512xf32>
    %55 = vector.broadcast %54 : vector<1x512xf32> to vector<8x512xf32>
    %56 = arith.addf %53, %55 : vector<8x512xf32>
    %57 = tpu.iota {dimensions = array<i32: 1>} : vector<8x512xi32>
    %c128_i32 = arith.constant 128 : i32
    %58 = vector.broadcast %c128_i32 : i32 to vector<8x1xi32>
    %59 = arith.muli %47, %58 : vector<8x1xi32>
    %60 = vector.broadcast %59 : vector<8x1xi32> to vector<8x512xi32>
    %61 = arith.subi %57, %60 : vector<8x512xi32>
    %c0_i32 = arith.constant 0 : i32
    %62 = vector.broadcast %c0_i32 : i32 to vector<8x512xi32>
    %63 = arith.cmpi sge, %61, %62 : vector<8x512xi32>
    %c6_i32 = arith.constant 6 : i32
    %64 = vector.broadcast %c6_i32 : i32 to vector<8x512xi32>
    %65 = arith.cmpi slt, %61, %64 : vector<8x512xi32>
    %66 = arith.andi %63, %65 : vector<8x512xi1>
    %cst_30 = arith.constant 0.000000e+00 : f32
    %67 = vector.broadcast %cst_30 : f32 to vector<8x512xf32>
    %68 = arith.select %66, %56, %67 : vector<8x512xi1>, vector<8x512xf32>
    %cst_31 = arith.constant dense<0.000000e+00> : vector<8xf32>
    %69 = vector.multi_reduction <add>, %68, %cst_31 [1] : vector<8x512xf32> to vector<8xf32>
    %70 = vector.shape_cast %69 : vector<8xf32> to vector<8x1xf32>
    %cst_32 = arith.constant 0.166666672 : f32
    %71 = vector.broadcast %cst_32 : f32 to vector<8x1xf32>
    %72 = arith.mulf %70, %71 : vector<8x1xf32>
    %73 = vector.broadcast %72 : vector<8x1xf32> to vector<8x512xf32>
    %74 = arith.subf %68, %73 : vector<8x512xf32>
    %cst_33 = arith.constant 0.000000e+00 : f32
    %75 = vector.broadcast %cst_33 : f32 to vector<8x512xf32>
    %76 = arith.select %66, %74, %75 : vector<8x512xi1>, vector<8x512xf32>
    %77 = arith.mulf %76, %76 : vector<8x512xf32>
    %cst_34 = arith.constant dense<0.000000e+00> : vector<8xf32>
    %78 = vector.multi_reduction <add>, %77, %cst_34 [1] : vector<8x512xf32> to vector<8xf32>
    %79 = vector.shape_cast %78 : vector<8xf32> to vector<8x1xf32>
    %cst_35 = arith.constant 0.166666672 : f32
    %80 = vector.broadcast %cst_35 : f32 to vector<8x1xf32>
    %81 = arith.mulf %79, %80 : vector<8x1xf32>
    %cst_36 = arith.constant 9.99999974E-6 : f32
    %82 = vector.broadcast %cst_36 : f32 to vector<8x1xf32>
    %83 = arith.addf %81, %82 : vector<8x1xf32>
    %84 = math.rsqrt %83 : vector<8x1xf32>
    %85 = vector.broadcast %84 : vector<8x1xf32> to vector<8x512xf32>
    %86 = arith.mulf %76, %85 : vector<8x512xf32>
    %87 = vector.extract_strided_slice %86 {offsets = [0, 0], sizes = [8, 128], strides = [1, 1]} : vector<8x512xf32> to vector<8x128xf32>
    %88 = vector.extract_strided_slice %86 {offsets = [0, 128], sizes = [8, 128], strides = [1, 1]} : vector<8x512xf32> to vector<8x128xf32>
    %89 = vector.extract_strided_slice %86 {offsets = [0, 256], sizes = [8, 128], strides = [1, 1]} : vector<8x512xf32> to vector<8x128xf32>
    %90 = vector.extract_strided_slice %86 {offsets = [0, 384], sizes = [8, 128], strides = [1, 1]} : vector<8x512xf32> to vector<8x128xf32>
    %91 = arith.addf %87, %88 : vector<8x128xf32>
    %92 = arith.addf %89, %90 : vector<8x128xf32>
    %93 = arith.addf %91, %92 : vector<8x128xf32>
    %c0_37 = arith.constant 0 : index
    %c0_38 = arith.constant 0 : index
    %94 = vector.load %arg16[%c0_37, %c0_38] : memref<8x128xf32, #tpu.memory_space<vmem>>, vector<8x128xf32>
    tpu.vector_store %arg16[%c0_37, %c0_38], %93 {strides = array<i32>} : memref<8x128xf32, #tpu.memory_space<vmem>>, vector<8x128xf32>,
    %c0_39 = arith.constant 0 : index
    %c0_40 = arith.constant 0 : index
    %95 = vector.load %arg8[%c0_39, %c0_40] : memref<512x128xf32, #tpu.memory_space<vmem>>, vector<512x128xf32>
    %cst_41 = arith.constant dense<0.000000e+00> : vector<8x128xf32>
    %96 = tpu.matmul %86, %95, %cst_41 {dimension_numbers = #tpu.dot_dimension_numbers<[1], [0], [0], [1], [0, 0, 1, 1], [], []>} : vector<8x512xf32>, vector<512x128xf32>, vector<8x128xf32> -> vector<8x128xf32>
    %c0_42 = arith.constant 0 : index
    %c0_43 = arith.constant 0 : index
    %97 = vector.load %arg9[%c0_42, %c0_43] : memref<128x128xf32, #tpu.memory_space<vmem>>, vector<128x128xf32>
    %cst_44 = arith.constant dense<0.000000e+00> : vector<8x128xf32>
    %98 = tpu.matmul %51, %97, %cst_44 {dimension_numbers = #tpu.dot_dimension_numbers<[1], [0], [0], [1], [0, 0, 1, 1], [], []>} : vector<8x128xf32>, vector<128x128xf32>, vector<8x128xf32> -> vector<8x128xf32>
    %99 = arith.addf %96, %98 : vector<8x128xf32>
    %c0_45 = arith.constant 0 : index
    %c0_46 = arith.constant 0 : index
    %100 = vector.load %arg17[%c0_45, %c0_46] : memref<8x128xf32, #tpu.memory_space<vmem>>, vector<8x128xf32>
    tpu.vector_store %arg17[%c0_45, %c0_46], %99 {strides = array<i32>} : memref<8x128xf32, #tpu.memory_space<vmem>>, vector<8x128xf32>,
    %c0_47 = arith.constant 0 : index
    %c0_48 = arith.constant 0 : index
    %101 = vector.load %arg10[%c0_47, %c0_48] : memref<32x512xf32, #tpu.memory_space<vmem>>, vector<32x512xf32>
    %cst_49 = arith.constant dense<0.000000e+00> : vector<8x512xf32>
    %102 = tpu.matmul %0, %101, %cst_49 {dimension_numbers = #tpu.dot_dimension_numbers<[1], [0], [0], [1], [0, 0, 1, 1], [], []>} : vector<8x32xf32>, vector<32x512xf32>, vector<8x512xf32> -> vector<8x512xf32>
    %c0_50 = arith.constant 0 : index
    %c0_51 = arith.constant 0 : index
    %103 = vector.load %arg11[%c0_50, %c0_51] : memref<1x512xf32, #tpu.memory_space<vmem>>, vector<1x512xf32>
    %104 = vector.broadcast %103 : vector<1x512xf32> to vector<8x512xf32>
    %105 = arith.addf %102, %104 : vector<8x512xf32>
    %106 = tpu.iota {dimensions = array<i32: 1>} : vector<8x512xi32>
    %c128_i32_52 = arith.constant 128 : i32
    %107 = vector.broadcast %c128_i32_52 : i32 to vector<8x1xi32>
    %108 = arith.muli %47, %107 : vector<8x1xi32>
    %109 = vector.broadcast %108 : vector<8x1xi32> to vector<8x512xi32>
    %110 = arith.subi %106, %109 : vector<8x512xi32>
    %c0_i32_53 = arith.constant 0 : i32
    %111 = vector.broadcast %c0_i32_53 : i32 to vector<8x512xi32>
    %112 = arith.cmpi sge, %110, %111 : vector<8x512xi32>
    %c10_i32 = arith.constant 10 : i32
    %113 = vector.broadcast %c10_i32 : i32 to vector<8x512xi32>
    %114 = arith.cmpi slt, %110, %113 : vector<8x512xi32>
    %115 = arith.andi %112, %114 : vector<8x512xi1>
    %cst_54 = arith.constant 0.000000e+00 : f32
    %116 = vector.broadcast %cst_54 : f32 to vector<8x512xf32>
    %117 = arith.select %115, %105, %116 : vector<8x512xi1>, vector<8x512xf32>
    %cst_55 = arith.constant dense<0.000000e+00> : vector<8xf32>
    %118 = vector.multi_reduction <add>, %117, %cst_55 [1] : vector<8x512xf32> to vector<8xf32>
    %119 = vector.shape_cast %118 : vector<8xf32> to vector<8x1xf32>
    %cst_56 = arith.constant 1.000000e-01 : f32
    %120 = vector.broadcast %cst_56 : f32 to vector<8x1xf32>
    %121 = arith.mulf %119, %120 : vector<8x1xf32>
    %122 = vector.broadcast %121 : vector<8x1xf32> to vector<8x512xf32>
    %123 = arith.subf %117, %122 : vector<8x512xf32>
    %cst_57 = arith.constant 0.000000e+00 : f32
    %124 = vector.broadcast %cst_57 : f32 to vector<8x512xf32>
    %125 = arith.select %115, %123, %124 : vector<8x512xi1>, vector<8x512xf32>
    %126 = arith.mulf %125, %125 : vector<8x512xf32>
    %cst_58 = arith.constant dense<0.000000e+00> : vector<8xf32>
    %127 = vector.multi_reduction <add>, %126, %cst_58 [1] : vector<8x512xf32> to vector<8xf32>
    %128 = vector.shape_cast %127 : vector<8xf32> to vector<8x1xf32>
    %cst_59 = arith.constant 1.000000e-01 : f32
    %129 = vector.broadcast %cst_59 : f32 to vector<8x1xf32>
    %130 = arith.mulf %128, %129 : vector<8x1xf32>
    %cst_60 = arith.constant 9.99999974E-6 : f32
    %131 = vector.broadcast %cst_60 : f32 to vector<8x1xf32>
    %132 = arith.addf %130, %131 : vector<8x1xf32>
    %133 = math.rsqrt %132 : vector<8x1xf32>
    %134 = vector.broadcast %133 : vector<8x1xf32> to vector<8x512xf32>
    %135 = arith.mulf %125, %134 : vector<8x512xf32>
    %136 = vector.extract_strided_slice %135 {offsets = [0, 0], sizes = [8, 128], strides = [1, 1]} : vector<8x512xf32> to vector<8x128xf32>
    %137 = vector.extract_strided_slice %135 {offsets = [0, 128], sizes = [8, 128], strides = [1, 1]} : vector<8x512xf32> to vector<8x128xf32>
    %138 = vector.extract_strided_slice %135 {offsets = [0, 256], sizes = [8, 128], strides = [1, 1]} : vector<8x512xf32> to vector<8x128xf32>
    %139 = vector.extract_strided_slice %135 {offsets = [0, 384], sizes = [8, 128], strides = [1, 1]} : vector<8x512xf32> to vector<8x128xf32>
    %140 = arith.addf %136, %137 : vector<8x128xf32>
    %141 = arith.addf %138, %139 : vector<8x128xf32>
    %142 = arith.addf %140, %141 : vector<8x128xf32>
    %c0_61 = arith.constant 0 : index
    %c0_62 = arith.constant 0 : index
    %143 = vector.load %arg18[%c0_61, %c0_62] : memref<8x128xf32, #tpu.memory_space<vmem>>, vector<8x128xf32>
    tpu.vector_store %arg18[%c0_61, %c0_62], %142 {strides = array<i32>} : memref<8x128xf32, #tpu.memory_space<vmem>>, vector<8x128xf32>,
    %c0_63 = arith.constant 0 : index
    %c0_64 = arith.constant 0 : index
    %144 = vector.load %arg12[%c0_63, %c0_64] : memref<512x128xf32, #tpu.memory_space<vmem>>, vector<512x128xf32>
    %cst_65 = arith.constant dense<0.000000e+00> : vector<8x128xf32>
    %145 = tpu.matmul %135, %144, %cst_65 {dimension_numbers = #tpu.dot_dimension_numbers<[1], [0], [0], [1], [0, 0, 1, 1], [], []>} : vector<8x512xf32>, vector<512x128xf32>, vector<8x128xf32> -> vector<8x128xf32>
    %c0_66 = arith.constant 0 : index
    %c0_67 = arith.constant 0 : index
    %146 = vector.load %arg13[%c0_66, %c0_67] : memref<128x128xf32, #tpu.memory_space<vmem>>, vector<128x128xf32>
    %cst_68 = arith.constant dense<0.000000e+00> : vector<8x128xf32>
    %147 = tpu.matmul %51, %146, %cst_68 {dimension_numbers = #tpu.dot_dimension_numbers<[1], [0], [0], [1], [0, 0, 1, 1], [], []>} : vector<8x128xf32>, vector<128x128xf32>, vector<8x128xf32> -> vector<8x128xf32>
    %148 = arith.addf %145, %147 : vector<8x128xf32>
    %c0_69 = arith.constant 0 : index
    %c0_70 = arith.constant 0 : index
    %149 = vector.load %arg19[%c0_69, %c0_70] : memref<8x128xf32, #tpu.memory_space<vmem>>, vector<8x128xf32>
    tpu.vector_store %arg19[%c0_69, %c0_70], %148 {strides = array<i32>} : memref<8x128xf32, #tpu.memory_space<vmem>>, vector<8x128xf32>,
    return
  }
  func.func @transform_0(%arg0: i32) -> (i32, i32) {
    %c0_i32 = arith.constant 0 : i32
    %c0_i32_0 = arith.constant 0 : i32
    return %arg0, %c0_i32 : i32, i32
  }
  func.func @transform_1(%arg0: i32) -> (i32, i32) {
    %c0_i32 = arith.constant 0 : i32
    %c0_i32_0 = arith.constant 0 : i32
    %c0_i32_1 = arith.constant 0 : i32
    return %c0_i32, %c0_i32_0 : i32, i32
  }
  func.func @transform_2(%arg0: i32) -> (i32, i32) {
    %c0_i32 = arith.constant 0 : i32
    %c0_i32_0 = arith.constant 0 : i32
    %c0_i32_1 = arith.constant 0 : i32
    return %c0_i32, %c0_i32_0 : i32, i32
  }
  func.func @transform_3(%arg0: i32) -> (i32, i32) {
    %c0_i32 = arith.constant 0 : i32
    %c0_i32_0 = arith.constant 0 : i32
    %c0_i32_1 = arith.constant 0 : i32
    return %c0_i32, %c0_i32_0 : i32, i32
  }
  func.func @transform_4(%arg0: i32) -> (i32, i32) {
    %c0_i32 = arith.constant 0 : i32
    %c0_i32_0 = arith.constant 0 : i32
    %c0_i32_1 = arith.constant 0 : i32
    return %c0_i32, %c0_i32_0 : i32, i32
  }
  func.func @transform_5(%arg0: i32) -> (i32, i32) {
    %c0_i32 = arith.constant 0 : i32
    %c0_i32_0 = arith.constant 0 : i32
    %c0_i32_1 = arith.constant 0 : i32
    return %c0_i32, %c0_i32_0 : i32, i32
  }
  func.func @transform_6(%arg0: i32) -> (i32, i32) {
    %c0_i32 = arith.constant 0 : i32
    %c0_i32_0 = arith.constant 0 : i32
    %c0_i32_1 = arith.constant 0 : i32
    return %c0_i32, %c0_i32_0 : i32, i32
  }
  func.func @transform_7(%arg0: i32) -> (i32, i32) {
    %c0_i32 = arith.constant 0 : i32
    %c0_i32_0 = arith.constant 0 : i32
    %c0_i32_1 = arith.constant 0 : i32
    return %c0_i32, %c0_i32_0 : i32, i32
  }
  func.func @transform_8(%arg0: i32) -> (i32, i32) {
    %c0_i32 = arith.constant 0 : i32
    %c0_i32_0 = arith.constant 0 : i32
    %c0_i32_1 = arith.constant 0 : i32
    return %c0_i32, %c0_i32_0 : i32, i32
  }
  func.func @transform_9(%arg0: i32) -> (i32, i32) {
    %c0_i32 = arith.constant 0 : i32
    %c0_i32_0 = arith.constant 0 : i32
    %c0_i32_1 = arith.constant 0 : i32
    return %c0_i32, %c0_i32_0 : i32, i32
  }
  func.func @transform_10(%arg0: i32) -> (i32, i32) {
    %c0_i32 = arith.constant 0 : i32
    %c0_i32_0 = arith.constant 0 : i32
    %c0_i32_1 = arith.constant 0 : i32
    return %c0_i32, %c0_i32_0 : i32, i32
  }
  func.func @transform_11(%arg0: i32) -> (i32, i32) {
    %c0_i32 = arith.constant 0 : i32
    %c0_i32_0 = arith.constant 0 : i32
    %c0_i32_1 = arith.constant 0 : i32
    return %c0_i32, %c0_i32_0 : i32, i32
  }
  func.func @transform_12(%arg0: i32) -> (i32, i32) {
    %c0_i32 = arith.constant 0 : i32
    %c0_i32_0 = arith.constant 0 : i32
    %c0_i32_1 = arith.constant 0 : i32
    return %c0_i32, %c0_i32_0 : i32, i32
  }
  func.func @transform_13(%arg0: i32) -> (i32, i32) {
    %c0_i32 = arith.constant 0 : i32
    %c0_i32_0 = arith.constant 0 : i32
    return %arg0, %c0_i32 : i32, i32
  }
  func.func @transform_14(%arg0: i32) -> (i32, i32) {
    %c0_i32 = arith.constant 0 : i32
    %c0_i32_0 = arith.constant 0 : i32
    return %arg0, %c0_i32 : i32, i32
  }
  func.func @transform_15(%arg0: i32) -> (i32, i32) {
    %c0_i32 = arith.constant 0 : i32
    %c0_i32_0 = arith.constant 0 : i32
    return %arg0, %c0_i32 : i32, i32
  }
  func.func @transform_16(%arg0: i32) -> (i32, i32) {
    %c0_i32 = arith.constant 0 : i32
    %c0_i32_0 = arith.constant 0 : i32
    return %arg0, %c0_i32 : i32, i32
  }
  func.func @transform_17(%arg0: i32) -> (i32, i32) {
    %c0_i32 = arith.constant 0 : i32
    %c0_i32_0 = arith.constant 0 : i32
    return %arg0, %c0_i32 : i32, i32
  }
  func.func @transform_18(%arg0: i32) -> (i32, i32) {
    %c0_i32 = arith.constant 0 : i32
    %c0_i32_0 = arith.constant 0 : i32
    return %arg0, %c0_i32 : i32, i32
  }
}

module attributes {stable_mosaic.version = 11 : i64} {
  func.func @kernel(%arg0: i32, %arg1: memref<8x32xf32, #tpu.memory_space<vmem>>, %arg2: memref<32x128xf32, #tpu.memory_space<vmem>>, %arg3: memref<1x128xf32, #tpu.memory_space<vmem>>, %arg4: memref<128x128xf32, #tpu.memory_space<vmem>>, %arg5: memref<1x128xf32, #tpu.memory_space<vmem>>, %arg6: memref<32x512xf32, #tpu.memory_space<vmem>>, %arg7: memref<1x512xf32, #tpu.memory_space<vmem>>, %arg8: memref<512x128xf32, #tpu.memory_space<vmem>>, %arg9: memref<128x128xf32, #tpu.memory_space<vmem>>, %arg10: memref<32x512xf32, #tpu.memory_space<vmem>>, %arg11: memref<1x512xf32, #tpu.memory_space<vmem>>, %arg12: memref<512x128xf32, #tpu.memory_space<vmem>>, %arg13: memref<128x128xf32, #tpu.memory_space<vmem>>, %arg14: memref<8x128xf32, #tpu.memory_space<vmem>>, %arg15: memref<8x128xf32, #tpu.memory_space<vmem>>, %arg16: memref<8x128xf32, #tpu.memory_space<vmem>>, %arg17: memref<8x128xf32, #tpu.memory_space<vmem>>, %arg18: memref<8x128xf32, #tpu.memory_space<vmem>>, %arg19: memref<8x128xf32, #tpu.memory_space<vmem>>) attributes {dimension_semantics = [#tpu.dimension_semantics<parallel>], iteration_bounds = array<i64: 1>, scalar_prefetch = 0 : i64, scratch_operands = 0 : i64, tpu.core_type = #tpu.core_type<tc>, window_params = [{transform_indices = @transform_0, window_bounds = array<i64: 8, 32>}, {pipeline_mode = #tpu.pipeline_mode<synchronous>, transform_indices = @transform_1, window_bounds = array<i64: 32, 128>}, {pipeline_mode = #tpu.pipeline_mode<synchronous>, transform_indices = @transform_2, window_bounds = array<i64: 1, 128>}, {pipeline_mode = #tpu.pipeline_mode<synchronous>, transform_indices = @transform_3, window_bounds = array<i64: 128, 128>}, {pipeline_mode = #tpu.pipeline_mode<synchronous>, transform_indices = @transform_4, window_bounds = array<i64: 1, 128>}, {pipeline_mode = #tpu.pipeline_mode<synchronous>, transform_indices = @transform_5, window_bounds = array<i64: 32, 512>}, {pipeline_mode = #tpu.pipeline_mode<synchronous>, transform_indices = @transform_6, window_bounds = array<i64: 1, 512>}, {pipeline_mode = #tpu.pipeline_mode<synchronous>, transform_indices = @transform_7, window_bounds = array<i64: 512, 128>}, {pipeline_mode = #tpu.pipeline_mode<synchronous>, transform_indices = @transform_8, window_bounds = array<i64: 128, 128>}, {pipeline_mode = #tpu.pipeline_mode<synchronous>, transform_indices = @transform_9, window_bounds = array<i64: 32, 512>}, {pipeline_mode = #tpu.pipeline_mode<synchronous>, transform_indices = @transform_10, window_bounds = array<i64: 1, 512>}, {pipeline_mode = #tpu.pipeline_mode<synchronous>, transform_indices = @transform_11, window_bounds = array<i64: 512, 128>}, {pipeline_mode = #tpu.pipeline_mode<synchronous>, transform_indices = @transform_12, window_bounds = array<i64: 128, 128>}, {transform_indices = @transform_13, window_bounds = array<i64: 8, 128>}, {transform_indices = @transform_14, window_bounds = array<i64: 8, 128>}, {transform_indices = @transform_15, window_bounds = array<i64: 8, 128>}, {transform_indices = @transform_16, window_bounds = array<i64: 8, 128>}, {transform_indices = @transform_17, window_bounds = array<i64: 8, 128>}, {transform_indices = @transform_18, window_bounds = array<i64: 8, 128>}]} {
    %c0 = arith.constant 0 : index
    %c0_0 = arith.constant 0 : index
    %0 = vector.load %arg1[%c0, %c0_0] : memref<8x32xf32, #tpu.memory_space<vmem>>, vector<8x32xf32>
    %c0_1 = arith.constant 0 : index
    %c0_2 = arith.constant 0 : index
    %1 = vector.load %arg2[%c0_1, %c0_2] : memref<32x128xf32, #tpu.memory_space<vmem>>, vector<32x128xf32>
    %cst = arith.constant dense<0.000000e+00> : vector<8x128xf32>
    %2 = tpu.matmul %0, %1, %cst {dimension_numbers = #tpu.dot_dimension_numbers<[1], [0], [0], [1], [0, 0, 1, 1], [], []>} : vector<8x32xf32>, vector<32x128xf32>, vector<8x128xf32> -> vector<8x128xf32>
    %c0_3 = arith.constant 0 : index
    %c0_4 = arith.constant 0 : index
    %3 = vector.load %arg3[%c0_3, %c0_4] : memref<1x128xf32, #tpu.memory_space<vmem>>, vector<1x128xf32>
    %4 = vector.broadcast %3 : vector<1x128xf32> to vector<8x128xf32>
    %5 = arith.addf %2, %4 : vector<8x128xf32>
    %6 = tpu.iota {dimensions = array<i32: 1>} : vector<8x128xi32>
    %c4_i32 = arith.constant 4 : i32
    %7 = vector.broadcast %c4_i32 : i32 to vector<8x128xi32>
    %8 = arith.cmpi slt, %6, %7 : vector<8x128xi32>
    %cst_5 = arith.constant 0.000000e+00 : f32
    %9 = vector.broadcast %cst_5 : f32 to vector<8x128xf32>
    %10 = arith.select %8, %5, %9 : vector<8x128xi1>, vector<8x128xf32>
    %cst_6 = arith.constant dense<0.000000e+00> : vector<8xf32>
    %11 = vector.multi_reduction <add>, %10, %cst_6 [1] : vector<8x128xf32> to vector<8xf32>
    %12 = vector.shape_cast %11 : vector<8xf32> to vector<8x1xf32>
    %cst_7 = arith.constant 2.500000e-01 : f32
    %13 = vector.broadcast %cst_7 : f32 to vector<8x1xf32>
    %14 = arith.mulf %12, %13 : vector<8x1xf32>
    %15 = vector.broadcast %14 : vector<8x1xf32> to vector<8x128xf32>
    %16 = arith.subf %10, %15 : vector<8x128xf32>
    %cst_8 = arith.constant 0.000000e+00 : f32
    %17 = vector.broadcast %cst_8 : f32 to vector<8x128xf32>
    %18 = arith.select %8, %16, %17 : vector<8x128xi1>, vector<8x128xf32>
    %19 = arith.mulf %18, %18 : vector<8x128xf32>
    %cst_9 = arith.constant dense<0.000000e+00> : vector<8xf32>
    %20 = vector.multi_reduction <add>, %19, %cst_9 [1] : vector<8x128xf32> to vector<8xf32>
    %21 = vector.shape_cast %20 : vector<8xf32> to vector<8x1xf32>
    %cst_10 = arith.constant 2.500000e-01 : f32
    %22 = vector.broadcast %cst_10 : f32 to vector<8x1xf32>
    %23 = arith.mulf %21, %22 : vector<8x1xf32>
    %cst_11 = arith.constant 9.99999974E-6 : f32
    %24 = vector.broadcast %cst_11 : f32 to vector<8x1xf32>
    %25 = arith.addf %23, %24 : vector<8x1xf32>
    %26 = math.rsqrt %25 : vector<8x1xf32>
    %27 = vector.broadcast %26 : vector<8x1xf32> to vector<8x128xf32>
    %28 = arith.mulf %18, %27 : vector<8x128xf32>
    %c0_12 = arith.constant 0 : index
    %c0_13 = arith.constant 0 : index
    %29 = vector.load %arg14[%c0_12, %c0_13] : memref<8x128xf32, #tpu.memory_space<vmem>>, vector<8x128xf32>
    tpu.vector_store %arg14[%c0_12, %c0_13], %28 {strides = array<i32>} : memref<8x128xf32, #tpu.memory_space<vmem>>, vector<8x128xf32>,
    %c0_14 = arith.constant 0 : index
    %c0_15 = arith.constant 0 : index
    %30 = vector.load %arg4[%c0_14, %c0_15] : memref<128x128xf32, #tpu.memory_space<vmem>>, vector<128x128xf32>
    %cst_16 = arith.constant dense<0.000000e+00> : vector<8x128xf32>
    %31 = tpu.matmul %28, %30, %cst_16 {dimension_numbers = #tpu.dot_dimension_numbers<[1], [0], [0], [1], [0, 0, 1, 1], [], []>} : vector<8x128xf32>, vector<128x128xf32>, vector<8x128xf32> -> vector<8x128xf32>
    %c0_17 = arith.constant 0 : index
    %c0_18 = arith.constant 0 : index
    %32 = vector.load %arg5[%c0_17, %c0_18] : memref<1x128xf32, #tpu.memory_space<vmem>>, vector<1x128xf32>
    %33 = vector.broadcast %32 : vector<1x128xf32> to vector<8x128xf32>
    %34 = arith.addf %31, %33 : vector<8x128xf32>
    %c0_19 = arith.constant 0 : index
    %c0_20 = arith.constant 0 : index
    %35 = vector.load %arg15[%c0_19, %c0_20] : memref<8x128xf32, #tpu.memory_space<vmem>>, vector<8x128xf32>
    tpu.vector_store %arg15[%c0_19, %c0_20], %34 {strides = array<i32>} : memref<8x128xf32, #tpu.memory_space<vmem>>, vector<8x128xf32>,
    %cst_21 = arith.constant 0xFF800000 : f32
    %36 = vector.broadcast %cst_21 : f32 to vector<8x128xf32>
    %37 = arith.select %8, %28, %36 : vector<8x128xi1>, vector<8x128xf32>
    %cst_22 = arith.constant dense<0xFF800000> : vector<8xf32>
    %38 = vector.multi_reduction <maximumf>, %37, %cst_22 [1] : vector<8x128xf32> to vector<8xf32>
    %39 = vector.shape_cast %38 : vector<8xf32> to vector<8x1xf32>
    %40 = vector.broadcast %39 : vector<8x1xf32> to vector<8x128xf32>
    %41 = arith.cmpf oeq, %37, %40 : vector<8x128xf32>
    %42 = arith.sitofp %6 : vector<8x128xi32> to vector<8x128xf32>
    %cst_23 = arith.constant 1.280000e+02 : f32
    %43 = vector.broadcast %cst_23 : f32 to vector<8x128xf32>
    %44 = arith.select %41, %42, %43 : vector<8x128xi1>, vector<8x128xf32>
    %cst_24 = arith.constant dense<0x7F800000> : vector<8xf32>
    %45 = vector.multi_reduction <minimumf>, %44, %cst_24 [1] : vector<8x128xf32> to vector<8xf32>
    %46 = vector.shape_cast %45 : vector<8xf32> to vector<8x1xf32>
    %47 = arith.fptosi %46 : vector<8x1xf32> to vector<8x1xi32>
    %48 = vector.broadcast %47 : vector<8x1xi32> to vector<8x128xi32>
    %49 = arith.cmpi eq, %6, %48 : vector<8x128xi32>
    %50 = arith.extui %49 : vector<8x128xi1> to vector<8x128xi32>
    %51 = arith.sitofp %50 : vector<8x128xi32> to vector<8x128xf32>
    %c0_25 = arith.constant 0 : index
    %c0_26 = arith.constant 0 : index
    %52 = vector.load %arg6[%c0_25, %c0_26] : memref<32x512xf32, #tpu.memory_space<vmem>>, vector<32x512xf32>
    %cst_27 = arith.constant dense<0.000000e+00> : vector<8x512xf32>
    %53 = tpu.matmul %0, %52, %cst_27 {dimension_numbers = #tpu.dot_dimension_numbers<[1], [0], [0], [1], [0, 0, 1, 1], [], []>} : vector<8x32xf32>, vector<32x512xf32>, vector<8x512xf32> -> vector<8x512xf32>
    %c0_28 = arith.constant 0 : index
    %c0_29 = arith.constant 0 : index
    %54 = vector.load %arg7[%c0_28, %c0_29] : memref<1x512xf32, #tpu.memory_space<vmem>>, vector<1x512xf32>
    %55 = vector.broadcast %54 : vector<1x512xf32> to vector<8x512xf32>
    %56 = arith.addf %53, %55 : vector<8x512xf32>
    %57 = tpu.iota {dimensions = array<i32: 1>} : vector<8x512xi32>
    %c128_i32 = arith.constant 128 : i32
    %58 = vector.broadcast %c128_i32 : i32 to vector<8x1xi32>
    %59 = arith.muli %47, %58 : vector<8x1xi32>
    %60 = vector.broadcast %59 : vector<8x1xi32> to vector<8x512xi32>
    %61 = arith.subi %57, %60 : vector<8x512xi32>
    %c0_i32 = arith.constant 0 : i32
    %62 = vector.broadcast %c0_i32 : i32 to vector<8x512xi32>
    %63 = arith.cmpi sge, %61, %62 : vector<8x512xi32>
    %c6_i32 = arith.constant 6 : i32
    %64 = vector.broadcast %c6_i32 : i32 to vector<8x512xi32>
    %65 = arith.cmpi slt, %61, %64 : vector<8x512xi32>
    %66 = arith.andi %63, %65 : vector<8x512xi1>
    %cst_30 = arith.constant 0.000000e+00 : f32
    %67 = vector.broadcast %cst_30 : f32 to vector<8x512xf32>
    %68 = arith.select %66, %56, %67 : vector<8x512xi1>, vector<8x512xf32>
    %cst_31 = arith.constant dense<0.000000e+00> : vector<8xf32>
    %69 = vector.multi_reduction <add>, %68, %cst_31 [1] : vector<8x512xf32> to vector<8xf32>
    %70 = vector.shape_cast %69 : vector<8xf32> to vector<8x1xf32>
    %cst_32 = arith.constant 0.166666672 : f32
    %71 = vector.broadcast %cst_32 : f32 to vector<8x1xf32>
    %72 = arith.mulf %70, %71 : vector<8x1xf32>
    %73 = vector.broadcast %72 : vector<8x1xf32> to vector<8x512xf32>
    %74 = arith.subf %68, %73 : vector<8x512xf32>
    %cst_33 = arith.constant 0.000000e+00 : f32
    %75 = vector.broadcast %cst_33 : f32 to vector<8x512xf32>
    %76 = arith.select %66, %74, %75 : vector<8x512xi1>, vector<8x512xf32>
    %77 = arith.mulf %76, %76 : vector<8x512xf32>
    %cst_34 = arith.constant dense<0.000000e+00> : vector<8xf32>
    %78 = vector.multi_reduction <add>, %77, %cst_34 [1] : vector<8x512xf32> to vector<8xf32>
    %79 = vector.shape_cast %78 : vector<8xf32> to vector<8x1xf32>
    %cst_35 = arith.constant 0.166666672 : f32
    %80 = vector.broadcast %cst_35 : f32 to vector<8x1xf32>
    %81 = arith.mulf %79, %80 : vector<8x1xf32>
    %cst_36 = arith.constant 9.99999974E-6 : f32
    %82 = vector.broadcast %cst_36 : f32 to vector<8x1xf32>
    %83 = arith.addf %81, %82 : vector<8x1xf32>
    %84 = math.rsqrt %83 : vector<8x1xf32>
    %85 = vector.broadcast %84 : vector<8x1xf32> to vector<8x512xf32>
    %86 = arith.mulf %76, %85 : vector<8x512xf32>
    %87 = vector.extract_strided_slice %86 {offsets = [0, 0], sizes = [8, 128], strides = [1, 1]} : vector<8x512xf32> to vector<8x128xf32>
    %88 = vector.extract_strided_slice %86 {offsets = [0, 128], sizes = [8, 128], strides = [1, 1]} : vector<8x512xf32> to vector<8x128xf32>
    %89 = vector.extract_strided_slice %86 {offsets = [0, 256], sizes = [8, 128], strides = [1, 1]} : vector<8x512xf32> to vector<8x128xf32>
    %90 = vector.extract_strided_slice %86 {offsets = [0, 384], sizes = [8, 128], strides = [1, 1]} : vector<8x512xf32> to vector<8x128xf32>
    %91 = arith.addf %87, %88 : vector<8x128xf32>
    %92 = arith.addf %89, %90 : vector<8x128xf32>
    %93 = arith.addf %91, %92 : vector<8x128xf32>
    %c0_37 = arith.constant 0 : index
    %c0_38 = arith.constant 0 : index
    %94 = vector.load %arg16[%c0_37, %c0_38] : memref<8x128xf32, #tpu.memory_space<vmem>>, vector<8x128xf32>
    tpu.vector_store %arg16[%c0_37, %c0_38], %93 {strides = array<i32>} : memref<8x128xf32, #tpu.memory_space<vmem>>, vector<8x128xf32>,
    %c0_39 = arith.constant 0 : index
    %c0_40 = arith.constant 0 : index
    %95 = vector.load %arg8[%c0_39, %c0_40] : memref<512x128xf32, #tpu.memory_space<vmem>>, vector<512x128xf32>
    %cst_41 = arith.constant dense<0.000000e+00> : vector<8x128xf32>
    %96 = tpu.matmul %86, %95, %cst_41 {dimension_numbers = #tpu.dot_dimension_numbers<[1], [0], [0], [1], [0, 0, 1, 1], [], []>} : vector<8x512xf32>, vector<512x128xf32>, vector<8x128xf32> -> vector<8x128xf32>
    %c0_42 = arith.constant 0 : index
    %c0_43 = arith.constant 0 : index
    %97 = vector.load %arg9[%c0_42, %c0_43] : memref<128x128xf32, #tpu.memory_space<vmem>>, vector<128x128xf32>
    %cst_44 = arith.constant dense<0.000000e+00> : vector<8x128xf32>
    %98 = tpu.matmul %51, %97, %cst_44 {dimension_numbers = #tpu.dot_dimension_numbers<[1], [0], [0], [1], [0, 0, 1, 1], [], []>} : vector<8x128xf32>, vector<128x128xf32>, vector<8x128xf32> -> vector<8x128xf32>
    %99 = arith.addf %96, %98 : vector<8x128xf32>
    %c0_45 = arith.constant 0 : index
    %c0_46 = arith.constant 0 : index
    %100 = vector.load %arg17[%c0_45, %c0_46] : memref<8x128xf32, #tpu.memory_space<vmem>>, vector<8x128xf32>
    tpu.vector_store %arg17[%c0_45, %c0_46], %99 {strides = array<i32>} : memref<8x128xf32, #tpu.memory_space<vmem>>, vector<8x128xf32>,
    %c0_47 = arith.constant 0 : index
    %c0_48 = arith.constant 0 : index
    %101 = vector.load %arg10[%c0_47, %c0_48] : memref<32x512xf32, #tpu.memory_space<vmem>>, vector<32x512xf32>
    %cst_49 = arith.constant dense<0.000000e+00> : vector<8x512xf32>
    %102 = tpu.matmul %0, %101, %cst_49 {dimension_numbers = #tpu.dot_dimension_numbers<[1], [0], [0], [1], [0, 0, 1, 1], [], []>} : vector<8x32xf32>, vector<32x512xf32>, vector<8x512xf32> -> vector<8x512xf32>
    %c0_50 = arith.constant 0 : index
    %c0_51 = arith.constant 0 : index
    %103 = vector.load %arg11[%c0_50, %c0_51] : memref<1x512xf32, #tpu.memory_space<vmem>>, vector<1x512xf32>
    %104 = vector.broadcast %103 : vector<1x512xf32> to vector<8x512xf32>
    %105 = arith.addf %102, %104 : vector<8x512xf32>
    %106 = tpu.iota {dimensions = array<i32: 1>} : vector<8x512xi32>
    %c128_i32_52 = arith.constant 128 : i32
    %107 = vector.broadcast %c128_i32_52 : i32 to vector<8x1xi32>
    %108 = arith.muli %47, %107 : vector<8x1xi32>
    %109 = vector.broadcast %108 : vector<8x1xi32> to vector<8x512xi32>
    %110 = arith.subi %106, %109 : vector<8x512xi32>
    %c0_i32_53 = arith.constant 0 : i32
    %111 = vector.broadcast %c0_i32_53 : i32 to vector<8x512xi32>
    %112 = arith.cmpi sge, %110, %111 : vector<8x512xi32>
    %c10_i32 = arith.constant 10 : i32
    %113 = vector.broadcast %c10_i32 : i32 to vector<8x512xi32>
    %114 = arith.cmpi slt, %110, %113 : vector<8x512xi32>
    %115 = arith.andi %112, %114 : vector<8x512xi1>
    %cst_54 = arith.constant 0.000000e+00 : f32
    %116 = vector.broadcast %cst_54 : f32 to vector<8x512xf32>
    %117 = arith.select %115, %105, %116 : vector<8x512xi1>, vector<8x512xf32>
    %cst_55 = arith.constant dense<0.000000e+00> : vector<8xf32>
    %118 = vector.multi_reduction <add>, %117, %cst_55 [1] : vector<8x512xf32> to vector<8xf32>
    %119 = vector.shape_cast %118 : vector<8xf32> to vector<8x1xf32>
    %cst_56 = arith.constant 1.000000e-01 : f32
    %120 = vector.broadcast %cst_56 : f32 to vector<8x1xf32>
    %121 = arith.mulf %119, %120 : vector<8x1xf32>
    %122 = vector.broadcast %121 : vector<8x1xf32> to vector<8x512xf32>
    %123 = arith.subf %117, %122 : vector<8x512xf32>
    %cst_57 = arith.constant 0.000000e+00 : f32
    %124 = vector.broadcast %cst_57 : f32 to vector<8x512xf32>
    %125 = arith.select %115, %123, %124 : vector<8x512xi1>, vector<8x512xf32>
    %126 = arith.mulf %125, %125 : vector<8x512xf32>
    %cst_58 = arith.constant dense<0.000000e+00> : vector<8xf32>
    %127 = vector.multi_reduction <add>, %126, %cst_58 [1] : vector<8x512xf32> to vector<8xf32>
    %128 = vector.shape_cast %127 : vector<8xf32> to vector<8x1xf32>
    %cst_59 = arith.constant 1.000000e-01 : f32
    %129 = vector.broadcast %cst_59 : f32 to vector<8x1xf32>
    %130 = arith.mulf %128, %129 : vector<8x1xf32>
    %cst_60 = arith.constant 9.99999974E-6 : f32
    %131 = vector.broadcast %cst_60 : f32 to vector<8x1xf32>
    %132 = arith.addf %130, %131 : vector<8x1xf32>
    %133 = math.rsqrt %132 : vector<8x1xf32>
    %134 = vector.broadcast %133 : vector<8x1xf32> to vector<8x512xf32>
    %135 = arith.mulf %125, %134 : vector<8x512xf32>
    %136 = vector.extract_strided_slice %135 {offsets = [0, 0], sizes = [8, 128], strides = [1, 1]} : vector<8x512xf32> to vector<8x128xf32>
    %137 = vector.extract_strided_slice %135 {offsets = [0, 128], sizes = [8, 128], strides = [1, 1]} : vector<8x512xf32> to vector<8x128xf32>
    %138 = vector.extract_strided_slice %135 {offsets = [0, 256], sizes = [8, 128], strides = [1, 1]} : vector<8x512xf32> to vector<8x128xf32>
    %139 = vector.extract_strided_slice %135 {offsets = [0, 384], sizes = [8, 128], strides = [1, 1]} : vector<8x512xf32> to vector<8x128xf32>
    %140 = arith.addf %136, %137 : vector<8x128xf32>
    %141 = arith.addf %138, %139 : vector<8x128xf32>
    %142 = arith.addf %140, %141 : vector<8x128xf32>
    %c0_61 = arith.constant 0 : index
    %c0_62 = arith.constant 0 : index
    %143 = vector.load %arg18[%c0_61, %c0_62] : memref<8x128xf32, #tpu.memory_space<vmem>>, vector<8x128xf32>
    tpu.vector_store %arg18[%c0_61, %c0_62], %142 {strides = array<i32>} : memref<8x128xf32, #tpu.memory_space<vmem>>, vector<8x128xf32>,
    %c0_63 = arith.constant 0 : index
    %c0_64 = arith.constant 0 : index
    %144 = vector.load %arg12[%c0_63, %c0_64] : memref<512x128xf32, #tpu.memory_space<vmem>>, vector<512x128xf32>
    %cst_65 = arith.constant dense<0.000000e+00> : vector<8x128xf32>
    %145 = tpu.matmul %135, %144, %cst_65 {dimension_numbers = #tpu.dot_dimension_numbers<[1], [0], [0], [1], [0, 0, 1, 1], [], []>} : vector<8x512xf32>, vector<512x128xf32>, vector<8x128xf32> -> vector<8x128xf32>
    %c0_66 = arith.constant 0 : index
    %c0_67 = arith.constant 0 : index
    %146 = vector.load %arg13[%c0_66, %c0_67] : memref<128x128xf32, #tpu.memory_space<vmem>>, vector<128x128xf32>
    %cst_68 = arith.constant dense<0.000000e+00> : vector<8x128xf32>
    %147 = tpu.matmul %51, %146, %cst_68 {dimension_numbers = #tpu.dot_dimension_numbers<[1], [0], [0], [1], [0, 0, 1, 1], [], []>} : vector<8x128xf32>, vector<128x128xf32>, vector<8x128xf32> -> vector<8x128xf32>
    %148 = arith.addf %145, %147 : vector<8x128xf32>
    %c0_69 = arith.constant 0 : index
    %c0_70 = arith.constant 0 : index
    %149 = vector.load %arg19[%c0_69, %c0_70] : memref<8x128xf32, #tpu.memory_space<vmem>>, vector<8x128xf32>
    tpu.vector_store %arg19[%c0_69, %c0_70], %148 {strides = array<i32>} : memref<8x128xf32, #tpu.memory_space<vmem>>, vector<8x128xf32>,
    return
  }
  func.func @transform_0(%arg0: i32) -> (i32, i32) {
    %c0_i32 = arith.constant 0 : i32
    %c0_i32_0 = arith.constant 0 : i32
    return %arg0, %c0_i32 : i32, i32
  }
  func.func @transform_1(%arg0: i32) -> (i32, i32) {
    %c0_i32 = arith.constant 0 : i32
    %c0_i32_0 = arith.constant 0 : i32
    %c0_i32_1 = arith.constant 0 : i32
    return %c0_i32, %c0_i32_0 : i32, i32
  }
  func.func @transform_2(%arg0: i32) -> (i32, i32) {
    %c0_i32 = arith.constant 0 : i32
    %c0_i32_0 = arith.constant 0 : i32
    %c0_i32_1 = arith.constant 0 : i32
    return %c0_i32, %c0_i32_0 : i32, i32
  }
  func.func @transform_3(%arg0: i32) -> (i32, i32) {
    %c0_i32 = arith.constant 0 : i32
    %c0_i32_0 = arith.constant 0 : i32
    %c0_i32_1 = arith.constant 0 : i32
    return %c0_i32, %c0_i32_0 : i32, i32
  }
  func.func @transform_4(%arg0: i32) -> (i32, i32) {
    %c0_i32 = arith.constant 0 : i32
    %c0_i32_0 = arith.constant 0 : i32
    %c0_i32_1 = arith.constant 0 : i32
    return %c0_i32, %c0_i32_0 : i32, i32
  }
  func.func @transform_5(%arg0: i32) -> (i32, i32) {
    %c0_i32 = arith.constant 0 : i32
    %c0_i32_0 = arith.constant 0 : i32
    %c0_i32_1 = arith.constant 0 : i32
    return %c0_i32, %c0_i32_0 : i32, i32
  }
  func.func @transform_6(%arg0: i32) -> (i32, i32) {
    %c0_i32 = arith.constant 0 : i32
    %c0_i32_0 = arith.constant 0 : i32
    %c0_i32_1 = arith.constant 0 : i32
    return %c0_i32, %c0_i32_0 : i32, i32
  }
  func.func @transform_7(%arg0: i32) -> (i32, i32) {
    %c0_i32 = arith.constant 0 : i32
    %c0_i32_0 = arith.constant 0 : i32
    %c0_i32_1 = arith.constant 0 : i32
    return %c0_i32, %c0_i32_0 : i32, i32
  }
  func.func @transform_8(%arg0: i32) -> (i32, i32) {
    %c0_i32 = arith.constant 0 : i32
    %c0_i32_0 = arith.constant 0 : i32
    %c0_i32_1 = arith.constant 0 : i32
    return %c0_i32, %c0_i32_0 : i32, i32
  }
  func.func @transform_9(%arg0: i32) -> (i32, i32) {
    %c0_i32 = arith.constant 0 : i32
    %c0_i32_0 = arith.constant 0 : i32
    %c0_i32_1 = arith.constant 0 : i32
    return %c0_i32, %c0_i32_0 : i32, i32
  }
  func.func @transform_10(%arg0: i32) -> (i32, i32) {
    %c0_i32 = arith.constant 0 : i32
    %c0_i32_0 = arith.constant 0 : i32
    %c0_i32_1 = arith.constant 0 : i32
    return %c0_i32, %c0_i32_0 : i32, i32
  }
  func.func @transform_11(%arg0: i32) -> (i32, i32) {
    %c0_i32 = arith.constant 0 : i32
    %c0_i32_0 = arith.constant 0 : i32
    %c0_i32_1 = arith.constant 0 : i32
    return %c0_i32, %c0_i32_0 : i32, i32
  }
  func.func @transform_12(%arg0: i32) -> (i32, i32) {
    %c0_i32 = arith.constant 0 : i32
    %c0_i32_0 = arith.constant 0 : i32
    %c0_i32_1 = arith.constant 0 : i32
    return %c0_i32, %c0_i32_0 : i32, i32
  }
  func.func @transform_13(%arg0: i32) -> (i32, i32) {
    %c0_i32 = arith.constant 0 : i32
    %c0_i32_0 = arith.constant 0 : i32
    return %arg0, %c0_i32 : i32, i32
  }
  func.func @transform_14(%arg0: i32) -> (i32, i32) {
    %c0_i32 = arith.constant 0 : i32
    %c0_i32_0 = arith.constant 0 : i32
    return %arg0, %c0_i32 : i32, i32
  }
  func.func @transform_15(%arg0: i32) -> (i32, i32) {
    %c0_i32 = arith.constant 0 : i32
    %c0_i32_0 = arith.constant 0 : i32
    return %arg0, %c0_i32 : i32, i32
  }
  func.func @transform_16(%arg0: i32) -> (i32, i32) {
    %c0_i32 = arith.constant 0 : i32
    %c0_i32_0 = arith.constant 0 : i32
    return %arg0, %c0_i32 : i32, i32
  }
  func.func @transform_17(%arg0: i32) -> (i32, i32) {
    %c0_i32 = arith.constant 0 : i32
    %c0_i32_0 = arith.constant 0 : i32
    return %arg0, %c0_i32 : i32, i32
  }
  func.func @transform_18(%arg0: i32) -> (i32, i32) {
    %c0_i32 = arith.constant 0 : i32
    %c0_i32_0 = arith.constant 0 : i32
    return %arg0, %c0_i32 : i32, i32
  }
}

</mosaic_0001>

<bundles_post_ra>
// kernel: tpu_custom_call.1
= control target key start
LH: loop header
LB: loop body
LE: loop exit
PB: predicated region body
PF: predicated region fallthrough
CT: control target
= control target key end

     0   :  { %s3066_s0 = inlined_call_operand.hbm [shape: f32[8,32], index: 0, kind: input, shape index: {}]   ;;  %s3067_s1 = inlined_call_operand.hbm [shape: f32[32,128], index: 1, kind: input, shape index: {}]   ;;  %s3068_s2 = inlined_call_operand.vmem [shape: f32[1,128], index: 2, kind: input, shape index: {}]   ;;  %s3069_s3 = inlined_call_operand.hbm [shape: f32[128,128], index: 3, kind: input, shape index: {}]   ;;  %s3070_s4 = inlined_call_operand.vmem [shape: f32[1,128], index: 4, kind: input, shape index: {}]   ;;  %s3071_s5 = inlined_call_operand.hbm [shape: f32[32,512], index: 5, kind: input, shape index: {}]   ;;  %s3072_s6 = inlined_call_operand.vmem [shape: f32[1,512], index: 6, kind: input, shape index: {}]   ;;  %s3073_s7 = inlined_call_operand.hbm [shape: f32[512,128], index: 7, kind: input, shape index: {}]   ;;  %s3074_s8 = inlined_call_operand.hbm [shape: f32[128,128], index: 8, kind: input, shape index: {}]   ;;  %s3075_s9 = inlined_call_operand.hbm [shape: f32[32,512], index: 9, kind: input, shape index: {}]   ;;  %s3076_s10 = inlined_call_operand.vmem [shape: f32[1,512], index: 10, kind: input, shape index: {}]   ;;  %s3077_s11 = inlined_call_operand.hbm [shape: f32[512,128], index: 11, kind: input, shape index: {}]   ;;  %s3078_s12 = inlined_call_operand.hbm [shape: f32[128,128], index: 12, kind: input, shape index: {}]   ;;  %s3079_s13 = inlined_call_operand.hbm [shape: f32[8,128], index: 13, kind: output, shape index: {0}]   ;;  %s3080_s14 = inlined_call_operand.hbm [shape: f32[8,128], index: 14, kind: output, shape index: {1}]   ;;  %s3081_s15 = inlined_call_operand.hbm [shape: f32[8,128], index: 15, kind: output, shape index: {2}]   ;;  %s3082_s16 = inlined_call_operand.hbm [shape: f32[8,128], index: 16, kind: output, shape index: {3}]   ;;  %s3083_s17 = inlined_call_operand.hbm [shape: f32[8,128], index: 17, kind: output, shape index: {4}]   ;;  %s3084_s18 = inlined_call_operand.hbm [shape: f32[8,128], index: 18, kind: output, shape index: {5}]  }
   0x1   :  { %3095 = sst [smem:[#allocation35_spill]] %s3066_s0 }
   0x2   :  { %3096 = sst [smem:[#allocation36_spill]] %s3067_s1 }
   0x3   :  { %3097 = sst [smem:[#allocation37_spill]] %s3068_s2 }
   0x4   :  { %3098 = sst [smem:[#allocation38_spill]] %s3084_s18 }
   0x5   :  { %24 = vsyncpa [#allocation3], 0 }
   0x6   :  { %25 = vsyncpa [#allocation6], 0 }
   0x7   :  { %26 = vsyncpa [#allocation9], 0 }
   0x8   :  { %27 = vsyncpa [#allocation12], 0 }
   0x9   :  { %28 = vsyncpa [#allocation15], 0 }
   0xa   :  { %29 = vsyncpa [#allocation4], 0 }
   0xb   :  { %30 = vsyncpa [#allocation19], 0 }
   0xc   :  { %31 = vsyncpa [#allocation22], 0 }
   0xd   :  { %32 = vsyncpa [#allocation25], 0  ;;  %s2455_s27 = smov [#allocation5]   ;;  %s3099_s0 = sld [smem:[#allocation36_spill]] }
   0xe   :  { %s48_s28 = sshll.u32 %s2455_s27, 4  ;;  %s49_s28 = int_to_ptr.vmem [resolvable:$true] %s48_s28 }
  0x13   :  { %s2107_s19 = scalar_lea.hbm %s3099_s0, 512 }
  0x14   :  { %p2108_p0 = scmp.ne.s32.totalorder %s3099_s0, %s2107_s19  ;;  %p2111_p1 = scmp.lt.u32.totalorder %s2107_s19, %s3099_s0 }
  0x16   :  { %p2113_p2 = pnand %p2111_p1, %p2108_p0 }
  0x18   :  { %2116 = shalt.err (!%p2113_p2)
}
  0x19   :  { %s2117_s2 = scalar_lea.vmem %s49_s28, 512  ;;  %p2122_p4 = scmp.lt.s32.totalorder %s49_s28, %s49_s28 }
  0x1a   :  { %p2118_p3 = scmp.ne.s32.totalorder %s49_s28, %s2117_s2  ;;  %p2123_p5 = scmp.lt.s32.totalorder %s2117_s2, %s2117_s2 }
  0x1c   :  { %p2124_p6 = por %p2123_p5, %p2122_p4 }
  0x1e   :  { %p2125_p7 = pnand %p2124_p6, %p2118_p3 }
  0x20   :  { %2128 = shalt.err (!%p2125_p7)
}
  0x21   :  { %s3088_s23 = smov 128   ;;  %s3090_s24 = smov 8  }
  0x22   :  { %54 = dma.hbm_to_vmem [thread:$0]  %s3099_s0, 512, %s49_s28, [#allocation6], %s3088_s23, %s3088_s23, %s3090_s24  }
  0x23   :  { %s2458_s27 = smov [#allocation8]   ;;  %s2129_s1 = scalar_lea.hbm %s3071_s5, 2048 }
  0x24   :  { %s76_s29 = sshll.u32 %s2458_s27, 4  ;;  %p2130_p8 = scmp.ne.s32.totalorder %s3071_s5, %s2129_s1  ;;  %s77_s29 = int_to_ptr.vmem [resolvable:$true] %s76_s29 }
  0x25   :  { %p2133_p9 = scmp.lt.u32.totalorder %s2129_s1, %s3071_s5 }
  0x27   :  { %p2135_p10 = pnand %p2133_p9, %p2130_p8 }
  0x29   :  { %2138 = shalt.err (!%p2135_p10)
}
  0x2a   :  { %s2139_s18 = scalar_lea.vmem %s77_s29, 2048  ;;  %p2144_p12 = scmp.lt.s32.totalorder %s77_s29, %s77_s29 }
  0x2b   :  { %p2140_p11 = scmp.ne.s32.totalorder %s77_s29, %s2139_s18  ;;  %p2145_p13 = scmp.lt.s32.totalorder %s2139_s18, %s2139_s18 }
  0x2d   :  { %p2146_p0 = por %p2145_p13, %p2144_p12 }
  0x2f   :  { %p2147_p1 = pnand %p2146_p0, %p2140_p11 }
  0x31   :  { %2150 = shalt.err (!%p2147_p1)
}
  0x32   :  { %s3092_s28 = smov 512   ;;  %s2460_s0 = smov 32  }
  0x33   :  { %82 = dma.hbm_to_vmem [thread:$0]  %s3071_s5, 2048, %s77_s29, [#allocation9], %s3092_s28, %s3092_s28, %s2460_s0  }
  0x34   :  { %s2461_s27 = smov [#allocation11]   ;;  %s2462_s19 = smov [#allocation14]  }
  0x35   :  { %s102_s30 = sshll.u32 %s2461_s27, 4  ;;  %s128_s1 = sshll.u32 %s2462_s19, 4  ;;  %s103_s30 = int_to_ptr.vmem [resolvable:$true] %s102_s30  ;;  %s2603_s1 = int_to_ptr.vmem [resolvable:$true] %s128_s1 }
  0x36   :  { %s2151_s21 = scalar_lea.hbm %s3074_s8, 2048 }
  0x37   :  { %p2152_p2 = scmp.ne.s32.totalorder %s3074_s8, %s2151_s21  ;;  %p2155_p3 = scmp.lt.u32.totalorder %s2151_s21, %s3074_s8 }
  0x39   :  { %p2157_p4 = pnand %p2155_p3, %p2152_p2 }
  0x3b   :  { %2160 = shalt.err (!%p2157_p4)
}
  0x3c   :  { %s2161_s5 = scalar_lea.vmem %s103_s30, 2048  ;;  %p2166_p6 = scmp.lt.s32.totalorder %s103_s30, %s103_s30 }
  0x3d   :  { %p2162_p5 = scmp.ne.s32.totalorder %s103_s30, %s2161_s5  ;;  %p2167_p7 = scmp.lt.s32.totalorder %s2161_s5, %s2161_s5 }
  0x3f   :  { %p2168_p8 = por %p2167_p7, %p2166_p6 }
  0x41   :  { %p2169_p9 = pnand %p2168_p8, %p2162_p5 }
  0x43   :  { %2172 = shalt.err (!%p2169_p9)
}
  0x44   :  { %s3100_s29 = smov 8   ;;  %s3101_s25 = smov 128  }
  0x45   :  { %108 = dma.hbm_to_vmem [thread:$0]  %s3074_s8, 2048, %s103_s30, [#allocation12], %s3101_s25, %s3101_s25, %s3100_s29  }
  0x46   :  { %s2173_s23 = scalar_lea.hbm %s3077_s11, 8192 }
  0x47   :  { %p2174_p10 = scmp.ne.s32.totalorder %s3077_s11, %s2173_s23  ;;  %p2177_p11 = scmp.lt.u32.totalorder %s2173_s23, %s3077_s11 }
  0x49   :  { %p2179_p12 = pnand %p2177_p11, %p2174_p10 }
  0x4b   :  { %2182 = shalt.err (!%p2179_p12)
}
  0x4c   :  { %s2183_s2 = scalar_lea.vmem %s2603_s1, 8192  ;;  %p2188_p0 = scmp.lt.s32.totalorder %s2603_s1, %s2603_s1 }
  0x4d   :  { %p2184_p13 = scmp.ne.s32.totalorder %s2603_s1, %s2183_s2  ;;  %p2189_p1 = scmp.lt.s32.totalorder %s2183_s2, %s2183_s2 }
  0x4f   :  { %p2190_p2 = por %p2189_p1, %p2188_p0 }
  0x51   :  { %p2191_p3 = pnand %p2190_p2, %p2184_p13 }
  0x53   :  { %2194 = shalt.err (!%p2191_p3)
}
  0x54   :  { %134 = dma.hbm_to_vmem [thread:$0]  %s3077_s11, 8192, %s2603_s1, [#allocation15], %s3101_s25, %s3101_s25, %s3100_s29  }
  0x55   :  { %s2463_s5 = smov [#allocation2]   ;;  %s2464_s27 = smov [#allocation7]  }
  0x56   :  { %s39_s26 = sshll.u32 %s2463_s5, 4  ;;  %s62_s19 = sshll.u32 %s2464_s27, 4  ;;  %s40_s26 = int_to_ptr.vmem [resolvable:$true] %s39_s26  ;;  %s2640_s19 = int_to_ptr.vmem [resolvable:$true] %s62_s19 }
  0x57   :  { %s3102_s24 = sld [smem:[#allocation35_spill]] }
  0x5d   :  { %s2195_s20 = scalar_lea.hbm %s3102_s24, 128 }
  0x5e   :  { %p2196_p4 = scmp.ne.s32.totalorder %s3102_s24, %s2195_s20  ;;  %p2199_p5 = scmp.lt.u32.totalorder %s2195_s20, %s3102_s24 }
  0x60   :  { %p2201_p6 = pnand %p2199_p5, %p2196_p4 }
  0x62   :  { %2204 = shalt.err (!%p2201_p6)
}
  0x63   :  { %s2205_s11 = scalar_lea.vmem %s40_s26, 128  ;;  %p2210_p8 = scmp.lt.s32.totalorder %s40_s26, %s40_s26 }
  0x64   :  { %p2206_p7 = scmp.ne.s32.totalorder %s40_s26, %s2205_s11  ;;  %p2211_p9 = scmp.lt.s32.totalorder %s2205_s11, %s2205_s11 }
  0x66   :  { %p2212_p10 = por %p2211_p9, %p2210_p8 }
  0x68   :  { %p2213_p11 = pnand %p2212_p10, %p2206_p7 }
  0x6a   :  { %2216 = shalt.err (!%p2213_p11)
}
  0x6b   :  { %42 = dma.hbm_to_vmem [thread:$0]  %s3102_s24, 128, %s40_s26, [#allocation3]  }
  0x6c   :  { %s2217_s27 = scalar_lea.hbm %s3069_s3, 2048 }
  0x6d   :  { %p2218_p12 = scmp.ne.s32.totalorder %s3069_s3, %s2217_s27  ;;  %p2221_p13 = scmp.lt.u32.totalorder %s2217_s27, %s3069_s3 }
  0x6f   :  { %p2223_p0 = pnand %p2221_p13, %p2218_p12 }
  0x71   :  { %2226 = shalt.err (!%p2223_p0)
}
  0x72   :  { %s2227_s21 = scalar_lea.vmem %s2640_s19, 2048  ;;  %p2232_p2 = scmp.lt.s32.totalorder %s2640_s19, %s2640_s19 }
  0x73   :  { %p2228_p1 = scmp.ne.s32.totalorder %s2640_s19, %s2227_s21  ;;  %p2233_p3 = scmp.lt.s32.totalorder %s2227_s21, %s2227_s21 }
  0x75   :  { %p2234_p4 = por %p2233_p3, %p2232_p2 }
  0x77   :  { %p2235_p5 = pnand %p2234_p4, %p2228_p1 }
  0x79   :  { %2238 = shalt.err (!%p2235_p5)
}
  0x7a   :  { %68 = dma.hbm_to_vmem [thread:$0]  %s3069_s3, 2048, %s2640_s19, [#allocation6], %s3101_s25, %s3101_s25, %s3100_s29  }
  0x7b   :  { %s2465_s22 = smov [#allocation10]   ;;  %s2466_s11 = smov [#allocation13]  }
  0x7c   :  { %s90_s2 = sshll.u32 %s2465_s22, 4  ;;  %s114_s1 = sshll.u32 %s2466_s11, 4  ;;  %s91_s2 = int_to_ptr.vmem [resolvable:$true] %s90_s2  ;;  %s2674_s1 = int_to_ptr.vmem [resolvable:$true] %s114_s1 }
  0x7d   :  { %s2239_s5 = scalar_lea.hbm %s3073_s7, 8192 }
  0x7e   :  { %p2240_p6 = scmp.ne.s32.totalorder %s3073_s7, %s2239_s5  ;;  %p2243_p7 = scmp.lt.u32.totalorder %s2239_s5, %s3073_s7 }
  0x80   :  { %p2245_p8 = pnand %p2243_p7, %p2240_p6 }
  0x82   :  { %2248 = shalt.err (!%p2245_p8)
}
  0x83   :  { %s2249_s3 = scalar_lea.vmem %s91_s2, 8192  ;;  %p2254_p10 = scmp.lt.s32.totalorder %s91_s2, %s91_s2 }
  0x84   :  { %p2250_p9 = scmp.ne.s32.totalorder %s91_s2, %s2249_s3  ;;  %p2255_p11 = scmp.lt.s32.totalorder %s2249_s3, %s2249_s3 }
  0x86   :  { %p2256_p12 = por %p2255_p11, %p2254_p10 }
  0x88   :  { %p2257_p13 = pnand %p2256_p12, %p2250_p9 }
  0x8a   :  { %2260 = shalt.err (!%p2257_p13)
}
  0x8b   :  { %96 = dma.hbm_to_vmem [thread:$0]  %s3073_s7, 8192, %s91_s2, [#allocation9], %s3101_s25, %s3101_s25, %s3100_s29  }
  0x8c   :  { %s2261_s24 = scalar_lea.hbm %s3075_s9, 2048 }
  0x8d   :  { %p2262_p0 = scmp.ne.s32.totalorder %s3075_s9, %s2261_s24  ;;  %p2265_p1 = scmp.lt.u32.totalorder %s2261_s24, %s3075_s9 }
  0x8f   :  { %p2267_p2 = pnand %p2265_p1, %p2262_p0 }
  0x91   :  { %2270 = shalt.err (!%p2267_p2)
}
  0x92   :  { %s2271_s5 = scalar_lea.vmem %s2674_s1, 2048  ;;  %p2276_p4 = scmp.lt.s32.totalorder %s2674_s1, %s2674_s1 }
  0x93   :  { %p2272_p3 = scmp.ne.s32.totalorder %s2674_s1, %s2271_s5  ;;  %p2277_p5 = scmp.lt.s32.totalorder %s2271_s5, %s2271_s5 }
  0x95   :  { %p2278_p6 = por %p2277_p5, %p2276_p4 }
  0x97   :  { %p2279_p7 = pnand %p2278_p6, %p2272_p3 }
  0x99   :  { %2282 = shalt.err (!%p2279_p7)
}
  0x9a   :  { %s3103_s7 = smov 512   ;;  %s2467_s18 = smov [#allocation16]  }
  0x9b   :  { %120 = dma.hbm_to_vmem [thread:$0]  %s3075_s9, 2048, %s2674_s1, [#allocation12], %s3103_s7, %s3103_s7, %s2460_s0  }
  0x9c   :  { %s140_s28 = sshll.u32 %s2467_s18, 4  ;;  %s2283_s19 = scalar_lea.hbm %s3078_s12, 2048  ;;  %s141_s28 = int_to_ptr.vmem [resolvable:$true] %s140_s28 }
  0x9d   :  { %p2284_p8 = scmp.ne.s32.totalorder %s3078_s12, %s2283_s19  ;;  %p2287_p9 = scmp.lt.u32.totalorder %s2283_s19, %s3078_s12 }
  0x9f   :  { %p2289_p10 = pnand %p2287_p9, %p2284_p8 }
  0xa1   :  { %2292 = shalt.err (!%p2289_p10)
}
  0xa2   :  { %s2293_s22 = scalar_lea.vmem %s141_s28, 2048  ;;  %p2298_p12 = scmp.lt.s32.totalorder %s141_s28, %s141_s28 }
  0xa3   :  { %p2294_p11 = scmp.ne.s32.totalorder %s141_s28, %s2293_s22  ;;  %p2299_p13 = scmp.lt.s32.totalorder %s2293_s22, %s2293_s22 }
  0xa5   :  { %p2300_p0 = por %p2299_p13, %p2298_p12 }
  0xa7   :  { %p2301_p1 = pnand %p2300_p0, %p2294_p11 }
  0xa9   :  { %2304 = shalt.err (!%p2301_p1)
}
  0xaa   :  { %146 = dma.hbm_to_vmem [thread:$0]  %s3078_s12, 2048, %s141_s28, [#allocation15], %s3101_s25, %s3101_s25, %s3100_s29  }
  0xab   :  { %2437 = dma.done.wait [#allocation3], 128  }
  0xac   :  { %2438 = vsyncadd [#allocation3], 4294967168 }
  0xad   :  { %2439 = dma.done.wait [#allocation6], 2560  }
  0xae   :  { %2440 = vsyncadd [#allocation6], 4294964736 }
  0xaf   :  { %2441 = dma.done.wait [#allocation9], 10240  }
  0xb0   :  { %2442 = vsyncadd [#allocation9], 4294957056 }
  0xb1   :  { %2443 = dma.done.wait [#allocation12], 4096  }
  0xb2   :  { %2444 = vsyncadd [#allocation12], 4294963200 }
  0xb3   :  { %2445 = dma.done.wait [#allocation15], 10240  }
  0xb4   :  { %2446 = vsyncadd [#allocation15], 4294957056  ;;  %v2468_v0 = vmov 0.0|0.0   ;;  %vm3094_vm0 = vmmov 0   ;;  %v2470_v1 = vmov 0.0   ;;  %v175_v2 = vld [vmem:[#allocation5] sm:$0xff]  ;;  %v260_v9 = vlaneseq }
  0xb5   :  { %1838 = vmatprep.subr.bf16.mxu0 %v2468_v0  ;;  %1730 = vmatprep.mubr.msk.f32.mxu0 %vm3094_vm0, %v2470_v1  ;;  %v176_v3 = vld [vmem:[#allocation5 + $0x8] sm:$0xff]  ;;  %v177_v4 = vld [vmem:[#allocation5 + $0x10] sm:$0xff]  ;;  %v178_v6 = vld [vmem:[#allocation5 + $0x18] sm:$0xff]  ;;  %vm186_vm1 = vcmask 261120   ;;  %s3104_s25 = sld [smem:[#allocation37_spill]]  ;;  %s2473_s7 = smov [#allocation21]  }
  0xb6   :  { %1844 = vmatprep.subr.bf16.mxu1 %v2468_v0  ;;  %1765 = vmatprep.mubr.msk.f32.mxu1 %vm3094_vm0, %v2470_v1  ;;  %v1839_v5 = vpack.c.bf16 %v176_v3, %v175_v2  ;;  %v1842_v7 = vpack.c.bf16 %v178_v6, %v177_v4  ;;  %v2733_v8 = vld [vmem:[#allocation2] sm:$0xff]  ;;  %v2739_v10 = vand.u32 127, %v260_v9  ;;  %v277_v16 = vld [vmem:[#allocation7] sm:$0xff]  ;;  %v278_v17 = vld [vmem:[#allocation7 + $0x8] sm:$0xff]  ;;  %s1465_s2 = sshll.u32 %s2473_s7, 4  ;;  %s1466_s2 = int_to_ptr.vmem [resolvable:$true] %s1465_s2 }
  0xb7   :  { %v279_v18 = vld [vmem:[#allocation7 + $0x10] sm:$0xff]  ;;  %v1845_v19 = vpack.c.bf16 %v278_v17, %v277_v16  ;;  %v280_v20 = vld [vmem:[#allocation7 + $0x18] sm:$0xff]  ;;  %v281_v22 = vld [vmem:[#allocation7 + $0x20] sm:$0xff] }
  0xb8   :  { %1840 = vmatpush3.bf16.msra.mxu0 %v1839_v5  ;;  %vm262_vm2 = vcmp.lt.s32.totalorder %v2739_v10, 4  ;;  %v1848_v21 = vpack.c.bf16 %v280_v20, %v279_v18  ;;  %v282_v23 = vld [vmem:[#allocation7 + $0x28] sm:$0xff]  ;;  %v283_v25 = vld [vmem:[#allocation7 + $0x30] sm:$0xff]  ;;  %v284_v26 = vld [vmem:[#allocation7 + $0x38] sm:$0xff] }
  0xb9   :  { %1841 = vmatprep.subr.bf16.mxu0 %v2468_v0  ;;  %1846 = vmatpush3.bf16.msra.mxu1 %v1845_v19  ;;  %v1851_v24 = vpack.c.bf16 %v282_v23, %v281_v22  ;;  %v1854_v27 = vpack.c.bf16 %v284_v26, %v283_v25  ;;  %v285_v33 = vld [vmem:[#allocation7 + $0x40] sm:$0xff]  ;;  %v286_v34 = vld [vmem:[#allocation7 + $0x48] sm:$0xff]  ;;  %v287_v36 = vld [vmem:[#allocation7 + $0x50] sm:$0xff] }
  0xba   :  { %1847 = vmatprep.subr.bf16.mxu1 %v2468_v0  ;;  %v1857_v35 = vpack.c.bf16 %v286_v34, %v285_v33  ;;  %v288_v37 = vld [vmem:[#allocation7 + $0x58] sm:$0xff]  ;;  %v289_v39 = vld [vmem:[#allocation7 + $0x60] sm:$0xff]  ;;  %v290_v40 = vld [vmem:[#allocation7 + $0x68] sm:$0xff] }
  0xbb   :  { %v1516_v11 = vld [vmem:[%s3104_s25] ss:$0 sm:$0xff]  ;;  %v1860_v38 = vpack.c.bf16 %v288_v37, %v287_v36  ;;  %v1863_v41 = vpack.c.bf16 %v290_v40, %v289_v39  ;;  %v291_v42 = vld [vmem:[#allocation7 + $0x70] sm:$0xff]  ;;  %v384_v45 = vld [vmem:[#allocation8 + $0x8] sm:$0xff]  ;;  %v375_v37 = vcvt.s32.f32 %v2739_v10 }
  0xbc   :  { %1843 = vmatpush3.bf16.msra.mxu0 %v1842_v7  ;;  %v292_v43 = vld [vmem:[#allocation7 + $0x78] sm:$0xff]  ;;  %v388_v46 = vld [vmem:[#allocation8 + $0x28] sm:$0xff]  ;;  %v383_v47 = vld [vmem:[#allocation8] sm:$0xff] }
  0xbd   :  { %1849 = vmatpush3.bf16.msra.mxu1 %v1848_v21  ;;  %v1866_v44 = vpack.c.bf16 %v292_v43, %v291_v42  ;;  %v1868_v48 = vpack.c.bf16 %v388_v46, %v384_v45  ;;  %v387_v49 = vld [vmem:[#allocation8 + $0x20] sm:$0xff]  ;;  %v392_v50 = vld [vmem:[#allocation8 + $0x48] sm:$0xff]  ;;  %v386_v56 = vld [vmem:[#allocation8 + $0x18] sm:$0xff] }
  0xbe   :  { %1850 = vmatprep.subr.bf16.mxu1 %v2468_v0  ;;  %v396_v51 = vld [vmem:[#allocation8 + $0x68] sm:$0xff]  ;;  %v1870_v52 = vpack.c.bf16 %v387_v49, %v383_v47  ;;  %v391_v54 = vld [vmem:[#allocation8 + $0x40] sm:$0xff]  ;;  %v390_v57 = vld [vmem:[#allocation8 + $0x38] sm:$0xff] }
  0xbf   :  { %1731 = vmatmul.mubr.msk.f32.vlgmr.msra.gmra.mrb[0].mxu0 %vm186_vm1, %v2733_v8  ;;  %v1872_v53 = vpack.c.bf16 %v396_v51, %v392_v50  ;;  %v395_v55 = vld [vmem:[#allocation8 + $0x60] sm:$0xff]  ;;  %1869 = vmatprep.subr.bf16.mxu0 %v1868_v48  ;;  %v1876_v59 = vpack.c.bf16 %v390_v57, %v386_v56  ;;  %v385_v60 = vld [vmem:[#allocation8 + $0x10] sm:$0xff]  ;;  %v394_v62 = vld [vmem:[#allocation8 + $0x58] sm:$0xff]  ;;  %v2783_v51 = vshrl.u32 %v260_v9, 7  ;;  %v565_v9 = vadd.s32 384, %v2739_v10 }
  0xc0   :  { %485 = vmatprep.mubr.f32.mxu0 %v2470_v1  ;;  %1871 = vmatpush1.bf16.msra.mxu0 %v1870_v52  ;;  %v1874_v58 = vpack.c.bf16 %v395_v55, %v391_v54  ;;  %v389_v61 = vld [vmem:[#allocation8 + $0x30] sm:$0xff]  ;;  %v398_v63 = vld [vmem:[#allocation8 + $0x78] sm:$0xff]  ;;  %v685_v16 = vld [vmem:[#allocation11] sm:$0xff] }
  0xc1   :  { %1852 = vmatpush3.bf16.msra.mxu1 %v1851_v24  ;;  %1873 = vmatprep.subr.bf16.mxu0 %v1872_v53  ;;  %v1878_v2 = vpack.c.bf16 %v389_v61, %v385_v60  ;;  %v1880_v3 = vpack.c.bf16 %v398_v63, %v394_v62  ;;  %v393_v4 = vld [vmem:[#allocation8 + $0x50] sm:$0xff]  ;;  %v686_v17 = vld [vmem:[#allocation11 + $0x8] sm:$0xff]  ;;  %v688_v20 = vld [vmem:[#allocation11 + $0x18] sm:$0xff]  ;;  %v403_v53 = vsub.s32 0, %v2783_v51  ;;  %v407_v54 = vsub.s32 1, %v2783_v51 }
  0xc2   :  { %1853 = vmatprep.subr.bf16.mxu1 %v2468_v0  ;;  %v397_v5 = vld [vmem:[#allocation8 + $0x70] sm:$0xff]  ;;  %v1885_v19 = vpack.c.bf16 %v686_v17, %v685_v16  ;;  %v689_v22 = vld [vmem:[#allocation11 + $0x20] sm:$0xff]  ;;  %v690_v23 = vld [vmem:[#allocation11 + $0x28] sm:$0xff]  ;;  %v411_v55 = vsub.s32 2, %v2783_v51  ;;  %v564_v60 = vadd.s32 256, %v2739_v10 }
  0xc3   :  { %v1882_v6 = vpack.c.bf16 %v397_v5, %v393_v4  ;;  %v687_v18 = vld [vmem:[#allocation11 + $0x10] sm:$0xff]  ;;  %v1891_v24 = vpack.c.bf16 %v690_v23, %v689_v22  ;;  %v692_v26 = vld [vmem:[#allocation11 + $0x38] sm:$0xff]  ;;  %v697_v34 = vld [vmem:[#allocation11 + $0x60] sm:$0xff]  ;;  %v2471_v4 = vmov 1.0  }
  0xc4   :  { %1875 = vmatpush1.bf16.msra.mxu0 %v1874_v58  ;;  %v1888_v21 = vpack.c.bf16 %v688_v20, %v687_v18  ;;  %v691_v25 = vld [vmem:[#allocation11 + $0x30] sm:$0xff]  ;;  %v1518_v47 = vld [vmem:[%s3070_s4] ss:$0 sm:$0xff]  ;;  %v563_v58 = vadd.s32 128, %v2739_v10 }
  0xc5   :  { %1855 = vmatpush3.bf16.msra.mxu1 %v1854_v27  ;;  %1877 = vmatprep.subr.bf16.mxu0 %v1876_v59  ;;  %v1894_v27 = vpack.c.bf16 %v692_v26, %v691_v25  ;;  %v699_v40 = vld [vmem:[#allocation11 + $0x70] sm:$0xff]  ;;  %v399_v57 = vld [vmem:[%s3072_s6] sm:$0xf] }
  0xc6   :  { %1856 = vmatprep.subr.bf16.mxu1 %v2468_v0  ;;  %v404_v61 = vrot.slane %v399_v57, %v403_v53  ;;  %v408_v62 = vrot.slane %v399_v57, %v407_v54  ;;  %v412_v63 = vrot.slane %v399_v57, %v411_v55 }
  0xc7   :  { %1520 = vmatmul.mubr.msk.f32.vlgmr.msra.gmra.mrb[2].mxu0 %vm186_vm1, %v2733_v8 }
  0xc8   :  { %1879 = vmatpush1.bf16.msra.mxu0 %v1878_v2  ;;  %556 = vmatprep.mubr.f32.mxu0 %v2470_v1  ;;  %v415_v2 = vsub.s32 3, %v2783_v51 }
  0xc9   :  { %1858 = vmatpush3.bf16.msra.mxu1 %v1857_v35  ;;  %1881 = vmatprep.subr.bf16.mxu0 %v1880_v3  ;;  %v698_v35 = vld [vmem:[#allocation11 + $0x68] sm:$0xff] }
  0xca   :  { %1859 = vmatprep.subr.bf16.mxu1 %v2468_v0  ;;  %v1903_v36 = vpack.c.bf16 %v698_v35, %v697_v34  ;;  %v669_v34 = vld [vmem:[#allocation10 + $0x180] sm:$0xff] }
  0xcc   :  { %1883 = vmatpush1.bf16.msra.mxu0 %v1882_v6 }
  0xcd   :  { %1861 = vmatpush3.bf16.msra.mxu1 %v1860_v38  ;;  %1884 = vmatprep.subr.bf16.mxu0 %v2468_v0 }
  0xce   :  { %1862 = vmatprep.subr.bf16.mxu1 %v2468_v0 }
  0xcf   :  { %1521 = vmatmul.mubr.msk.f32.vlgmr.msra.gmra.mrb[4].mxu0 %vm186_vm1, %v2733_v8 }
  0xd0   :  { %1800 = vmatprep.mubr.msk.f32.mxu0 %vm3094_vm0, %v2470_v1  ;;  %1886 = vmatpush3.bf16.msra.mxu0 %v1885_v19 }
  0xd1   :  { %1864 = vmatpush3.bf16.msra.mxu1 %v1863_v41  ;;  %1887 = vmatprep.subr.bf16.mxu0 %v2468_v0  ;;  %v700_v41 = vld [vmem:[#allocation11 + $0x78] sm:$0xff] }
  0xd2   :  { %1865 = vmatprep.subr.bf16.mxu1 %v2468_v0  ;;  %v1906_v43 = vpack.c.bf16 %v700_v41, %v699_v40  ;;  %v653_v41 = vld [vmem:[#allocation10 + $0x100] sm:$0xff] }
  0xd4   :  { %1889 = vmatpush3.bf16.msra.mxu0 %v1888_v21 }
  0xd5   :  { %1867 = vmatpush3.bf16.msra.mxu1 %v1866_v44  ;;  %1890 = vmatprep.subr.bf16.mxu0 %v2468_v0 }
  0xd8   :  { %1892 = vmatpush3.bf16.msra.mxu0 %v1891_v24 }
  0xd9   :  { %1893 = vmatprep.subr.bf16.mxu0 %v2468_v0 }
  0xdc   :  { %1895 = vmatpush3.bf16.msra.mxu0 %v1894_v27 }
  0xdd   :  { %1896 = vmatprep.subr.bf16.mxu0 %v2468_v0 }
 0x192   :  { %v256_v12 = vpop.f32.mrb[0].mxu0 }
 0x193   :  { %v257_v13 = vadd.f32 %v1516_v11, %v256_v12  ;;  %v1732_v14 = vpop.f32.mrb[1].mxu0 }
 0x195   :  { %v263_v15 = vsel %vm262_vm2, %v257_v13, 0.0 }
 0x196   :  { %264 = vadd.xlane.f32.xlu0 %v263_v15 }
 0x19a   :  { %v487_v42 = vpop.f32.mrb[2].mxu0 }
 0x19b   :  { %v489_v44 = vpop.f32.mrb[3].mxu0 }
 0x1a2   :  { %v558_v45 = vpop.f32.mrb[4].mxu0 }
 0x1a3   :  { %v560_v46 = vpop.f32.mrb[5].mxu0 }
 0x223   :  { %v265_v28 = vpop.xlane.xlu0 %264 }
 0x224   :  { %v266_v29 = vmul.f32 0.25, %v265_v28  ;;  %v693_v28 = vld [vmem:[#allocation11 + $0x40] sm:$0xff] }
 0x226   :  { %v267_v30 = vsub.f32 %v263_v15, %v266_v29  ;;  %v694_v29 = vld [vmem:[#allocation11 + $0x48] sm:$0xff] }
 0x228   :  { %v2753_v31 = vsel %vm262_vm2, %v267_v30, 0.0  ;;  %v1897_v30 = vpack.c.bf16 %v694_v29, %v693_v28 }
 0x229   :  { %v269_v32 = vmul.f32 %v2753_v31, %v2753_v31 }
 0x22a   :  { %1898 = vmatpush3.bf16.msra.mxu0 %v1897_v30 }
 0x22b   :  { %270 = vadd.xlane.f32.xlu0 %v269_v32  ;;  %v696_v32 = vld [vmem:[#allocation11 + $0x58] sm:$0xff]  ;;  %1899 = vmatprep.subr.bf16.mxu0 %v2468_v0 }
 0x2b8   :  { %v271_v7 = vpop.xlane.xlu0 %270 }
 0x2b9   :  { %v272_v11 = vmul.f32 0.25, %v271_v7 }
 0x2bb   :  { %v273_v12 = vadd.f32 1e-05, %v272_v11 }
 0x2bd   :  { %2101 = vrsqrt.f32 %v273_v12  ;;  %v488_v12 = vadd.f32 %v487_v42, %v404_v61  ;;  %v654_v42 = vld [vmem:[#allocation10 + $0x108] sm:$0xff] }
 0x2c7   :  { %v2102_v13 = vpop.eup %2101 }
 0x2c8   :  { %v275_v14 = vmul.f32 %v2102_v13, %v2753_v31  ;;  %v695_v31 = vld [vmem:[#allocation11 + $0x50] sm:$0xff]  ;;  %v490_v13 = vadd.f32 %v489_v44, %v408_v62  ;;  %v1942_v44 = vpack.c.bf16 %v654_v42, %v653_v41 }
 0x2c9   :  { %v1900_v33 = vpack.c.bf16 %v696_v32, %v695_v31  ;;  %v637_v32 = vld [vmem:[#allocation10 + $0x80] sm:$0xff] }
 0x2ca   :  { %1766 = vmatmul.mubr.f32.vlgmr.msra.gmra.mrb[0].mxu1 %v275_v14  ;;  %276 = vst [vmem:[#allocation17] sm:$0xff] %v275_v14  ;;  %v371_v15 = vsel %vm262_vm2, %v275_v14, -inf  ;;  %v559_v14 = vadd.f32 %v558_v45, %v412_v63  ;;  %v640_v45 = vld [vmem:[#allocation10 + $0x98] sm:$0xff]  ;;  %v673_v63 = vld [vmem:[#allocation10 + $0x1a0] sm:$0xff] }
 0x2cb   :  { %372 = vmax.xlane.f32.xlu1 %v371_v15  ;;  %1901 = vmatpush3.bf16.msra.mxu0 %v1900_v33  ;;  %v638_v33 = vld [vmem:[#allocation10 + $0x88] sm:$0xff] }
 0x2cc   :  { %1902 = vmatprep.subr.bf16.mxu0 %v2468_v0  ;;  %v1908_v35 = vpack.c.bf16 %v638_v33, %v637_v32  ;;  %v627_v32 = vld [vmem:[#allocation10 + $0x30] sm:$0xff]  ;;  %v628_v33 = vld [vmem:[#allocation10 + $0x38] sm:$0xff] }
 0x2ce   :  { %1909 = vmatprep.subr.bf16.mxu1 %v1908_v35  ;;  %v659_v35 = vld [vmem:[#allocation10 + $0x130] sm:$0xff] }
 0x2cf   :  { %1904 = vmatpush3.bf16.msra.mxu0 %v1903_v36  ;;  %v670_v36 = vld [vmem:[#allocation10 + $0x188] sm:$0xff] }
 0x2d0   :  { %1905 = vmatprep.subr.bf16.mxu0 %v2468_v0 }
 0x2d3   :  { %1907 = vmatpush3.bf16.msra.mxu0 %v1906_v43  ;;  %v639_v43 = vld [vmem:[#allocation10 + $0x90] sm:$0xff] }
 0x358   :  { %v373_v38 = vpop.xlane.xlu1 %372 }
 0x359   :  { %vm374_vm3 = vcmp.eq.f32.partialorder %v371_v15, %v373_v38  ;;  %v416_v15 = vrot.slane %v399_v57, %v415_v2  ;;  %v622_v38 = vld [vmem:[#allocation10 + $0x8] sm:$0xff] }
 0x35a   :  { %v376_v39 = vsel %vm374_vm3, %v375_v37, 128.0  ;;  %v621_v37 = vld [vmem:[#allocation10] sm:$0xff] }
 0x35b   :  { %377 = vmin.xlane.f32.xlu1 %v376_v39  ;;  %v561_v21 = vadd.f32 %v560_v46, %v416_v15  ;;  %v1940_v39 = vpack.c.bf16 %v670_v36, %v669_v34  ;;  %v1910_v40 = vpack.c.bf16 %v622_v38, %v621_v37  ;;  %v671_v46 = vld [vmem:[#allocation10 + $0x190] sm:$0xff]  ;;  %v644_v15 = vld [vmem:[#allocation10 + $0xb8] sm:$0xff]  ;;  %v1922_v37 = vpack.c.bf16 %v628_v33, %v627_v32  ;;  %v650_v32 = vld [vmem:[#allocation10 + $0xe8] sm:$0xff] }
 0x35c   :  { %v660_v36 = vld [vmem:[#allocation10 + $0x138] sm:$0xff]  ;;  %v681_v33 = vld [vmem:[#allocation10 + $0x1e0] sm:$0xff] }
 0x35d   :  { %1941 = vmatprep.subr.bf16.mxu0 %v1940_v39  ;;  %1911 = vmatpush3.bf16.msra.mxu1 %v1910_v40  ;;  %v1954_v38 = vpack.c.bf16 %v660_v36, %v659_v35 }
 0x39d   :  { %v366_v48 = vpop.f32.mrb[0].mxu1 }
 0x39e   :  { %v367_v49 = vadd.f32 %v1518_v47, %v366_v48  ;;  %v1767_v50 = vpop.f32.mrb[1].mxu1  ;;  %v672_v47 = vld [vmem:[#allocation10 + $0x198] sm:$0xff]  ;;  %v1912_v48 = vpack.c.bf16 %v640_v45, %v639_v43 }
 0x39f   :  { %v623_v50 = vld [vmem:[#allocation10 + $0x10] sm:$0xff] }
 0x3a0   :  { %370 = vst [vmem:[#allocation18] sm:$0xff] %v367_v49  ;;  %v1944_v49 = vpack.c.bf16 %v672_v47, %v671_v46  ;;  %1913 = vmatprep.subr.bf16.mxu1 %v1912_v48 }
 0x3e8   :  { %v378_v52 = vpop.xlane.xlu1 %377 }
 0x3e9   :  { %v2076_v56 = vtrunc.f32 %v378_v52  ;;  %v624_v52 = vld [vmem:[#allocation10 + $0x18] sm:$0xff] }
 0x3ea   :  { %v1914_v57 = vpack.c.bf16 %v624_v52, %v623_v50  ;;  %v646_v50 = vld [vmem:[#allocation10 + $0xc8] sm:$0xff]  ;;  %v677_v52 = vld [vmem:[#allocation10 + $0x1c0] sm:$0xff] }
 0x3eb   :  { %v2792_v59 = vcvt.f32.s32 %v2076_v56  ;;  %v655_v56 = vld [vmem:[#allocation10 + $0x110] sm:$0xff] }
 0x3ec   :  { %1915 = vmatpush3.bf16.msra.mxu1 %v1914_v57  ;;  %v678_v57 = vld [vmem:[#allocation10 + $0x1c8] sm:$0xff] }
 0x3ed   :  { %vm3093_vm4 = vcmp.eq.s32.totalorder %v2739_v10, %v2792_v59  ;;  %v566_v3 = vmul.u32 128, %v2792_v59  ;;  %v1956_v23 = vpack.c.bf16 %v678_v57, %v677_v52  ;;  %v917_v57 = vld [vmem:[#allocation13 + $0x28] sm:$0xff] }
 0x3ee   :  { %1801 = vmatmul.mubr.msk.f32.vlgmr.msra.gmra.mrb[6].mxu0 %vm3093_vm4, %v2471_v4 }
 0x3ef   :  { %v567_v5 = vsub.s32 %v2739_v10, %v566_v3  ;;  %v568_v6 = vsub.s32 %v563_v58, %v566_v3  ;;  %v569_v7 = vsub.s32 %v564_v60, %v566_v3  ;;  %v570_v11 = vsub.s32 %v565_v9, %v566_v3  ;;  %1943 = vmatpush3.bf16.msra.mxu0 %v1942_v44  ;;  %v656_v58 = vld [vmem:[#allocation10 + $0x118] sm:$0xff]  ;;  %v641_v60 = vld [vmem:[#allocation10 + $0xa0] sm:$0xff]  ;;  %v642_v9 = vld [vmem:[#allocation10 + $0xa8] sm:$0xff] }
 0x3f0   :  { %1945 = vmatprep.subr.bf16.mxu0 %v1944_v49  ;;  %v1946_v61 = vpack.c.bf16 %v656_v58, %v655_v56  ;;  %v1916_v62 = vpack.c.bf16 %v642_v9, %v641_v60  ;;  %v674_v3 = vld [vmem:[#allocation10 + $0x1a8] sm:$0xff]  ;;  %v645_v49 = vld [vmem:[#allocation10 + $0xc0] sm:$0xff] }
 0x3f1   :  { %vm571_vm5 = vcmp.ge.s32.totalorder %v567_v5, 0  ;;  %vm575_vm6 = vcmp.lt.s32.totalorder %v567_v5, 6  ;;  %vm572_vm7 = vcmp.ge.s32.totalorder %v568_v6, 0  ;;  %vm576_vm8 = vcmp.lt.s32.totalorder %v568_v6, 6  ;;  %v629_v58 = vld [vmem:[#allocation10 + $0x40] sm:$0xff]  ;;  %v630_v60 = vld [vmem:[#allocation10 + $0x48] sm:$0xff] }
 0x3f2   :  { %vm2814_vm9 = vmand %vm571_vm5, %vm575_vm6  ;;  %vm573_vm10 = vcmp.ge.s32.totalorder %v569_v7, 0  ;;  %vm577_vm11 = vcmp.lt.s32.totalorder %v569_v7, 6  ;;  %vm574_vm12 = vcmp.ge.s32.totalorder %v570_v11, 0  ;;  %vm578_vm13 = vcmp.lt.s32.totalorder %v570_v11, 6  ;;  %1917 = vmatprep.subr.bf16.mxu1 %v1916_v62  ;;  %v662_v62 = vld [vmem:[#allocation10 + $0x148] sm:$0xff] }
 0x3f3   :  { %v2820_v17 = vsel %vm2814_vm9, %v488_v12, 0.0  ;;  %vm2823_vm14 = vmand %vm572_vm7, %vm576_vm8  ;;  %vm1092_vm15 = vcmp.lt.s32.totalorder %v567_v5, 10  ;;  %vm1094_vm3 = vcmp.lt.s32.totalorder %v569_v7, 10  ;;  %vm1093_vm8 = vcmp.lt.s32.totalorder %v568_v6, 10  ;;  %v625_v5 = vld [vmem:[#allocation10 + $0x20] sm:$0xff]  ;;  %v626_v7 = vld [vmem:[#allocation10 + $0x28] sm:$0xff]  ;;  %1947 = vmatpush3.bf16.msra.mxu0 %v1946_v61 }
 0x3f4   :  { %v2829_v19 = vsel %vm2823_vm14, %v490_v13, 0.0  ;;  %vm2832_vm2 = vmand %vm573_vm10, %vm577_vm11  ;;  %vm1095_vm4 = vcmp.lt.s32.totalorder %v570_v11, 10  ;;  %v1948_v6 = vpack.c.bf16 %v674_v3, %v673_v63  ;;  %v657_v11 = vld [vmem:[#allocation10 + $0x120] sm:$0xff]  ;;  %v658_v12 = vld [vmem:[#allocation10 + $0x128] sm:$0xff]  ;;  %v1918_v13 = vpack.c.bf16 %v626_v7, %v625_v5 }
 0x3f5   :  { %v587_v22 = vadd.f32 %v2829_v19, %v2820_v17  ;;  %vm2839_vm6 = vmand %vm574_vm12, %vm578_vm13  ;;  %v2845_v24 = vsel %vm2832_vm2, %v559_v14, 0.0  ;;  %v643_v14 = vld [vmem:[#allocation10 + $0xb0] sm:$0xff]  ;;  %v1924_v56 = vpack.c.bf16 %v646_v50, %v645_v49  ;;  %v1926_v9 = vpack.c.bf16 %v630_v60, %v629_v58  ;;  %v661_v61 = vld [vmem:[#allocation10 + $0x140] sm:$0xff] }
 0x3f6   :  { %vm2848_vm11 = vmand %vm571_vm5, %vm1092_vm15  ;;  %v2860_v28 = vsel %vm2839_vm6, %v561_v21, 0.0  ;;  %v675_v21 = vld [vmem:[#allocation10 + $0x1b0] sm:$0xff]  ;;  %1949 = vmatprep.subr.bf16.mxu0 %v1948_v6  ;;  %1919 = vmatpush3.bf16.msra.mxu1 %v1918_v13  ;;  %v1958_v63 = vpack.c.bf16 %v662_v62, %v661_v61  ;;  %v648_v5 = vld [vmem:[#allocation10 + $0xd8] sm:$0xff] }
 0x3f7   :  { %v588_v26 = vadd.f32 %v587_v22, %v2845_v24  ;;  %vm2854_vm0 = vmand %vm573_vm10, %vm1094_vm3  ;;  %v1950_v22 = vpack.c.bf16 %v658_v12, %v657_v11  ;;  %v647_v3 = vld [vmem:[#allocation10 + $0xd0] sm:$0xff]  ;;  %v680_v11 = vld [vmem:[#allocation10 + $0x1d8] sm:$0xff] }
 0x3f8   :  { %vm2863_vm13 = vmand %vm572_vm7, %vm1093_vm8  ;;  %v679_v6 = vld [vmem:[#allocation10 + $0x1d0] sm:$0xff]  ;;  %v1928_v7 = vpack.c.bf16 %v648_v5, %v647_v3  ;;  %v632_v13 = vld [vmem:[#allocation10 + $0x58] sm:$0xff] }
 0x3f9   :  { %v589_v30 = vadd.f32 %v588_v26, %v2860_v28  ;;  %vm2869_vm5 = vmand %vm574_vm12, %vm1095_vm4  ;;  %v1920_v26 = vpack.c.bf16 %v644_v15, %v643_v14  ;;  %1951 = vmatpush3.bf16.msra.mxu0 %v1950_v22  ;;  %v631_v12 = vld [vmem:[#allocation10 + $0x50] sm:$0xff]  ;;  %v1960_v14 = vpack.c.bf16 %v680_v11, %v679_v6  ;;  %v664_v22 = vld [vmem:[#allocation10 + $0x158] sm:$0xff]  ;;  %vm3121_vm4 = vmmov 0  }
 0x3fa   :  { %v1930_v15 = vpack.c.bf16 %v632_v13, %v631_v12  ;;  %v668_v49 = vld [vmem:[#allocation10 + $0x178] sm:$0xff]  ;;  %v912_v6 = vld [vmem:[#allocation13] sm:$0xff]  ;;  %v914_v11 = vld [vmem:[#allocation13 + $0x10] sm:$0xff] }
 0x3fb   :  { %590 = vadd.xlane.f32.xlu0 %v589_v30  ;;  %v676_v30 = vld [vmem:[#allocation10 + $0x1b8] sm:$0xff]  ;;  %1921 = vmatprep.subr.bf16.mxu1 %v1920_v26  ;;  %v649_v26 = vld [vmem:[#allocation10 + $0xe0] sm:$0xff]  ;;  %v918_v12 = vld [vmem:[#allocation13 + $0x30] sm:$0xff] }
 0x3fc   :  { %v1952_v34 = vpack.c.bf16 %v676_v30, %v675_v21  ;;  %1923 = vmatpush3.bf16.msra.mxu1 %v1922_v37  ;;  %v663_v21 = vld [vmem:[#allocation10 + $0x150] sm:$0xff]  ;;  %v1932_v35 = vpack.c.bf16 %v650_v32, %v649_v26  ;;  %v633_v37 = vld [vmem:[#allocation10 + $0x60] sm:$0xff]  ;;  %v915_v58 = vld [vmem:[#allocation13 + $0x18] sm:$0xff] }
 0x3fd   :  { %1925 = vmatprep.subr.bf16.mxu1 %v1924_v56  ;;  %v1962_v30 = vpack.c.bf16 %v664_v22, %v663_v21  ;;  %v913_v56 = vld [vmem:[#allocation13 + $0x8] sm:$0xff]  ;;  %v927_v21 = vld [vmem:[#allocation13 + $0x78] sm:$0xff] }
 0x3fe   :  { %1953 = vmatprep.subr.bf16.mxu0 %v1952_v34  ;;  %v682_v34 = vld [vmem:[#allocation10 + $0x1e8] sm:$0xff]  ;;  %v1972_v60 = vpack.c.bf16 %v917_v57, %v913_v56 }
 0x3ff   :  { %1955 = vmatpush3.bf16.msra.mxu0 %v1954_v38  ;;  %v1964_v36 = vpack.c.bf16 %v682_v34, %v681_v33  ;;  %v634_v38 = vld [vmem:[#allocation10 + $0x68] sm:$0xff] }
 0x400   :  { %1957 = vmatprep.subr.bf16.mxu0 %v1956_v23  ;;  %1927 = vmatpush3.bf16.msra.mxu1 %v1926_v9  ;;  %v919_v23 = vld [vmem:[#allocation13 + $0x38] sm:$0xff]  ;;  %v921_v13 = vld [vmem:[#allocation13 + $0x48] sm:$0xff] }
 0x401   :  { %1929 = vmatprep.subr.bf16.mxu1 %v1928_v7  ;;  %v1980_v9 = vpack.c.bf16 %v919_v23, %v915_v58  ;;  %v916_v7 = vld [vmem:[#allocation13 + $0x20] sm:$0xff]  ;;  %v1211_v56 = vld [vmem:[#allocation16 + $0x48] sm:$0xff]  ;;  %v1213_v58 = vld [vmem:[#allocation16 + $0x58] sm:$0xff] }
 0x402   :  { %v1974_v26 = vpack.c.bf16 %v916_v7, %v912_v6  ;;  %v1214_v23 = vld [vmem:[#allocation16 + $0x60] sm:$0xff] }
 0x403   :  { %1959 = vmatpush3.bf16.msra.mxu0 %v1958_v63 }
 0x404   :  { %1961 = vmatprep.subr.bf16.mxu0 %v1960_v14  ;;  %1931 = vmatpush3.bf16.msra.mxu1 %v1930_v15  ;;  %v925_v14 = vld [vmem:[#allocation13 + $0x68] sm:$0xff]  ;;  %v923_v15 = vld [vmem:[#allocation13 + $0x58] sm:$0xff] }
 0x405   :  { %1933 = vmatprep.subr.bf16.mxu1 %v1932_v35 }
 0x407   :  { %1963 = vmatpush3.bf16.msra.mxu0 %v1962_v30  ;;  %v1982_v30 = vpack.c.bf16 %v918_v12, %v914_v11 }
 0x408   :  { %1965 = vmatprep.subr.bf16.mxu0 %v1964_v36  ;;  %v920_v36 = vld [vmem:[#allocation13 + $0x40] sm:$0xff] }
 0x488   :  { %v591_v39 = vpop.xlane.xlu0 %590 }
 0x489   :  { %v592_v40 = vmul.f32 0.16666667, %v591_v39  ;;  %v665_v39 = vld [vmem:[#allocation10 + $0x160] sm:$0xff] }
 0x48b   :  { %v593_v41 = vsub.f32 %v2820_v17, %v592_v40  ;;  %v594_v42 = vsub.f32 %v2829_v19, %v592_v40  ;;  %v595_v43 = vsub.f32 %v2845_v24, %v592_v40  ;;  %v596_v44 = vsub.f32 %v2860_v28, %v592_v40 }
 0x48c   :  { %v1934_v40 = vpack.c.bf16 %v634_v38, %v633_v37  ;;  %v1976_v37 = vpack.c.bf16 %v925_v14, %v921_v13  ;;  %v1984_v38 = vpack.c.bf16 %v927_v21, %v923_v15  ;;  %v928_v15 = vld [vmem:[%s3076_s10] sm:$0xf]  ;;  %s2472_s10 = smov [#allocation18]  }
 0x48d   :  { %v2879_v45 = vsel %vm2814_vm9, %v593_v41, 0.0  ;;  %v2883_v46 = vsel %vm2823_vm14, %v594_v42, 0.0  ;;  %v2887_v47 = vsel %vm2832_vm2, %v595_v43, 0.0  ;;  %v2895_v24 = vsel %vm2839_vm6, %v596_v44, 0.0  ;;  %v666_v41 = vld [vmem:[#allocation10 + $0x168] sm:$0xff]  ;;  %v651_v42 = vld [vmem:[#allocation10 + $0xf0] sm:$0xff] }
 0x48e   :  { %v601_v17 = vmul.f32 %v2879_v45, %v2879_v45  ;;  %v602_v19 = vmul.f32 %v2883_v46, %v2883_v46  ;;  %v603_v16 = vmul.f32 %v2887_v47, %v2887_v47  ;;  %v604_v28 = vmul.f32 %v2895_v24, %v2895_v24  ;;  %v652_v43 = vld [vmem:[#allocation10 + $0xf8] sm:$0xff]  ;;  %1935 = vmatpush3.bf16.msra.mxu1 %v1934_v40  ;;  %v922_v40 = vld [vmem:[#allocation13 + $0x50] sm:$0xff]  ;;  %s1445_s5 = sshll.u32 %s2472_s10, 4  ;;  %s1446_s5 = int_to_ptr.vmem [resolvable:$true] %s1445_s5 }
 0x48f   :  { %v1966_v44 = vpack.c.bf16 %v666_v41, %v665_v39  ;;  %v924_v39 = vld [vmem:[#allocation13 + $0x60] sm:$0xff]  ;;  %v926_v41 = vld [vmem:[#allocation13 + $0x70] sm:$0xff]  ;;  %s2305_s27 = scalar_lea.vmem %s1446_s5, 128  ;;  %p2310_p3 = scmp.lt.s32.totalorder %s1446_s5, %s1446_s5 }
 0x490   :  { %v605_v18 = vadd.f32 %v602_v19, %v601_v17  ;;  %v1936_v17 = vpack.c.bf16 %v652_v43, %v651_v42  ;;  %v683_v19 = vld [vmem:[#allocation10 + $0x1f0] sm:$0xff]  ;;  %p2306_p2 = scmp.ne.s32.totalorder %s1446_s5, %s2305_s27  ;;  %p2311_p4 = scmp.lt.s32.totalorder %s2305_s27, %s2305_s27 }
 0x491   :  { %1967 = vmatpush3.bf16.msra.mxu0 %v1966_v44 }
 0x492   :  { %v606_v20 = vadd.f32 %v605_v18, %v603_v16  ;;  %v684_v16 = vld [vmem:[#allocation10 + $0x1f8] sm:$0xff]  ;;  %v635_v18 = vld [vmem:[#allocation10 + $0x70] sm:$0xff]  ;;  %1937 = vmatprep.subr.bf16.mxu1 %v1936_v17  ;;  %p2312_p5 = por %p2311_p4, %p2310_p3 }
 0x494   :  { %v607_v48 = vadd.f32 %v606_v20, %v604_v28  ;;  %v1968_v28 = vpack.c.bf16 %v684_v16, %v683_v19  ;;  %v636_v20 = vld [vmem:[#allocation10 + $0x78] sm:$0xff]  ;;  %v1204_v19 = vld [vmem:[#allocation16 + $0x10] sm:$0xff]  ;;  %p2313_p6 = pnand %p2312_p5, %p2306_p2 }
 0x495   :  { %v1938_v50 = vpack.c.bf16 %v636_v20, %v635_v18  ;;  %v1205_v16 = vld [vmem:[#allocation16 + $0x18] sm:$0xff]  ;;  %v1207_v20 = vld [vmem:[#allocation16 + $0x28] sm:$0xff] }
 0x496   :  { %608 = vadd.xlane.f32.xlu1 %v607_v48  ;;  %v667_v48 = vld [vmem:[#allocation10 + $0x170] sm:$0xff]  ;;  %1969 = vmatprep.subr.bf16.mxu0 %v1968_v28  ;;  %v1992_v18 = vpack.c.bf16 %v1205_v16, %v1204_v19  ;;  %v1206_v28 = vld [vmem:[#allocation16 + $0x20] sm:$0xff]  ;;  %v1171_v16 = vld [vmem:[#allocation14 + $0x108] sm:$0xff] }
 0x497   :  { %v1970_v52 = vpack.c.bf16 %v668_v49, %v667_v48  ;;  %1939 = vmatpush3.bf16.msra.mxu1 %v1938_v50  ;;  %v1995_v48 = vpack.c.bf16 %v1207_v20, %v1206_v28  ;;  %v1208_v49 = vld [vmem:[#allocation16 + $0x30] sm:$0xff]  ;;  %v1209_v50 = vld [vmem:[#allocation16 + $0x38] sm:$0xff]  ;;  %v1170_v19 = vld [vmem:[#allocation14 + $0x100] sm:$0xff] }
 0x498   :  { %1981 = vmatprep.subr.bf16.mxu1 %v1980_v9  ;;  %v1215_v9 = vld [vmem:[#allocation16 + $0x68] sm:$0xff]  ;;  %v2046_v28 = vpack.c.bf16 %v1171_v16, %v1170_v19  ;;  %v1157_v20 = vld [vmem:[#allocation14 + $0x98] sm:$0xff] }
 0x499   :  { %1971 = vmatpush3.bf16.msra.mxu0 %v1970_v52  ;;  %v1998_v52 = vpack.c.bf16 %v1209_v50, %v1208_v49  ;;  %v1189_v49 = vld [vmem:[#allocation14 + $0x198] sm:$0xff]  ;;  %v1147_v19 = vld [vmem:[#allocation14 + $0x48] sm:$0xff] }
 0x49a   :  { %1973 = vmatprep.subr.bf16.mxu0 %v1972_v60 }
 0x4c1   :  { %v2901_v61 = vpop.f32.mrb[6].mxu0 }
 0x4c2   :  { %v1802_v62 = vpop.f32.mrb[7].mxu0 }
 0x4c3   :  { %v2007_v62 = vpack.c.bf16 %v1215_v9, %v1214_v23  ;;  %v1159_v23 = vld [vmem:[#allocation14 + $0xa8] sm:$0xff] }
 0x523   :  { %v609_v63 = vpop.xlane.xlu1 %608 }
 0x524   :  { %v610_v3 = vmul.f32 0.16666667, %v609_v63  ;;  %v1216_v63 = vld [vmem:[#allocation16 + $0x70] sm:$0xff] }
 0x526   :  { %v611_v5 = vadd.f32 1e-05, %v610_v3  ;;  %v1217_v3 = vld [vmem:[#allocation16 + $0x78] sm:$0xff] }
 0x528   :  { %2103 = vrsqrt.f32 %v611_v5  ;;  %v2010_v5 = vpack.c.bf16 %v1217_v3, %v1216_v63  ;;  %v1190_v63 = vld [vmem:[#allocation14 + $0x1a0] sm:$0xff]  ;;  %v1191_v3 = vld [vmem:[#allocation14 + $0x1a8] sm:$0xff] }
 0x532   :  { %v2104_v22 = vpop.eup %2103 }
 0x533   :  { %v613_v32 = vmul.f32 %v2104_v22, %v2879_v45  ;;  %v614_v33 = vmul.f32 %v2104_v22, %v2883_v46  ;;  %v615_v34 = vmul.f32 %v2104_v22, %v2887_v47  ;;  %v616_v35 = vmul.f32 %v2104_v22, %v2895_v24  ;;  %v1202_v47 = vld [vmem:[#allocation16] sm:$0xff]  ;;  %v1203_v24 = vld [vmem:[#allocation16 + $0x8] sm:$0xff] }
 0x534   :  { %v1978_v45 = vpack.c.bf16 %v924_v39, %v920_v36  ;;  %v1986_v46 = vpack.c.bf16 %v926_v41, %v922_v40  ;;  %v1989_v17 = vpack.c.bf16 %v1203_v24, %v1202_v47  ;;  %v1154_v41 = vld [vmem:[#allocation14 + $0x80] sm:$0xff]  ;;  %v1139_v47 = vld [vmem:[#allocation14 + $0x8] sm:$0xff] }
 0x535   :  { %v617_v42 = vadd.f32 %v614_v33, %v613_v32  ;;  %835 = vmatprep.mubr.f32.mxu1 %v614_v33  ;;  %v618_v43 = vadd.f32 %v616_v35, %v615_v34  ;;  %905 = vmatprep.mubr.f32.mxu0 %v616_v35 }
 0x536   :  { %836 = vmatmul.mubr.f32.vlgmr.msra.gmra.mrb[2].mxu1 %v613_v32  ;;  %906 = vmatmul.mubr.f32.vlgmr.msra.gmra.mrb[8].mxu0 %v615_v34 }
 0x537   :  { %1975 = vmatpush1.bf16.msra.mxu0 %v1974_v26  ;;  %1983 = vmatpush1.bf16.msra.mxu1 %v1982_v30  ;;  %v619_v44 = vadd.f32 %v618_v43, %v617_v42  ;;  %v945_v30 = vrot.slane %v928_v15, %v415_v2  ;;  %v1155_v42 = vld [vmem:[#allocation14 + $0x88] sm:$0xff]  ;;  %v1186_v43 = vld [vmem:[#allocation14 + $0x180] sm:$0xff] }
 0x538   :  { %1977 = vmatprep.subr.bf16.mxu0 %v1976_v37  ;;  %1985 = vmatprep.subr.bf16.mxu1 %v1984_v38 }
 0x539   :  { %1014 = vmatprep.mubr.f32.mxu0 %v2470_v1  ;;  %1085 = vmatprep.mubr.f32.mxu1 %v2470_v1  ;;  %620 = vst [vmem:[#allocation20] sm:$0xff] %v619_v44  ;;  %v1138_v44 = vld [vmem:[#allocation14] sm:$0xff] }
 0x53b   :  { %1979 = vmatpush1.bf16.msra.mxu0 %v1978_v45  ;;  %1987 = vmatpush1.bf16.msra.mxu1 %v1986_v46  ;;  %v2012_v45 = vpack.c.bf16 %v1155_v42, %v1154_v41  ;;  %v1187_v46 = vld [vmem:[#allocation14 + $0x188] sm:$0xff] }
 0x53c   :  { %1988 = vmatprep.subr.bf16.mxu1 %v2468_v0  ;;  %v2044_v24 = vpack.c.bf16 %v1187_v46, %v1186_v43  ;;  %v1163_v46 = vld [vmem:[#allocation14 + $0xc8] sm:$0xff] }
 0x53d   :  { %2013 = vmatprep.subr.bf16.mxu0 %v2012_v45  ;;  %v1162_v45 = vld [vmem:[#allocation14 + $0xc0] sm:$0xff] }
 0x53e   :  { %1523 = vmatmul.mubr.msk.f32.vlgmr.msra.gmra.mrb[10].mxu0 %vm186_vm1, %v2733_v8  ;;  %1524 = vmatmul.mubr.msk.f32.vlgmr.msra.gmra.mrb[4].mxu1 %vm186_vm1, %v2733_v8  ;;  %v1210_v8 = vld [vmem:[#allocation16 + $0x40] sm:$0xff]  ;;  %vm3122_vm1 = vcmp.eq.s32.totalorder %v2739_v10, %v2792_v59  ;;  %v941_v10 = vrot.slane %v928_v15, %v411_v55  ;;  %v937_v59 = vrot.slane %v928_v15, %v407_v54 }
 0x53f   :  { %1990 = vmatpush3.bf16.msra.mxu1 %v1989_v17  ;;  %1835 = vmatprep.mubr.msk.f32.mxu1 %vm3121_vm4, %v2470_v1  ;;  %v2001_v57 = vpack.c.bf16 %v1211_v56, %v1210_v8  ;;  %v1212_v1 = vld [vmem:[#allocation16 + $0x50] sm:$0xff]  ;;  %v2014_v17 = vpack.c.bf16 %v1139_v47, %v1138_v44  ;;  %v1141_v56 = vld [vmem:[#allocation14 + $0x18] sm:$0xff]  ;;  %v1194_v44 = vld [vmem:[#allocation14 + $0x1c0] sm:$0xff]  ;;  %v2028_v47 = vpack.c.bf16 %v1163_v46, %v1162_v45 }
 0x540   :  { %1991 = vmatprep.subr.bf16.mxu1 %v2468_v0  ;;  %v2004_v60 = vpack.c.bf16 %v1213_v58, %v1212_v1  ;;  %v1140_v8 = vld [vmem:[#allocation14 + $0x10] sm:$0xff]  ;;  %v1173_v58 = vld [vmem:[#allocation14 + $0x118] sm:$0xff] }
 0x541   :  { %2015 = vmatpush3.bf16.msra.mxu0 %v2014_v17  ;;  %v2018_v1 = vpack.c.bf16 %v1141_v56, %v1140_v8  ;;  %v1146_v17 = vld [vmem:[#allocation14 + $0x40] sm:$0xff] }
 0x542   :  { %v2030_v16 = vpack.c.bf16 %v1147_v19, %v1146_v17 }
 0x543   :  { %1993 = vmatpush3.bf16.msra.mxu1 %v1992_v18  ;;  %v1156_v18 = vld [vmem:[#allocation14 + $0x90] sm:$0xff] }
 0x544   :  { %1994 = vmatprep.subr.bf16.mxu1 %v2468_v0  ;;  %v2016_v50 = vpack.c.bf16 %v1157_v20, %v1156_v18  ;;  %v1178_v18 = vld [vmem:[#allocation14 + $0x140] sm:$0xff]  ;;  %v1164_v20 = vld [vmem:[#allocation14 + $0xd0] sm:$0xff] }
 0x546   :  { %2017 = vmatprep.subr.bf16.mxu0 %v2016_v50  ;;  %v1196_v50 = vld [vmem:[#allocation14 + $0x1d0] sm:$0xff] }
 0x547   :  { %1996 = vmatpush3.bf16.msra.mxu1 %v1995_v48  ;;  %v1188_v48 = vld [vmem:[#allocation14 + $0x190] sm:$0xff]  ;;  %2019 = vmatpush3.bf16.msra.mxu0 %v2018_v1  ;;  %v1149_v1 = vld [vmem:[#allocation14 + $0x58] sm:$0xff] }
 0x548   :  { %1997 = vmatprep.subr.bf16.mxu1 %v2468_v0 }
 0x54b   :  { %1999 = vmatpush3.bf16.msra.mxu1 %v1998_v52  ;;  %v2048_v52 = vpack.c.bf16 %v1189_v49, %v1188_v48  ;;  %v1165_v49 = vld [vmem:[#allocation14 + $0xd8] sm:$0xff] }
 0x54c   :  { %2000 = vmatprep.subr.bf16.mxu1 %v2468_v0  ;;  %v2032_v8 = vpack.c.bf16 %v1165_v49, %v1164_v20 }
 0x54f   :  { %2002 = vmatpush3.bf16.msra.mxu1 %v2001_v57  ;;  %v1172_v57 = vld [vmem:[#allocation14 + $0x110] sm:$0xff] }
 0x550   :  { %2003 = vmatprep.subr.bf16.mxu1 %v2468_v0  ;;  %v2050_v9 = vpack.c.bf16 %v1173_v58, %v1172_v57  ;;  %v1148_v57 = vld [vmem:[#allocation14 + $0x50] sm:$0xff] }
 0x551   :  { %v1180_v58 = vld [vmem:[#allocation14 + $0x150] sm:$0xff] }
 0x553   :  { %2005 = vmatpush3.bf16.msra.mxu1 %v2004_v60  ;;  %v1158_v60 = vld [vmem:[#allocation14 + $0xa0] sm:$0xff] }
 0x554   :  { %2006 = vmatprep.subr.bf16.mxu1 %v2468_v0 }
 0x557   :  { %2008 = vmatpush3.bf16.msra.mxu1 %v2007_v62  ;;  %v2020_v62 = vpack.c.bf16 %v1159_v23, %v1158_v60  ;;  %v2034_v60 = vpack.c.bf16 %v1149_v1, %v1148_v57  ;;  %v1181_v23 = vld [vmem:[#allocation14 + $0x158] sm:$0xff] }
 0x558   :  { %2009 = vmatprep.subr.bf16.mxu1 %v2468_v0  ;;  %v933_v0 = vrot.slane %v928_v15, %v403_v53  ;;  %v1161_v15 = vld [vmem:[#allocation14 + $0xb8] sm:$0xff] }
 0x559   :  { %2021 = vmatprep.subr.bf16.mxu0 %v2020_v62  ;;  %v1167_v62 = vld [vmem:[#allocation14 + $0xe8] sm:$0xff] }
 0x55b   :  { %2011 = vmatpush3.bf16.msra.mxu1 %v2010_v5  ;;  %v1142_v5 = vld [vmem:[#allocation14 + $0x20] sm:$0xff] }
 0x55c   :  { %2045 = vmatprep.subr.bf16.mxu1 %v2044_v24  ;;  %v1195_v24 = vld [vmem:[#allocation14 + $0x1c8] sm:$0xff] }
 0x55d   :  { %v2060_v31 = vpack.c.bf16 %v1195_v24, %v1194_v44 }
 0x55e   :  { %1836 = vmatmul.mubr.msk.f32.vlgmr.msra.gmra.mrb[6].mxu1 %vm3122_vm1, %v2471_v4 }
 0x55f   :  { %2047 = vmatpush3.bf16.msra.mxu1 %v2046_v28  ;;  %v1179_v28 = vld [vmem:[#allocation14 + $0x148] sm:$0xff] }
 0x560   :  { %2049 = vmatprep.subr.bf16.mxu1 %v2048_v52  ;;  %v2062_v48 = vpack.c.bf16 %v1179_v28, %v1178_v18  ;;  %v1197_v52 = vld [vmem:[#allocation14 + $0x1d8] sm:$0xff] }
 0x561   :  { %v2064_v56 = vpack.c.bf16 %v1197_v52, %v1196_v50 }
 0x563   :  { %2051 = vmatpush3.bf16.msra.mxu1 %v2050_v9  ;;  %v1166_v9 = vld [vmem:[#allocation14 + $0xe0] sm:$0xff] }
 0x609   :  { %v1597_v6 = vpop.f32.mrb[2].mxu1  ;;  %v1632_v7 = vpop.f32.mrb[8].mxu0 }
 0x60a   :  { %v1598_v11 = vpop.f32.mrb[3].mxu1  ;;  %v1633_v12 = vpop.f32.mrb[9].mxu0 }
 0x60b   :  { %v1599_v13 = vadd.f32 %v1598_v11, %v1597_v6  ;;  %v1634_v14 = vadd.f32 %v1633_v12, %v1632_v7  ;;  %v2052_v6 = vpack.c.bf16 %v1191_v3, %v1190_v63  ;;  %v1143_v7 = vld [vmem:[#allocation14 + $0x28] sm:$0xff]  ;;  %v1174_v11 = vld [vmem:[#allocation14 + $0x120] sm:$0xff]  ;;  %v2066_v63 = vpack.c.bf16 %v1181_v23, %v1180_v58 }
 0x60c   :  { %v1175_v12 = vld [vmem:[#allocation14 + $0x128] sm:$0xff]  ;;  %v2036_v3 = vpack.c.bf16 %v1167_v62, %v1166_v9 }
 0x60d   :  { %v838_v21 = vadd.f32 %v1599_v13, %v2901_v61  ;;  %v2022_v13 = vpack.c.bf16 %v1143_v7, %v1142_v5  ;;  %2053 = vmatprep.subr.bf16.mxu1 %v2052_v6  ;;  %v1198_v5 = vld [vmem:[#allocation14 + $0x1e0] sm:$0xff]  ;;  %v1199_v6 = vld [vmem:[#allocation14 + $0x1e8] sm:$0xff] }
 0x60e   :  { %v1150_v7 = vld [vmem:[#allocation14 + $0x60] sm:$0xff] }
 0x60f   :  { %v908_v22 = vadd.f32 %v1634_v14, %v838_v21  ;;  %v1160_v14 = vld [vmem:[#allocation14 + $0xb0] sm:$0xff]  ;;  %2023 = vmatpush3.bf16.msra.mxu0 %v2022_v13  ;;  %v1182_v13 = vld [vmem:[#allocation14 + $0x160] sm:$0xff] }
 0x610   :  { %v1192_v21 = vld [vmem:[#allocation14 + $0x1b0] sm:$0xff] }
 0x611   :  { %911 = vst [vmem:[#allocation21] sm:$0xff] %v908_v22  ;;  %v1016_v4 = vpop.f32.mrb[10].mxu0  ;;  %v1087_v26 = vpop.f32.mrb[4].mxu1  ;;  %v2024_v22 = vpack.c.bf16 %v1161_v15, %v1160_v14  ;;  %v1183_v14 = vld [vmem:[#allocation14 + $0x168] sm:$0xff] }
 0x612   :  { %v1017_v32 = vadd.f32 %v1016_v4, %v933_v0  ;;  %v1018_v33 = vpop.f32.mrb[11].mxu0  ;;  %v1089_v34 = vpop.f32.mrb[5].mxu1  ;;  %v1088_v61 = vadd.f32 %v1087_v26, %v941_v10  ;;  %v2054_v0 = vpack.c.bf16 %v1175_v12, %v1174_v11  ;;  %v1193_v10 = vld [vmem:[#allocation14 + $0x1b8] sm:$0xff]  ;;  %v2068_v11 = vpack.c.bf16 %v1199_v6, %v1198_v5  ;;  %v1151_v12 = vld [vmem:[#allocation14 + $0x68] sm:$0xff] }
 0x613   :  { %v1019_v35 = vadd.f32 %v1018_v33, %v937_v59  ;;  %v1090_v54 = vadd.f32 %v1089_v34, %v945_v30  ;;  %v1144_v59 = vld [vmem:[#allocation14 + $0x30] sm:$0xff]  ;;  %v1145_v4 = vld [vmem:[#allocation14 + $0x38] sm:$0xff]  ;;  %v2056_v26 = vpack.c.bf16 %v1193_v10, %v1192_v21  ;;  %2025 = vmatprep.subr.bf16.mxu0 %v2024_v22  ;;  %v2038_v15 = vpack.c.bf16 %v1151_v12, %v1150_v7 }
 0x614   :  { %v2941_v53 = vsel %vm2848_vm11, %v1017_v32, 0.0  ;;  %v2951_v51 = vsel %vm2854_vm0, %v1088_v61, 0.0  ;;  %v1176_v30 = vld [vmem:[#allocation14 + $0x130] sm:$0xff]  ;;  %v1177_v32 = vld [vmem:[#allocation14 + $0x138] sm:$0xff]  ;;  %v2026_v33 = vpack.c.bf16 %v1145_v4, %v1144_v59  ;;  %2055 = vmatpush3.bf16.msra.mxu1 %v2054_v0  ;;  %v2070_v10 = vpack.c.bf16 %v1183_v14, %v1182_v13 }
 0x615   :  { %v2945_v55 = vsel %vm2863_vm13, %v1019_v35, 0.0  ;;  %v2956_v37 = vsel %vm2869_vm5, %v1090_v54, 0.0  ;;  %v2058_v34 = vpack.c.bf16 %v1177_v32, %v1176_v30  ;;  %2057 = vmatprep.subr.bf16.mxu1 %v2056_v26  ;;  %v1168_v21 = vld [vmem:[#allocation14 + $0xf0] sm:$0xff]  ;;  %v1169_v0 = vld [vmem:[#allocation14 + $0xf8] sm:$0xff] }
 0x616   :  { %v1104_v36 = vadd.f32 %v2945_v55, %v2941_v53  ;;  %2027 = vmatpush3.bf16.msra.mxu0 %v2026_v33  ;;  %v1200_v22 = vld [vmem:[#allocation14 + $0x1f0] sm:$0xff]  ;;  %v2040_v59 = vpack.c.bf16 %v1169_v0, %v1168_v21  ;;  %v1201_v4 = vld [vmem:[#allocation14 + $0x1f8] sm:$0xff] }
 0x617   :  { %2029 = vmatprep.subr.bf16.mxu0 %v2028_v47  ;;  %v1152_v26 = vld [vmem:[#allocation14 + $0x70] sm:$0xff]  ;;  %v1153_v30 = vld [vmem:[#allocation14 + $0x78] sm:$0xff]  ;;  %v2072_v32 = vpack.c.bf16 %v1201_v4, %v1200_v22 }
 0x618   :  { %v1105_v2 = vadd.f32 %v1104_v36, %v2951_v51  ;;  %2059 = vmatpush3.bf16.msra.mxu1 %v2058_v34  ;;  %v1184_v33 = vld [vmem:[#allocation14 + $0x170] sm:$0xff]  ;;  %v1185_v34 = vld [vmem:[#allocation14 + $0x178] sm:$0xff] }
 0x619   :  { %2061 = vmatprep.subr.bf16.mxu1 %v2060_v31 }
 0x61a   :  { %v1106_v38 = vadd.f32 %v1105_v2, %v2956_v37  ;;  %2031 = vmatpush3.bf16.msra.mxu0 %v2030_v16 }
 0x61b   :  { %2033 = vmatprep.subr.bf16.mxu0 %v2032_v8 }
 0x61c   :  { %1107 = vadd.xlane.f32.xlu0 %v1106_v38  ;;  %2063 = vmatpush3.bf16.msra.mxu1 %v2062_v48 }
 0x61d   :  { %2065 = vmatprep.subr.bf16.mxu1 %v2064_v56 }
 0x61e   :  { %2035 = vmatpush3.bf16.msra.mxu0 %v2034_v60 }
 0x61f   :  { %2037 = vmatprep.subr.bf16.mxu0 %v2036_v3 }
 0x620   :  { %2067 = vmatpush3.bf16.msra.mxu1 %v2066_v63 }
 0x621   :  { %2069 = vmatprep.subr.bf16.mxu1 %v2068_v11 }
 0x622   :  { %2039 = vmatpush3.bf16.msra.mxu0 %v2038_v15 }
 0x623   :  { %2041 = vmatprep.subr.bf16.mxu0 %v2040_v59 }
 0x624   :  { %2071 = vmatpush3.bf16.msra.mxu1 %v2070_v10 }
 0x625   :  { %2073 = vmatprep.subr.bf16.mxu1 %v2072_v32 }
 0x631   :  { %v2959_v39 = vpop.f32.mrb[6].mxu1 }
 0x632   :  { %v1837_v40 = vpop.f32.mrb[7].mxu1 }
 0x6a9   :  { %v1108_v61 = vpop.xlane.xlu0 %1107 }
 0x6aa   :  { %v1109_v35 = vmul.f32 0.1, %v1108_v61  ;;  %v2042_v61 = vpack.c.bf16 %v1153_v30, %v1152_v26 }
 0x6ac   :  { %v1110_v54 = vsub.f32 %v2941_v53, %v1109_v35  ;;  %v1111_v36 = vsub.f32 %v2945_v55, %v1109_v35  ;;  %v1112_v2 = vsub.f32 %v2951_v51, %v1109_v35  ;;  %v1113_v38 = vsub.f32 %v2956_v37, %v1109_v35  ;;  %2043 = vmatpush3.bf16.msra.mxu0 %v2042_v61 }
 0x6ad   :  { %v2074_v35 = vpack.c.bf16 %v1185_v34, %v1184_v33 }
 0x6ae   :  { %v2967_v40 = vsel %vm2848_vm11, %v1110_v54, 0.0  ;;  %v2971_v41 = vsel %vm2863_vm13, %v1111_v36, 0.0  ;;  %v2975_v42 = vsel %vm2854_vm0, %v1112_v2, 0.0  ;;  %v2983_v51 = vsel %vm2869_vm5, %v1113_v38, 0.0 }
 0x6af   :  { %v1118_v53 = vmul.f32 %v2967_v40, %v2967_v40  ;;  %v1119_v55 = vmul.f32 %v2971_v41, %v2971_v41  ;;  %v1120_v25 = vmul.f32 %v2975_v42, %v2975_v42  ;;  %v1121_v37 = vmul.f32 %v2983_v51, %v2983_v51  ;;  %2075 = vmatpush3.bf16.msra.mxu1 %v2074_v35 }
 0x6b1   :  { %v1122_v29 = vadd.f32 %v1119_v55, %v1118_v53 }
 0x6b3   :  { %v1123_v27 = vadd.f32 %v1122_v29, %v1120_v25 }
 0x6b5   :  { %v1124_v43 = vadd.f32 %v1123_v27, %v1121_v37 }
 0x6b7   :  { %1125 = vadd.xlane.f32.xlu1 %v1124_v43 }
 0x744   :  { %v1126_v54 = vpop.xlane.xlu1 %1125 }
 0x745   :  { %v1127_v36 = vmul.f32 0.1, %v1126_v54 }
 0x747   :  { %v1128_v2 = vadd.f32 1e-05, %v1127_v36 }
 0x749   :  { %2105 = vrsqrt.f32 %v1128_v2 }
 0x753   :  { %v2106_v38 = vpop.eup %2105 }
 0x754   :  { %v1130_v53 = vmul.f32 %v2106_v38, %v2967_v40  ;;  %v1131_v55 = vmul.f32 %v2106_v38, %v2971_v41  ;;  %v1132_v25 = vmul.f32 %v2106_v38, %v2975_v42  ;;  %v1133_v29 = vmul.f32 %v2106_v38, %v2983_v51 }
 0x756   :  { %v1134_v37 = vadd.f32 %v1131_v55, %v1130_v53  ;;  %1352 = vmatprep.mubr.f32.mxu0 %v1131_v55  ;;  %v1135_v27 = vadd.f32 %v1133_v29, %v1132_v25  ;;  %1422 = vmatprep.mubr.f32.mxu1 %v1133_v29 }
 0x757   :  { %1353 = vmatmul.mubr.f32.vlgmr.msra.gmra.mrb[12].mxu0 %v1130_v53  ;;  %1423 = vmatmul.mubr.f32.vlgmr.msra.gmra.mrb[8].mxu1 %v1132_v25 }
 0x758   :  { %v1136_v43 = vadd.f32 %v1135_v27, %v1134_v37 }
 0x75a   :  { %1137 = vst [vmem:[#allocation23] sm:$0xff] %v1136_v43 }
 0x75b   :  { %2316 = shalt.err (!%p2313_p6)
}
 0x75c   :  { %s2317_s23 = scalar_lea.hbm %s3080_s14, 128 }
 0x75d   :  { %p2318_p7 = scmp.ne.s32.totalorder %s3080_s14, %s2317_s23  ;;  %p2321_p8 = scmp.lt.u32.totalorder %s2317_s23, %s3080_s14 }
 0x75f   :  { %p2323_p9 = pnand %p2321_p8, %p2318_p7 }
 0x761   :  { %2326 = shalt.err (!%p2323_p9)
}
 0x762   :  { %1448 = dma.vmem_to_hbm [thread:$0]  %s1446_s5, 128, %s3080_s14, [#allocation19]  }
 0x763   :  { %s2327_s22 = scalar_lea.vmem %s1466_s2, 128  ;;  %p2332_p11 = scmp.lt.s32.totalorder %s1466_s2, %s1466_s2 }
 0x764   :  { %p2328_p10 = scmp.ne.s32.totalorder %s1466_s2, %s2327_s22  ;;  %p2333_p12 = scmp.lt.s32.totalorder %s2327_s22, %s2327_s22 }
 0x766   :  { %p2334_p13 = por %p2333_p12, %p2332_p11 }
 0x768   :  { %p2335_p0 = pnand %p2334_p13, %p2328_p10 }
 0x76a   :  { %2338 = shalt.err (!%p2335_p0)
}
 0x76b   :  { %s2339_s12 = scalar_lea.hbm %s3082_s16, 128 }
 0x76c   :  { %p2340_p1 = scmp.ne.s32.totalorder %s3082_s16, %s2339_s12  ;;  %p2343_p2 = scmp.lt.u32.totalorder %s2339_s12, %s3082_s16 }
 0x76e   :  { %p2345_p3 = pnand %p2343_p2, %p2340_p1 }
 0x770   :  { %2348 = shalt.err (!%p2345_p3)
}
 0x771   :  { %1468 = dma.vmem_to_hbm [thread:$0]  %s1466_s2, 128, %s3082_s16, [#allocation22]  }
 0x772   :  { %s2474_s30 = smov [#allocation17]   ;;  %s2475_s6 = smov [#allocation20]  }
 0x773   :  { %s1435_s4 = sshll.u32 %s2474_s30, 4  ;;  %s1455_s10 = sshll.u32 %s2475_s6, 4  ;;  %s1436_s4 = int_to_ptr.vmem [resolvable:$true] %s1435_s4  ;;  %s1456_s10 = int_to_ptr.vmem [resolvable:$true] %s1455_s10 }
 0x774   :  { %s2349_s5 = scalar_lea.vmem %s1436_s4, 128  ;;  %p2354_p5 = scmp.lt.s32.totalorder %s1436_s4, %s1436_s4 }
 0x775   :  { %p2350_p4 = scmp.ne.s32.totalorder %s1436_s4, %s2349_s5  ;;  %p2355_p6 = scmp.lt.s32.totalorder %s2349_s5, %s2349_s5 }
 0x777   :  { %p2356_p7 = por %p2355_p6, %p2354_p5 }
 0x779   :  { %p2357_p8 = pnand %p2356_p7, %p2350_p4 }
 0x77b   :  { %2360 = shalt.err (!%p2357_p8)
}
 0x77c   :  { %s2361_s18 = scalar_lea.hbm %s3079_s13, 128 }
 0x77d   :  { %p2362_p9 = scmp.ne.s32.totalorder %s3079_s13, %s2361_s18  ;;  %p2365_p10 = scmp.lt.u32.totalorder %s2361_s18, %s3079_s13 }
 0x77f   :  { %p2367_p11 = pnand %p2365_p10, %p2362_p9 }
 0x781   :  { %2370 = shalt.err (!%p2367_p11)
}
 0x782   :  { %1438 = dma.vmem_to_hbm [thread:$0]  %s1436_s4, 128, %s3079_s13, [#allocation4]  }
 0x783   :  { %s2371_s20 = scalar_lea.vmem %s1456_s10, 128  ;;  %p2376_p13 = scmp.lt.s32.totalorder %s1456_s10, %s1456_s10 }
 0x784   :  { %p2372_p12 = scmp.ne.s32.totalorder %s1456_s10, %s2371_s20  ;;  %p2377_p0 = scmp.lt.s32.totalorder %s2371_s20, %s2371_s20 }
 0x786   :  { %p2378_p1 = por %p2377_p0, %p2376_p13 }
 0x788   :  { %p2379_p2 = pnand %p2378_p1, %p2372_p12 }
 0x78a   :  { %2382 = shalt.err (!%p2379_p2)
}
 0x78b   :  { %s2383_s24 = scalar_lea.hbm %s3081_s15, 128 }
 0x78c   :  { %p2384_p3 = scmp.ne.s32.totalorder %s3081_s15, %s2383_s24  ;;  %p2387_p4 = scmp.lt.u32.totalorder %s2383_s24, %s3081_s15 }
 0x78e   :  { %p2389_p5 = pnand %p2387_p4, %p2384_p3 }
 0x790   :  { %2392 = shalt.err (!%p2389_p5)
}
 0x791   :  { %1458 = dma.vmem_to_hbm [thread:$0]  %s1456_s10, 128, %s3081_s15, [#allocation19]  }
 0x792   :  { %s2476_s25 = smov [#allocation23]  }
 0x793   :  { %s1475_s1 = sshll.u32 %s2476_s25, 4  ;;  %s1476_s1 = int_to_ptr.vmem [resolvable:$true] %s1475_s1 }
 0x794   :  { %s2393_s11 = scalar_lea.vmem %s1476_s1, 128  ;;  %p2398_p7 = scmp.lt.s32.totalorder %s1476_s1, %s1476_s1 }
 0x795   :  { %p2394_p6 = scmp.ne.s32.totalorder %s1476_s1, %s2393_s11  ;;  %p2399_p8 = scmp.lt.s32.totalorder %s2393_s11, %s2393_s11 }
 0x797   :  { %p2400_p9 = por %p2399_p8, %p2398_p7 }
 0x799   :  { %p2401_p10 = pnand %p2400_p9, %p2394_p6 }
 0x79b   :  { %2404 = shalt.err (!%p2401_p10)
}
 0x79c   :  { %s2405_s30 = scalar_lea.hbm %s3083_s17, 128 }
 0x79d   :  { %p2406_p11 = scmp.ne.s32.totalorder %s3083_s17, %s2405_s30  ;;  %p2409_p12 = scmp.lt.u32.totalorder %s2405_s30, %s3083_s17 }
 0x79f   :  { %p2411_p13 = pnand %p2409_p12, %p2406_p11 }
 0x7a1   :  { %2414 = shalt.err (!%p2411_p13)
}
 0x7a2   :  { %1478 = dma.vmem_to_hbm [thread:$0]  %s1476_s1, 128, %s3083_s17, [#allocation22]  }
 0x7a3   :  { %s2477_s27 = smov [#allocation24]  }
 0x7a4   :  { %s1485_s18 = sshll.u32 %s2477_s27, 4  ;;  %s1486_s18 = int_to_ptr.vmem [resolvable:$true] %s1485_s18 }
 0x7a5   :  { %s2415_s28 = scalar_lea.vmem %s1486_s18, 128  ;;  %p2420_p1 = scmp.lt.s32.totalorder %s1486_s18, %s1486_s18 }
 0x7a6   :  { %p2416_p0 = scmp.ne.s32.totalorder %s1486_s18, %s2415_s28  ;;  %p2421_p2 = scmp.lt.s32.totalorder %s2415_s28, %s2415_s28 }
 0x7a8   :  { %p2422_p3 = por %p2421_p2, %p2420_p1 }
 0x7aa   :  { %p2423_p4 = pnand %p2422_p3, %p2416_p0 }
 0x82a   :  { %v1684_v40 = vpop.f32.mrb[12].mxu0  ;;  %v1719_v41 = vpop.f32.mrb[8].mxu1 }
 0x82b   :  { %v1685_v42 = vpop.f32.mrb[13].mxu0  ;;  %v1720_v51 = vpop.f32.mrb[9].mxu1 }
 0x82c   :  { %v1686_v45 = vadd.f32 %v1685_v42, %v1684_v40  ;;  %v1721_v46 = vadd.f32 %v1720_v51, %v1719_v41 }
 0x82e   :  { %v1355_v44 = vadd.f32 %v1686_v45, %v2959_v39 }
 0x830   :  { %v1425_v47 = vadd.f32 %v1721_v46, %v1355_v44 }
 0x832   :  { %1428 = vst [vmem:[#allocation24] sm:$0xff] %v1425_v47 }
 0x833   :  { %2426 = shalt.err (!%p2423_p4)
}
 0x834   :  { %s3123_s16 = sld [smem:[#allocation38_spill]] }
 0x83a   :  { %s2427_s2 = scalar_lea.hbm %s3123_s16, 128 }
 0x83b   :  { %p2428_p5 = scmp.ne.s32.totalorder %s3123_s16, %s2427_s2  ;;  %p2431_p6 = scmp.lt.u32.totalorder %s2427_s2, %s3123_s16 }
 0x83d   :  { %p2433_p7 = pnand %p2431_p6, %p2428_p5 }
 0x83f   :  { %2436 = shalt.err (!%p2433_p7)
}
 0x840   :  { %1488 = dma.vmem_to_hbm [thread:$0]  %s1486_s18, 128, %s3123_s16, [#allocation25]  }
 0x841   :  { %2447 = dma.done.wait [#allocation4], 128  }
 0x842   :  { %2448 = vsyncadd [#allocation4], 4294967168 }
 0x843   :  { %2449 = dma.done.wait [#allocation19], 256  }
 0x844   :  { %2450 = vsyncadd [#allocation19], 4294967040 }
 0x845   :  { %2451 = dma.done.wait [#allocation22], 256  }
 0x846   :  { %2452 = vsyncadd [#allocation22], 4294967040 }
 0x847   :  { %2453 = dma.done.wait [#allocation25], 128  }
 0x848   :  { %2454 = vsyncadd [#allocation25], 4294967168 }
 0x849   :  { %1507 = vsyncpa [#allocation3], 1 }
 0x84a   :  { %1508 = vsyncpa [#allocation6], 1 }
 0x84b   :  { %1509 = vsyncpa [#allocation9], 1 }
 0x84c   :  { %1510 = vsyncpa [#allocation12], 1 }
 0x84d   :  { %1511 = vsyncpa [#allocation15], 1 }
 0x84e   :  { %1512 = vsyncpa [#allocation4], 1 }
 0x84f   :  { %1513 = vsyncpa [#allocation19], 1 }
 0x850   :  { %1514 = vsyncpa [#allocation22], 1 }
 0x851   :  { %1515 = vsyncpa [#allocation25], 1 }

// kernel: tpu_custom_call.1
= control target key start
LH: loop header
LB: loop body
LE: loop exit
PB: predicated region body
PF: predicated region fallthrough
CT: control target
= control target key end

     0   :  { %s3066_s0 = inlined_call_operand.hbm [shape: f32[8,32], index: 0, kind: input, shape index: {}]   ;;  %s3067_s1 = inlined_call_operand.hbm [shape: f32[32,128], index: 1, kind: input, shape index: {}]   ;;  %s3068_s2 = inlined_call_operand.vmem [shape: f32[1,128], index: 2, kind: input, shape index: {}]   ;;  %s3069_s3 = inlined_call_operand.hbm [shape: f32[128,128], index: 3, kind: input, shape index: {}]   ;;  %s3070_s4 = inlined_call_operand.vmem [shape: f32[1,128], index: 4, kind: input, shape index: {}]   ;;  %s3071_s5 = inlined_call_operand.hbm [shape: f32[32,512], index: 5, kind: input, shape index: {}]   ;;  %s3072_s6 = inlined_call_operand.vmem [shape: f32[1,512], index: 6, kind: input, shape index: {}]   ;;  %s3073_s7 = inlined_call_operand.hbm [shape: f32[512,128], index: 7, kind: input, shape index: {}]   ;;  %s3074_s8 = inlined_call_operand.hbm [shape: f32[128,128], index: 8, kind: input, shape index: {}]   ;;  %s3075_s9 = inlined_call_operand.hbm [shape: f32[32,512], index: 9, kind: input, shape index: {}]   ;;  %s3076_s10 = inlined_call_operand.vmem [shape: f32[1,512], index: 10, kind: input, shape index: {}]   ;;  %s3077_s11 = inlined_call_operand.hbm [shape: f32[512,128], index: 11, kind: input, shape index: {}]   ;;  %s3078_s12 = inlined_call_operand.hbm [shape: f32[128,128], index: 12, kind: input, shape index: {}]   ;;  %s3079_s13 = inlined_call_operand.hbm [shape: f32[8,128], index: 13, kind: output, shape index: {0}]   ;;  %s3080_s14 = inlined_call_operand.hbm [shape: f32[8,128], index: 14, kind: output, shape index: {1}]   ;;  %s3081_s15 = inlined_call_operand.hbm [shape: f32[8,128], index: 15, kind: output, shape index: {2}]   ;;  %s3082_s16 = inlined_call_operand.hbm [shape: f32[8,128], index: 16, kind: output, shape index: {3}]   ;;  %s3083_s17 = inlined_call_operand.hbm [shape: f32[8,128], index: 17, kind: output, shape index: {4}]   ;;  %s3084_s18 = inlined_call_operand.hbm [shape: f32[8,128], index: 18, kind: output, shape index: {5}]  }
   0x1   :  { %3095 = sst [smem:[#allocation35_spill]] %s3066_s0 }
   0x2   :  { %3096 = sst [smem:[#allocation36_spill]] %s3067_s1 }
   0x3   :  { %3097 = sst [smem:[#allocation37_spill]] %s3068_s2 }
   0x4   :  { %3098 = sst [smem:[#allocation38_spill]] %s3084_s18 }
   0x5   :  { %24 = vsyncpa [#allocation3], 0 }
   0x6   :  { %25 = vsyncpa [#allocation6], 0 }
   0x7   :  { %26 = vsyncpa [#allocation9], 0 }
   0x8   :  { %27 = vsyncpa [#allocation12], 0 }
   0x9   :  { %28 = vsyncpa [#allocation15], 0 }
   0xa   :  { %29 = vsyncpa [#allocation4], 0 }
   0xb   :  { %30 = vsyncpa [#allocation19], 0 }
   0xc   :  { %31 = vsyncpa [#allocation22], 0 }
   0xd   :  { %32 = vsyncpa [#allocation25], 0  ;;  %s2455_s27 = smov [#allocation5]   ;;  %s3099_s0 = sld [smem:[#allocation36_spill]] }
   0xe   :  { %s48_s28 = sshll.u32 %s2455_s27, 4  ;;  %s49_s28 = int_to_ptr.vmem [resolvable:$true] %s48_s28 }
  0x13   :  { %s2107_s19 = scalar_lea.hbm %s3099_s0, 512 }
  0x14   :  { %p2108_p0 = scmp.ne.s32.totalorder %s3099_s0, %s2107_s19  ;;  %p2111_p1 = scmp.lt.u32.totalorder %s2107_s19, %s3099_s0 }
  0x16   :  { %p2113_p2 = pnand %p2111_p1, %p2108_p0 }
  0x18   :  { %2116 = shalt.err (!%p2113_p2)
}
  0x19   :  { %s2117_s2 = scalar_lea.vmem %s49_s28, 512  ;;  %p2122_p4 = scmp.lt.s32.totalorder %s49_s28, %s49_s28 }
  0x1a   :  { %p2118_p3 = scmp.ne.s32.totalorder %s49_s28, %s2117_s2  ;;  %p2123_p5 = scmp.lt.s32.totalorder %s2117_s2, %s2117_s2 }
  0x1c   :  { %p2124_p6 = por %p2123_p5, %p2122_p4 }
  0x1e   :  { %p2125_p7 = pnand %p2124_p6, %p2118_p3 }
  0x20   :  { %2128 = shalt.err (!%p2125_p7)
}
  0x21   :  { %s3088_s23 = smov 128   ;;  %s3090_s24 = smov 8  }
  0x22   :  { %54 = dma.hbm_to_vmem [thread:$0]  %s3099_s0, 512, %s49_s28, [#allocation6], %s3088_s23, %s3088_s23, %s3090_s24  }
  0x23   :  { %s2458_s27 = smov [#allocation8]   ;;  %s2129_s1 = scalar_lea.hbm %s3071_s5, 2048 }
  0x24   :  { %s76_s29 = sshll.u32 %s2458_s27, 4  ;;  %p2130_p8 = scmp.ne.s32.totalorder %s3071_s5, %s2129_s1  ;;  %s77_s29 = int_to_ptr.vmem [resolvable:$true] %s76_s29 }
  0x25   :  { %p2133_p9 = scmp.lt.u32.totalorder %s2129_s1, %s3071_s5 }
  0x27   :  { %p2135_p10 = pnand %p2133_p9, %p2130_p8 }
  0x29   :  { %2138 = shalt.err (!%p2135_p10)
}
  0x2a   :  { %s2139_s18 = scalar_lea.vmem %s77_s29, 2048  ;;  %p2144_p12 = scmp.lt.s32.totalorder %s77_s29, %s77_s29 }
  0x2b   :  { %p2140_p11 = scmp.ne.s32.totalorder %s77_s29, %s2139_s18  ;;  %p2145_p13 = scmp.lt.s32.totalorder %s2139_s18, %s2139_s18 }
  0x2d   :  { %p2146_p0 = por %p2145_p13, %p2144_p12 }
  0x2f   :  { %p2147_p1 = pnand %p2146_p0, %p2140_p11 }
  0x31   :  { %2150 = shalt.err (!%p2147_p1)
}
  0x32   :  { %s3092_s28 = smov 512   ;;  %s2460_s0 = smov 32  }
  0x33   :  { %82 = dma.hbm_to_vmem [thread:$0]  %s3071_s5, 2048, %s77_s29, [#allocation9], %s3092_s28, %s3092_s28, %s2460_s0  }
  0x34   :  { %s2461_s27 = smov [#allocation11]   ;;  %s2462_s19 = smov [#allocation14]  }
  0x35   :  { %s102_s30 = sshll.u32 %s2461_s27, 4  ;;  %s128_s1 = sshll.u32 %s2462_s19, 4  ;;  %s103_s30 = int_to_ptr.vmem [resolvable:$true] %s102_s30  ;;  %s2603_s1 = int_to_ptr.vmem [resolvable:$true] %s128_s1 }
  0x36   :  { %s2151_s21 = scalar_lea.hbm %s3074_s8, 2048 }
  0x37   :  { %p2152_p2 = scmp.ne.s32.totalorder %s3074_s8, %s2151_s21  ;;  %p2155_p3 = scmp.lt.u32.totalorder %s2151_s21, %s3074_s8 }
  0x39   :  { %p2157_p4 = pnand %p2155_p3, %p2152_p2 }
  0x3b   :  { %2160 = shalt.err (!%p2157_p4)
}
  0x3c   :  { %s2161_s5 = scalar_lea.vmem %s103_s30, 2048  ;;  %p2166_p6 = scmp.lt.s32.totalorder %s103_s30, %s103_s30 }
  0x3d   :  { %p2162_p5 = scmp.ne.s32.totalorder %s103_s30, %s2161_s5  ;;  %p2167_p7 = scmp.lt.s32.totalorder %s2161_s5, %s2161_s5 }
  0x3f   :  { %p2168_p8 = por %p2167_p7, %p2166_p6 }
  0x41   :  { %p2169_p9 = pnand %p2168_p8, %p2162_p5 }
  0x43   :  { %2172 = shalt.err (!%p2169_p9)
}
  0x44   :  { %s3100_s29 = smov 8   ;;  %s3101_s25 = smov 128  }
  0x45   :  { %108 = dma.hbm_to_vmem [thread:$0]  %s3074_s8, 2048, %s103_s30, [#allocation12], %s3101_s25, %s3101_s25, %s3100_s29  }
  0x46   :  { %s2173_s23 = scalar_lea.hbm %s3077_s11, 8192 }
  0x47   :  { %p2174_p10 = scmp.ne.s32.totalorder %s3077_s11, %s2173_s23  ;;  %p2177_p11 = scmp.lt.u32.totalorder %s2173_s23, %s3077_s11 }
  0x49   :  { %p2179_p12 = pnand %p2177_p11, %p2174_p10 }
  0x4b   :  { %2182 = shalt.err (!%p2179_p12)
}
  0x4c   :  { %s2183_s2 = scalar_lea.vmem %s2603_s1, 8192  ;;  %p2188_p0 = scmp.lt.s32.totalorder %s2603_s1, %s2603_s1 }
  0x4d   :  { %p2184_p13 = scmp.ne.s32.totalorder %s2603_s1, %s2183_s2  ;;  %p2189_p1 = scmp.lt.s32.totalorder %s2183_s2, %s2183_s2 }
  0x4f   :  { %p2190_p2 = por %p2189_p1, %p2188_p0 }
  0x51   :  { %p2191_p3 = pnand %p2190_p2, %p2184_p13 }
  0x53   :  { %2194 = shalt.err (!%p2191_p3)
}
  0x54   :  { %134 = dma.hbm_to_vmem [thread:$0]  %s3077_s11, 8192, %s2603_s1, [#allocation15], %s3101_s25, %s3101_s25, %s3100_s29  }
  0x55   :  { %s2463_s5 = smov [#allocation2]   ;;  %s2464_s27 = smov [#allocation7]  }
  0x56   :  { %s39_s26 = sshll.u32 %s2463_s5, 4  ;;  %s62_s19 = sshll.u32 %s2464_s27, 4  ;;  %s40_s26 = int_to_ptr.vmem [resolvable:$true] %s39_s26  ;;  %s2640_s19 = int_to_ptr.vmem [resolvable:$true] %s62_s19 }
  0x57   :  { %s3102_s24 = sld [smem:[#allocation35_spill]] }
  0x5d   :  { %s2195_s20 = scalar_lea.hbm %s3102_s24, 128 }
  0x5e   :  { %p2196_p4 = scmp.ne.s32.totalorder %s3102_s24, %s2195_s20  ;;  %p2199_p5 = scmp.lt.u32.totalorder %s2195_s20, %s3102_s24 }
  0x60   :  { %p2201_p6 = pnand %p2199_p5, %p2196_p4 }
  0x62   :  { %2204 = shalt.err (!%p2201_p6)
}
  0x63   :  { %s2205_s11 = scalar_lea.vmem %s40_s26, 128  ;;  %p2210_p8 = scmp.lt.s32.totalorder %s40_s26, %s40_s26 }
  0x64   :  { %p2206_p7 = scmp.ne.s32.totalorder %s40_s26, %s2205_s11  ;;  %p2211_p9 = scmp.lt.s32.totalorder %s2205_s11, %s2205_s11 }
  0x66   :  { %p2212_p10 = por %p2211_p9, %p2210_p8 }
  0x68   :  { %p2213_p11 = pnand %p2212_p10, %p2206_p7 }
  0x6a   :  { %2216 = shalt.err (!%p2213_p11)
}
  0x6b   :  { %42 = dma.hbm_to_vmem [thread:$0]  %s3102_s24, 128, %s40_s26, [#allocation3]  }
  0x6c   :  { %s2217_s27 = scalar_lea.hbm %s3069_s3, 2048 }
  0x6d   :  { %p2218_p12 = scmp.ne.s32.totalorder %s3069_s3, %s2217_s27  ;;  %p2221_p13 = scmp.lt.u32.totalorder %s2217_s27, %s3069_s3 }
  0x6f   :  { %p2223_p0 = pnand %p2221_p13, %p2218_p12 }
  0x71   :  { %2226 = shalt.err (!%p2223_p0)
}
  0x72   :  { %s2227_s21 = scalar_lea.vmem %s2640_s19, 2048  ;;  %p2232_p2 = scmp.lt.s32.totalorder %s2640_s19, %s2640_s19 }
  0x73   :  { %p2228_p1 = scmp.ne.s32.totalorder %s2640_s19, %s2227_s21  ;;  %p2233_p3 = scmp.lt.s32.totalorder %s2227_s21, %s2227_s21 }
  0x75   :  { %p2234_p4 = por %p2233_p3, %p2232_p2 }
  0x77   :  { %p2235_p5 = pnand %p2234_p4, %p2228_p1 }
  0x79   :  { %2238 = shalt.err (!%p2235_p5)
}
  0x7a   :  { %68 = dma.hbm_to_vmem [thread:$0]  %s3069_s3, 2048, %s2640_s19, [#allocation6], %s3101_s25, %s3101_s25, %s3100_s29  }
  0x7b   :  { %s2465_s22 = smov [#allocation10]   ;;  %s2466_s11 = smov [#allocation13]  }
  0x7c   :  { %s90_s2 = sshll.u32 %s2465_s22, 4  ;;  %s114_s1 = sshll.u32 %s2466_s11, 4  ;;  %s91_s2 = int_to_ptr.vmem [resolvable:$true] %s90_s2  ;;  %s2674_s1 = int_to_ptr.vmem [resolvable:$true] %s114_s1 }
  0x7d   :  { %s2239_s5 = scalar_lea.hbm %s3073_s7, 8192 }
  0x7e   :  { %p2240_p6 = scmp.ne.s32.totalorder %s3073_s7, %s2239_s5  ;;  %p2243_p7 = scmp.lt.u32.totalorder %s2239_s5, %s3073_s7 }
  0x80   :  { %p2245_p8 = pnand %p2243_p7, %p2240_p6 }
  0x82   :  { %2248 = shalt.err (!%p2245_p8)
}
  0x83   :  { %s2249_s3 = scalar_lea.vmem %s91_s2, 8192  ;;  %p2254_p10 = scmp.lt.s32.totalorder %s91_s2, %s91_s2 }
  0x84   :  { %p2250_p9 = scmp.ne.s32.totalorder %s91_s2, %s2249_s3  ;;  %p2255_p11 = scmp.lt.s32.totalorder %s2249_s3, %s2249_s3 }
  0x86   :  { %p2256_p12 = por %p2255_p11, %p2254_p10 }
  0x88   :  { %p2257_p13 = pnand %p2256_p12, %p2250_p9 }
  0x8a   :  { %2260 = shalt.err (!%p2257_p13)
}
  0x8b   :  { %96 = dma.hbm_to_vmem [thread:$0]  %s3073_s7, 8192, %s91_s2, [#allocation9], %s3101_s25, %s3101_s25, %s3100_s29  }
  0x8c   :  { %s2261_s24 = scalar_lea.hbm %s3075_s9, 2048 }
  0x8d   :  { %p2262_p0 = scmp.ne.s32.totalorder %s3075_s9, %s2261_s24  ;;  %p2265_p1 = scmp.lt.u32.totalorder %s2261_s24, %s3075_s9 }
  0x8f   :  { %p2267_p2 = pnand %p2265_p1, %p2262_p0 }
  0x91   :  { %2270 = shalt.err (!%p2267_p2)
}
  0x92   :  { %s2271_s5 = scalar_lea.vmem %s2674_s1, 2048  ;;  %p2276_p4 = scmp.lt.s32.totalorder %s2674_s1, %s2674_s1 }
  0x93   :  { %p2272_p3 = scmp.ne.s32.totalorder %s2674_s1, %s2271_s5  ;;  %p2277_p5 = scmp.lt.s32.totalorder %s2271_s5, %s2271_s5 }
  0x95   :  { %p2278_p6 = por %p2277_p5, %p2276_p4 }
  0x97   :  { %p2279_p7 = pnand %p2278_p6, %p2272_p3 }
  0x99   :  { %2282 = shalt.err (!%p2279_p7)
}
  0x9a   :  { %s3103_s7 = smov 512   ;;  %s2467_s18 = smov [#allocation16]  }
  0x9b   :  { %120 = dma.hbm_to_vmem [thread:$0]  %s3075_s9, 2048, %s2674_s1, [#allocation12], %s3103_s7, %s3103_s7, %s2460_s0  }
  0x9c   :  { %s140_s28 = sshll.u32 %s2467_s18, 4  ;;  %s2283_s19 = scalar_lea.hbm %s3078_s12, 2048  ;;  %s141_s28 = int_to_ptr.vmem [resolvable:$true] %s140_s28 }
  0x9d   :  { %p2284_p8 = scmp.ne.s32.totalorder %s3078_s12, %s2283_s19  ;;  %p2287_p9 = scmp.lt.u32.totalorder %s2283_s19, %s3078_s12 }
  0x9f   :  { %p2289_p10 = pnand %p2287_p9, %p2284_p8 }
  0xa1   :  { %2292 = shalt.err (!%p2289_p10)
}
  0xa2   :  { %s2293_s22 = scalar_lea.vmem %s141_s28, 2048  ;;  %p2298_p12 = scmp.lt.s32.totalorder %s141_s28, %s141_s28 }
  0xa3   :  { %p2294_p11 = scmp.ne.s32.totalorder %s141_s28, %s2293_s22  ;;  %p2299_p13 = scmp.lt.s32.totalorder %s2293_s22, %s2293_s22 }
  0xa5   :  { %p2300_p0 = por %p2299_p13, %p2298_p12 }
  0xa7   :  { %p2301_p1 = pnand %p2300_p0, %p2294_p11 }
  0xa9   :  { %2304 = shalt.err (!%p2301_p1)
}
  0xaa   :  { %146 = dma.hbm_to_vmem [thread:$0]  %s3078_s12, 2048, %s141_s28, [#allocation15], %s3101_s25, %s3101_s25, %s3100_s29  }
  0xab   :  { %2437 = dma.done.wait [#allocation3], 128  }
  0xac   :  { %2438 = vsyncadd [#allocation3], 4294967168 }
  0xad   :  { %2439 = dma.done.wait [#allocation6], 2560  }
  0xae   :  { %2440 = vsyncadd [#allocation6], 4294964736 }
  0xaf   :  { %2441 = dma.done.wait [#allocation9], 10240  }
  0xb0   :  { %2442 = vsyncadd [#allocation9], 4294957056 }
  0xb1   :  { %2443 = dma.done.wait [#allocation12], 4096  }
  0xb2   :  { %2444 = vsyncadd [#allocation12], 4294963200 }
  0xb3   :  { %2445 = dma.done.wait [#allocation15], 10240  }
  0xb4   :  { %2446 = vsyncadd [#allocation15], 4294957056  ;;  %v2468_v0 = vmov 0.0|0.0   ;;  %vm3094_vm0 = vmmov 0   ;;  %v2470_v1 = vmov 0.0   ;;  %v175_v2 = vld [vmem:[#allocation5] sm:$0xff]  ;;  %v260_v9 = vlaneseq }
  0xb5   :  { %1838 = vmatprep.subr.bf16.mxu0 %v2468_v0  ;;  %1730 = vmatprep.mubr.msk.f32.mxu0 %vm3094_vm0, %v2470_v1  ;;  %v176_v3 = vld [vmem:[#allocation5 + $0x8] sm:$0xff]  ;;  %v177_v4 = vld [vmem:[#allocation5 + $0x10] sm:$0xff]  ;;  %v178_v6 = vld [vmem:[#allocation5 + $0x18] sm:$0xff]  ;;  %vm186_vm1 = vcmask 261120   ;;  %s3104_s25 = sld [smem:[#allocation37_spill]]  ;;  %s2473_s7 = smov [#allocation21]  }
  0xb6   :  { %1844 = vmatprep.subr.bf16.mxu1 %v2468_v0  ;;  %1765 = vmatprep.mubr.msk.f32.mxu1 %vm3094_vm0, %v2470_v1  ;;  %v1839_v5 = vpack.c.bf16 %v176_v3, %v175_v2  ;;  %v1842_v7 = vpack.c.bf16 %v178_v6, %v177_v4  ;;  %v2733_v8 = vld [vmem:[#allocation2] sm:$0xff]  ;;  %v2739_v10 = vand.u32 127, %v260_v9  ;;  %v277_v16 = vld [vmem:[#allocation7] sm:$0xff]  ;;  %v278_v17 = vld [vmem:[#allocation7 + $0x8] sm:$0xff]  ;;  %s1465_s2 = sshll.u32 %s2473_s7, 4  ;;  %s1466_s2 = int_to_ptr.vmem [resolvable:$true] %s1465_s2 }
  0xb7   :  { %v279_v18 = vld [vmem:[#allocation7 + $0x10] sm:$0xff]  ;;  %v1845_v19 = vpack.c.bf16 %v278_v17, %v277_v16  ;;  %v280_v20 = vld [vmem:[#allocation7 + $0x18] sm:$0xff]  ;;  %v281_v22 = vld [vmem:[#allocation7 + $0x20] sm:$0xff] }
  0xb8   :  { %1840 = vmatpush3.bf16.msra.mxu0 %v1839_v5  ;;  %vm262_vm2 = vcmp.lt.s32.totalorder %v2739_v10, 4  ;;  %v1848_v21 = vpack.c.bf16 %v280_v20, %v279_v18  ;;  %v282_v23 = vld [vmem:[#allocation7 + $0x28] sm:$0xff]  ;;  %v283_v25 = vld [vmem:[#allocation7 + $0x30] sm:$0xff]  ;;  %v284_v26 = vld [vmem:[#allocation7 + $0x38] sm:$0xff] }
  0xb9   :  { %1841 = vmatprep.subr.bf16.mxu0 %v2468_v0  ;;  %1846 = vmatpush3.bf16.msra.mxu1 %v1845_v19  ;;  %v1851_v24 = vpack.c.bf16 %v282_v23, %v281_v22  ;;  %v1854_v27 = vpack.c.bf16 %v284_v26, %v283_v25  ;;  %v285_v33 = vld [vmem:[#allocation7 + $0x40] sm:$0xff]  ;;  %v286_v34 = vld [vmem:[#allocation7 + $0x48] sm:$0xff]  ;;  %v287_v36 = vld [vmem:[#allocation7 + $0x50] sm:$0xff] }
  0xba   :  { %1847 = vmatprep.subr.bf16.mxu1 %v2468_v0  ;;  %v1857_v35 = vpack.c.bf16 %v286_v34, %v285_v33  ;;  %v288_v37 = vld [vmem:[#allocation7 + $0x58] sm:$0xff]  ;;  %v289_v39 = vld [vmem:[#allocation7 + $0x60] sm:$0xff]  ;;  %v290_v40 = vld [vmem:[#allocation7 + $0x68] sm:$0xff] }
  0xbb   :  { %v1516_v11 = vld [vmem:[%s3104_s25] ss:$0 sm:$0xff]  ;;  %v1860_v38 = vpack.c.bf16 %v288_v37, %v287_v36  ;;  %v1863_v41 = vpack.c.bf16 %v290_v40, %v289_v39  ;;  %v291_v42 = vld [vmem:[#allocation7 + $0x70] sm:$0xff]  ;;  %v384_v45 = vld [vmem:[#allocation8 + $0x8] sm:$0xff]  ;;  %v375_v37 = vcvt.s32.f32 %v2739_v10 }
  0xbc   :  { %1843 = vmatpush3.bf16.msra.mxu0 %v1842_v7  ;;  %v292_v43 = vld [vmem:[#allocation7 + $0x78] sm:$0xff]  ;;  %v388_v46 = vld [vmem:[#allocation8 + $0x28] sm:$0xff]  ;;  %v383_v47 = vld [vmem:[#allocation8] sm:$0xff] }
  0xbd   :  { %1849 = vmatpush3.bf16.msra.mxu1 %v1848_v21  ;;  %v1866_v44 = vpack.c.bf16 %v292_v43, %v291_v42  ;;  %v1868_v48 = vpack.c.bf16 %v388_v46, %v384_v45  ;;  %v387_v49 = vld [vmem:[#allocation8 + $0x20] sm:$0xff]  ;;  %v392_v50 = vld [vmem:[#allocation8 + $0x48] sm:$0xff]  ;;  %v386_v56 = vld [vmem:[#allocation8 + $0x18] sm:$0xff] }
  0xbe   :  { %1850 = vmatprep.subr.bf16.mxu1 %v2468_v0  ;;  %v396_v51 = vld [vmem:[#allocation8 + $0x68] sm:$0xff]  ;;  %v1870_v52 = vpack.c.bf16 %v387_v49, %v383_v47  ;;  %v391_v54 = vld [vmem:[#allocation8 + $0x40] sm:$0xff]  ;;  %v390_v57 = vld [vmem:[#allocation8 + $0x38] sm:$0xff] }
  0xbf   :  { %1731 = vmatmul.mubr.msk.f32.vlgmr.msra.gmra.mrb[0].mxu0 %vm186_vm1, %v2733_v8  ;;  %v1872_v53 = vpack.c.bf16 %v396_v51, %v392_v50  ;;  %v395_v55 = vld [vmem:[#allocation8 + $0x60] sm:$0xff]  ;;  %1869 = vmatprep.subr.bf16.mxu0 %v1868_v48  ;;  %v1876_v59 = vpack.c.bf16 %v390_v57, %v386_v56  ;;  %v385_v60 = vld [vmem:[#allocation8 + $0x10] sm:$0xff]  ;;  %v394_v62 = vld [vmem:[#allocation8 + $0x58] sm:$0xff]  ;;  %v2783_v51 = vshrl.u32 %v260_v9, 7  ;;  %v565_v9 = vadd.s32 384, %v2739_v10 }
  0xc0   :  { %485 = vmatprep.mubr.f32.mxu0 %v2470_v1  ;;  %1871 = vmatpush1.bf16.msra.mxu0 %v1870_v52  ;;  %v1874_v58 = vpack.c.bf16 %v395_v55, %v391_v54  ;;  %v389_v61 = vld [vmem:[#allocation8 + $0x30] sm:$0xff]  ;;  %v398_v63 = vld [vmem:[#allocation8 + $0x78] sm:$0xff]  ;;  %v685_v16 = vld [vmem:[#allocation11] sm:$0xff] }
  0xc1   :  { %1852 = vmatpush3.bf16.msra.mxu1 %v1851_v24  ;;  %1873 = vmatprep.subr.bf16.mxu0 %v1872_v53  ;;  %v1878_v2 = vpack.c.bf16 %v389_v61, %v385_v60  ;;  %v1880_v3 = vpack.c.bf16 %v398_v63, %v394_v62  ;;  %v393_v4 = vld [vmem:[#allocation8 + $0x50] sm:$0xff]  ;;  %v686_v17 = vld [vmem:[#allocation11 + $0x8] sm:$0xff]  ;;  %v688_v20 = vld [vmem:[#allocation11 + $0x18] sm:$0xff]  ;;  %v403_v53 = vsub.s32 0, %v2783_v51  ;;  %v407_v54 = vsub.s32 1, %v2783_v51 }
  0xc2   :  { %1853 = vmatprep.subr.bf16.mxu1 %v2468_v0  ;;  %v397_v5 = vld [vmem:[#allocation8 + $0x70] sm:$0xff]  ;;  %v1885_v19 = vpack.c.bf16 %v686_v17, %v685_v16  ;;  %v689_v22 = vld [vmem:[#allocation11 + $0x20] sm:$0xff]  ;;  %v690_v23 = vld [vmem:[#allocation11 + $0x28] sm:$0xff]  ;;  %v411_v55 = vsub.s32 2, %v2783_v51  ;;  %v564_v60 = vadd.s32 256, %v2739_v10 }
  0xc3   :  { %v1882_v6 = vpack.c.bf16 %v397_v5, %v393_v4  ;;  %v687_v18 = vld [vmem:[#allocation11 + $0x10] sm:$0xff]  ;;  %v1891_v24 = vpack.c.bf16 %v690_v23, %v689_v22  ;;  %v692_v26 = vld [vmem:[#allocation11 + $0x38] sm:$0xff]  ;;  %v697_v34 = vld [vmem:[#allocation11 + $0x60] sm:$0xff]  ;;  %v2471_v4 = vmov 1.0  }
  0xc4   :  { %1875 = vmatpush1.bf16.msra.mxu0 %v1874_v58  ;;  %v1888_v21 = vpack.c.bf16 %v688_v20, %v687_v18  ;;  %v691_v25 = vld [vmem:[#allocation11 + $0x30] sm:$0xff]  ;;  %v1518_v47 = vld [vmem:[%s3070_s4] ss:$0 sm:$0xff]  ;;  %v563_v58 = vadd.s32 128, %v2739_v10 }
  0xc5   :  { %1855 = vmatpush3.bf16.msra.mxu1 %v1854_v27  ;;  %1877 = vmatprep.subr.bf16.mxu0 %v1876_v59  ;;  %v1894_v27 = vpack.c.bf16 %v692_v26, %v691_v25  ;;  %v699_v40 = vld [vmem:[#allocation11 + $0x70] sm:$0xff]  ;;  %v399_v57 = vld [vmem:[%s3072_s6] sm:$0xf] }
  0xc6   :  { %1856 = vmatprep.subr.bf16.mxu1 %v2468_v0  ;;  %v404_v61 = vrot.slane %v399_v57, %v403_v53  ;;  %v408_v62 = vrot.slane %v399_v57, %v407_v54  ;;  %v412_v63 = vrot.slane %v399_v57, %v411_v55 }
  0xc7   :  { %1520 = vmatmul.mubr.msk.f32.vlgmr.msra.gmra.mrb[2].mxu0 %vm186_vm1, %v2733_v8 }
  0xc8   :  { %1879 = vmatpush1.bf16.msra.mxu0 %v1878_v2  ;;  %556 = vmatprep.mubr.f32.mxu0 %v2470_v1  ;;  %v415_v2 = vsub.s32 3, %v2783_v51 }
  0xc9   :  { %1858 = vmatpush3.bf16.msra.mxu1 %v1857_v35  ;;  %1881 = vmatprep.subr.bf16.mxu0 %v1880_v3  ;;  %v698_v35 = vld [vmem:[#allocation11 + $0x68] sm:$0xff] }
  0xca   :  { %1859 = vmatprep.subr.bf16.mxu1 %v2468_v0  ;;  %v1903_v36 = vpack.c.bf16 %v698_v35, %v697_v34  ;;  %v669_v34 = vld [vmem:[#allocation10 + $0x180] sm:$0xff] }
  0xcc   :  { %1883 = vmatpush1.bf16.msra.mxu0 %v1882_v6 }
  0xcd   :  { %1861 = vmatpush3.bf16.msra.mxu1 %v1860_v38  ;;  %1884 = vmatprep.subr.bf16.mxu0 %v2468_v0 }
  0xce   :  { %1862 = vmatprep.subr.bf16.mxu1 %v2468_v0 }
  0xcf   :  { %1521 = vmatmul.mubr.msk.f32.vlgmr.msra.gmra.mrb[4].mxu0 %vm186_vm1, %v2733_v8 }
  0xd0   :  { %1800 = vmatprep.mubr.msk.f32.mxu0 %vm3094_vm0, %v2470_v1  ;;  %1886 = vmatpush3.bf16.msra.mxu0 %v1885_v19 }
  0xd1   :  { %1864 = vmatpush3.bf16.msra.mxu1 %v1863_v41  ;;  %1887 = vmatprep.subr.bf16.mxu0 %v2468_v0  ;;  %v700_v41 = vld [vmem:[#allocation11 + $0x78] sm:$0xff] }
  0xd2   :  { %1865 = vmatprep.subr.bf16.mxu1 %v2468_v0  ;;  %v1906_v43 = vpack.c.bf16 %v700_v41, %v699_v40  ;;  %v653_v41 = vld [vmem:[#allocation10 + $0x100] sm:$0xff] }
  0xd4   :  { %1889 = vmatpush3.bf16.msra.mxu0 %v1888_v21 }
  0xd5   :  { %1867 = vmatpush3.bf16.msra.mxu1 %v1866_v44  ;;  %1890 = vmatprep.subr.bf16.mxu0 %v2468_v0 }
  0xd8   :  { %1892 = vmatpush3.bf16.msra.mxu0 %v1891_v24 }
  0xd9   :  { %1893 = vmatprep.subr.bf16.mxu0 %v2468_v0 }
  0xdc   :  { %1895 = vmatpush3.bf16.msra.mxu0 %v1894_v27 }
  0xdd   :  { %1896 = vmatprep.subr.bf16.mxu0 %v2468_v0 }
 0x192   :  { %v256_v12 = vpop.f32.mrb[0].mxu0 }
 0x193   :  { %v257_v13 = vadd.f32 %v1516_v11, %v256_v12  ;;  %v1732_v14 = vpop.f32.mrb[1].mxu0 }
 0x195   :  { %v263_v15 = vsel %vm262_vm2, %v257_v13, 0.0 }
 0x196   :  { %264 = vadd.xlane.f32.xlu0 %v263_v15 }
 0x19a   :  { %v487_v42 = vpop.f32.mrb[2].mxu0 }
 0x19b   :  { %v489_v44 = vpop.f32.mrb[3].mxu0 }
 0x1a2   :  { %v558_v45 = vpop.f32.mrb[4].mxu0 }
 0x1a3   :  { %v560_v46 = vpop.f32.mrb[5].mxu0 }
 0x223   :  { %v265_v28 = vpop.xlane.xlu0 %264 }
 0x224   :  { %v266_v29 = vmul.f32 0.25, %v265_v28  ;;  %v693_v28 = vld [vmem:[#allocation11 + $0x40] sm:$0xff] }
 0x226   :  { %v267_v30 = vsub.f32 %v263_v15, %v266_v29  ;;  %v694_v29 = vld [vmem:[#allocation11 + $0x48] sm:$0xff] }
 0x228   :  { %v2753_v31 = vsel %vm262_vm2, %v267_v30, 0.0  ;;  %v1897_v30 = vpack.c.bf16 %v694_v29, %v693_v28 }
 0x229   :  { %v269_v32 = vmul.f32 %v2753_v31, %v2753_v31 }
 0x22a   :  { %1898 = vmatpush3.bf16.msra.mxu0 %v1897_v30 }
 0x22b   :  { %270 = vadd.xlane.f32.xlu0 %v269_v32  ;;  %v696_v32 = vld [vmem:[#allocation11 + $0x58] sm:$0xff]  ;;  %1899 = vmatprep.subr.bf16.mxu0 %v2468_v0 }
 0x2b8   :  { %v271_v7 = vpop.xlane.xlu0 %270 }
 0x2b9   :  { %v272_v11 = vmul.f32 0.25, %v271_v7 }
 0x2bb   :  { %v273_v12 = vadd.f32 1e-05, %v272_v11 }
 0x2bd   :  { %2101 = vrsqrt.f32 %v273_v12  ;;  %v488_v12 = vadd.f32 %v487_v42, %v404_v61  ;;  %v654_v42 = vld [vmem:[#allocation10 + $0x108] sm:$0xff] }
 0x2c7   :  { %v2102_v13 = vpop.eup %2101 }
 0x2c8   :  { %v275_v14 = vmul.f32 %v2102_v13, %v2753_v31  ;;  %v695_v31 = vld [vmem:[#allocation11 + $0x50] sm:$0xff]  ;;  %v490_v13 = vadd.f32 %v489_v44, %v408_v62  ;;  %v1942_v44 = vpack.c.bf16 %v654_v42, %v653_v41 }
 0x2c9   :  { %v1900_v33 = vpack.c.bf16 %v696_v32, %v695_v31  ;;  %v637_v32 = vld [vmem:[#allocation10 + $0x80] sm:$0xff] }
 0x2ca   :  { %1766 = vmatmul.mubr.f32.vlgmr.msra.gmra.mrb[0].mxu1 %v275_v14  ;;  %276 = vst [vmem:[#allocation17] sm:$0xff] %v275_v14  ;;  %v371_v15 = vsel %vm262_vm2, %v275_v14, -inf  ;;  %v559_v14 = vadd.f32 %v558_v45, %v412_v63  ;;  %v640_v45 = vld [vmem:[#allocation10 + $0x98] sm:$0xff]  ;;  %v673_v63 = vld [vmem:[#allocation10 + $0x1a0] sm:$0xff] }
 0x2cb   :  { %372 = vmax.xlane.f32.xlu1 %v371_v15  ;;  %1901 = vmatpush3.bf16.msra.mxu0 %v1900_v33  ;;  %v638_v33 = vld [vmem:[#allocation10 + $0x88] sm:$0xff] }
 0x2cc   :  { %1902 = vmatprep.subr.bf16.mxu0 %v2468_v0  ;;  %v1908_v35 = vpack.c.bf16 %v638_v33, %v637_v32  ;;  %v627_v32 = vld [vmem:[#allocation10 + $0x30] sm:$0xff]  ;;  %v628_v33 = vld [vmem:[#allocation10 + $0x38] sm:$0xff] }
 0x2ce   :  { %1909 = vmatprep.subr.bf16.mxu1 %v1908_v35  ;;  %v659_v35 = vld [vmem:[#allocation10 + $0x130] sm:$0xff] }
 0x2cf   :  { %1904 = vmatpush3.bf16.msra.mxu0 %v1903_v36  ;;  %v670_v36 = vld [vmem:[#allocation10 + $0x188] sm:$0xff] }
 0x2d0   :  { %1905 = vmatprep.subr.bf16.mxu0 %v2468_v0 }
 0x2d3   :  { %1907 = vmatpush3.bf16.msra.mxu0 %v1906_v43  ;;  %v639_v43 = vld [vmem:[#allocation10 + $0x90] sm:$0xff] }
 0x358   :  { %v373_v38 = vpop.xlane.xlu1 %372 }
 0x359   :  { %vm374_vm3 = vcmp.eq.f32.partialorder %v371_v15, %v373_v38  ;;  %v416_v15 = vrot.slane %v399_v57, %v415_v2  ;;  %v622_v38 = vld [vmem:[#allocation10 + $0x8] sm:$0xff] }
 0x35a   :  { %v376_v39 = vsel %vm374_vm3, %v375_v37, 128.0  ;;  %v621_v37 = vld [vmem:[#allocation10] sm:$0xff] }
 0x35b   :  { %377 = vmin.xlane.f32.xlu1 %v376_v39  ;;  %v561_v21 = vadd.f32 %v560_v46, %v416_v15  ;;  %v1940_v39 = vpack.c.bf16 %v670_v36, %v669_v34  ;;  %v1910_v40 = vpack.c.bf16 %v622_v38, %v621_v37  ;;  %v671_v46 = vld [vmem:[#allocation10 + $0x190] sm:$0xff]  ;;  %v644_v15 = vld [vmem:[#allocation10 + $0xb8] sm:$0xff]  ;;  %v1922_v37 = vpack.c.bf16 %v628_v33, %v627_v32  ;;  %v650_v32 = vld [vmem:[#allocation10 + $0xe8] sm:$0xff] }
 0x35c   :  { %v660_v36 = vld [vmem:[#allocation10 + $0x138] sm:$0xff]  ;;  %v681_v33 = vld [vmem:[#allocation10 + $0x1e0] sm:$0xff] }
 0x35d   :  { %1941 = vmatprep.subr.bf16.mxu0 %v1940_v39  ;;  %1911 = vmatpush3.bf16.msra.mxu1 %v1910_v40  ;;  %v1954_v38 = vpack.c.bf16 %v660_v36, %v659_v35 }
 0x39d   :  { %v366_v48 = vpop.f32.mrb[0].mxu1 }
 0x39e   :  { %v367_v49 = vadd.f32 %v1518_v47, %v366_v48  ;;  %v1767_v50 = vpop.f32.mrb[1].mxu1  ;;  %v672_v47 = vld [vmem:[#allocation10 + $0x198] sm:$0xff]  ;;  %v1912_v48 = vpack.c.bf16 %v640_v45, %v639_v43 }
 0x39f   :  { %v623_v50 = vld [vmem:[#allocation10 + $0x10] sm:$0xff] }
 0x3a0   :  { %370 = vst [vmem:[#allocation18] sm:$0xff] %v367_v49  ;;  %v1944_v49 = vpack.c.bf16 %v672_v47, %v671_v46  ;;  %1913 = vmatprep.subr.bf16.mxu1 %v1912_v48 }
 0x3e8   :  { %v378_v52 = vpop.xlane.xlu1 %377 }
 0x3e9   :  { %v2076_v56 = vtrunc.f32 %v378_v52  ;;  %v624_v52 = vld [vmem:[#allocation10 + $0x18] sm:$0xff] }
 0x3ea   :  { %v1914_v57 = vpack.c.bf16 %v624_v52, %v623_v50  ;;  %v646_v50 = vld [vmem:[#allocation10 + $0xc8] sm:$0xff]  ;;  %v677_v52 = vld [vmem:[#allocation10 + $0x1c0] sm:$0xff] }
 0x3eb   :  { %v2792_v59 = vcvt.f32.s32 %v2076_v56  ;;  %v655_v56 = vld [vmem:[#allocation10 + $0x110] sm:$0xff] }
 0x3ec   :  { %1915 = vmatpush3.bf16.msra.mxu1 %v1914_v57  ;;  %v678_v57 = vld [vmem:[#allocation10 + $0x1c8] sm:$0xff] }
 0x3ed   :  { %vm3093_vm4 = vcmp.eq.s32.totalorder %v2739_v10, %v2792_v59  ;;  %v566_v3 = vmul.u32 128, %v2792_v59  ;;  %v1956_v23 = vpack.c.bf16 %v678_v57, %v677_v52  ;;  %v917_v57 = vld [vmem:[#allocation13 + $0x28] sm:$0xff] }
 0x3ee   :  { %1801 = vmatmul.mubr.msk.f32.vlgmr.msra.gmra.mrb[6].mxu0 %vm3093_vm4, %v2471_v4 }
 0x3ef   :  { %v567_v5 = vsub.s32 %v2739_v10, %v566_v3  ;;  %v568_v6 = vsub.s32 %v563_v58, %v566_v3  ;;  %v569_v7 = vsub.s32 %v564_v60, %v566_v3  ;;  %v570_v11 = vsub.s32 %v565_v9, %v566_v3  ;;  %1943 = vmatpush3.bf16.msra.mxu0 %v1942_v44  ;;  %v656_v58 = vld [vmem:[#allocation10 + $0x118] sm:$0xff]  ;;  %v641_v60 = vld [vmem:[#allocation10 + $0xa0] sm:$0xff]  ;;  %v642_v9 = vld [vmem:[#allocation10 + $0xa8] sm:$0xff] }
 0x3f0   :  { %1945 = vmatprep.subr.bf16.mxu0 %v1944_v49  ;;  %v1946_v61 = vpack.c.bf16 %v656_v58, %v655_v56  ;;  %v1916_v62 = vpack.c.bf16 %v642_v9, %v641_v60  ;;  %v674_v3 = vld [vmem:[#allocation10 + $0x1a8] sm:$0xff]  ;;  %v645_v49 = vld [vmem:[#allocation10 + $0xc0] sm:$0xff] }
 0x3f1   :  { %vm571_vm5 = vcmp.ge.s32.totalorder %v567_v5, 0  ;;  %vm575_vm6 = vcmp.lt.s32.totalorder %v567_v5, 6  ;;  %vm572_vm7 = vcmp.ge.s32.totalorder %v568_v6, 0  ;;  %vm576_vm8 = vcmp.lt.s32.totalorder %v568_v6, 6  ;;  %v629_v58 = vld [vmem:[#allocation10 + $0x40] sm:$0xff]  ;;  %v630_v60 = vld [vmem:[#allocation10 + $0x48] sm:$0xff] }
 0x3f2   :  { %vm2814_vm9 = vmand %vm571_vm5, %vm575_vm6  ;;  %vm573_vm10 = vcmp.ge.s32.totalorder %v569_v7, 0  ;;  %vm577_vm11 = vcmp.lt.s32.totalorder %v569_v7, 6  ;;  %vm574_vm12 = vcmp.ge.s32.totalorder %v570_v11, 0  ;;  %vm578_vm13 = vcmp.lt.s32.totalorder %v570_v11, 6  ;;  %1917 = vmatprep.subr.bf16.mxu1 %v1916_v62  ;;  %v662_v62 = vld [vmem:[#allocation10 + $0x148] sm:$0xff] }
 0x3f3   :  { %v2820_v17 = vsel %vm2814_vm9, %v488_v12, 0.0  ;;  %vm2823_vm14 = vmand %vm572_vm7, %vm576_vm8  ;;  %vm1092_vm15 = vcmp.lt.s32.totalorder %v567_v5, 10  ;;  %vm1094_vm3 = vcmp.lt.s32.totalorder %v569_v7, 10  ;;  %vm1093_vm8 = vcmp.lt.s32.totalorder %v568_v6, 10  ;;  %v625_v5 = vld [vmem:[#allocation10 + $0x20] sm:$0xff]  ;;  %v626_v7 = vld [vmem:[#allocation10 + $0x28] sm:$0xff]  ;;  %1947 = vmatpush3.bf16.msra.mxu0 %v1946_v61 }
 0x3f4   :  { %v2829_v19 = vsel %vm2823_vm14, %v490_v13, 0.0  ;;  %vm2832_vm2 = vmand %vm573_vm10, %vm577_vm11  ;;  %vm1095_vm4 = vcmp.lt.s32.totalorder %v570_v11, 10  ;;  %v1948_v6 = vpack.c.bf16 %v674_v3, %v673_v63  ;;  %v657_v11 = vld [vmem:[#allocation10 + $0x120] sm:$0xff]  ;;  %v658_v12 = vld [vmem:[#allocation10 + $0x128] sm:$0xff]  ;;  %v1918_v13 = vpack.c.bf16 %v626_v7, %v625_v5 }
 0x3f5   :  { %v587_v22 = vadd.f32 %v2829_v19, %v2820_v17  ;;  %vm2839_vm6 = vmand %vm574_vm12, %vm578_vm13  ;;  %v2845_v24 = vsel %vm2832_vm2, %v559_v14, 0.0  ;;  %v643_v14 = vld [vmem:[#allocation10 + $0xb0] sm:$0xff]  ;;  %v1924_v56 = vpack.c.bf16 %v646_v50, %v645_v49  ;;  %v1926_v9 = vpack.c.bf16 %v630_v60, %v629_v58  ;;  %v661_v61 = vld [vmem:[#allocation10 + $0x140] sm:$0xff] }
 0x3f6   :  { %vm2848_vm11 = vmand %vm571_vm5, %vm1092_vm15  ;;  %v2860_v28 = vsel %vm2839_vm6, %v561_v21, 0.0  ;;  %v675_v21 = vld [vmem:[#allocation10 + $0x1b0] sm:$0xff]  ;;  %1949 = vmatprep.subr.bf16.mxu0 %v1948_v6  ;;  %1919 = vmatpush3.bf16.msra.mxu1 %v1918_v13  ;;  %v1958_v63 = vpack.c.bf16 %v662_v62, %v661_v61  ;;  %v648_v5 = vld [vmem:[#allocation10 + $0xd8] sm:$0xff] }
 0x3f7   :  { %v588_v26 = vadd.f32 %v587_v22, %v2845_v24  ;;  %vm2854_vm0 = vmand %vm573_vm10, %vm1094_vm3  ;;  %v1950_v22 = vpack.c.bf16 %v658_v12, %v657_v11  ;;  %v647_v3 = vld [vmem:[#allocation10 + $0xd0] sm:$0xff]  ;;  %v680_v11 = vld [vmem:[#allocation10 + $0x1d8] sm:$0xff] }
 0x3f8   :  { %vm2863_vm13 = vmand %vm572_vm7, %vm1093_vm8  ;;  %v679_v6 = vld [vmem:[#allocation10 + $0x1d0] sm:$0xff]  ;;  %v1928_v7 = vpack.c.bf16 %v648_v5, %v647_v3  ;;  %v632_v13 = vld [vmem:[#allocation10 + $0x58] sm:$0xff] }
 0x3f9   :  { %v589_v30 = vadd.f32 %v588_v26, %v2860_v28  ;;  %vm2869_vm5 = vmand %vm574_vm12, %vm1095_vm4  ;;  %v1920_v26 = vpack.c.bf16 %v644_v15, %v643_v14  ;;  %1951 = vmatpush3.bf16.msra.mxu0 %v1950_v22  ;;  %v631_v12 = vld [vmem:[#allocation10 + $0x50] sm:$0xff]  ;;  %v1960_v14 = vpack.c.bf16 %v680_v11, %v679_v6  ;;  %v664_v22 = vld [vmem:[#allocation10 + $0x158] sm:$0xff]  ;;  %vm3121_vm4 = vmmov 0  }
 0x3fa   :  { %v1930_v15 = vpack.c.bf16 %v632_v13, %v631_v12  ;;  %v668_v49 = vld [vmem:[#allocation10 + $0x178] sm:$0xff]  ;;  %v912_v6 = vld [vmem:[#allocation13] sm:$0xff]  ;;  %v914_v11 = vld [vmem:[#allocation13 + $0x10] sm:$0xff] }
 0x3fb   :  { %590 = vadd.xlane.f32.xlu0 %v589_v30  ;;  %v676_v30 = vld [vmem:[#allocation10 + $0x1b8] sm:$0xff]  ;;  %1921 = vmatprep.subr.bf16.mxu1 %v1920_v26  ;;  %v649_v26 = vld [vmem:[#allocation10 + $0xe0] sm:$0xff]  ;;  %v918_v12 = vld [vmem:[#allocation13 + $0x30] sm:$0xff] }
 0x3fc   :  { %v1952_v34 = vpack.c.bf16 %v676_v30, %v675_v21  ;;  %1923 = vmatpush3.bf16.msra.mxu1 %v1922_v37  ;;  %v663_v21 = vld [vmem:[#allocation10 + $0x150] sm:$0xff]  ;;  %v1932_v35 = vpack.c.bf16 %v650_v32, %v649_v26  ;;  %v633_v37 = vld [vmem:[#allocation10 + $0x60] sm:$0xff]  ;;  %v915_v58 = vld [vmem:[#allocation13 + $0x18] sm:$0xff] }
 0x3fd   :  { %1925 = vmatprep.subr.bf16.mxu1 %v1924_v56  ;;  %v1962_v30 = vpack.c.bf16 %v664_v22, %v663_v21  ;;  %v913_v56 = vld [vmem:[#allocation13 + $0x8] sm:$0xff]  ;;  %v927_v21 = vld [vmem:[#allocation13 + $0x78] sm:$0xff] }
 0x3fe   :  { %1953 = vmatprep.subr.bf16.mxu0 %v1952_v34  ;;  %v682_v34 = vld [vmem:[#allocation10 + $0x1e8] sm:$0xff]  ;;  %v1972_v60 = vpack.c.bf16 %v917_v57, %v913_v56 }
 0x3ff   :  { %1955 = vmatpush3.bf16.msra.mxu0 %v1954_v38  ;;  %v1964_v36 = vpack.c.bf16 %v682_v34, %v681_v33  ;;  %v634_v38 = vld [vmem:[#allocation10 + $0x68] sm:$0xff] }
 0x400   :  { %1957 = vmatprep.subr.bf16.mxu0 %v1956_v23  ;;  %1927 = vmatpush3.bf16.msra.mxu1 %v1926_v9  ;;  %v919_v23 = vld [vmem:[#allocation13 + $0x38] sm:$0xff]  ;;  %v921_v13 = vld [vmem:[#allocation13 + $0x48] sm:$0xff] }
 0x401   :  { %1929 = vmatprep.subr.bf16.mxu1 %v1928_v7  ;;  %v1980_v9 = vpack.c.bf16 %v919_v23, %v915_v58  ;;  %v916_v7 = vld [vmem:[#allocation13 + $0x20] sm:$0xff]  ;;  %v1211_v56 = vld [vmem:[#allocation16 + $0x48] sm:$0xff]  ;;  %v1213_v58 = vld [vmem:[#allocation16 + $0x58] sm:$0xff] }
 0x402   :  { %v1974_v26 = vpack.c.bf16 %v916_v7, %v912_v6  ;;  %v1214_v23 = vld [vmem:[#allocation16 + $0x60] sm:$0xff] }
 0x403   :  { %1959 = vmatpush3.bf16.msra.mxu0 %v1958_v63 }
 0x404   :  { %1961 = vmatprep.subr.bf16.mxu0 %v1960_v14  ;;  %1931 = vmatpush3.bf16.msra.mxu1 %v1930_v15  ;;  %v925_v14 = vld [vmem:[#allocation13 + $0x68] sm:$0xff]  ;;  %v923_v15 = vld [vmem:[#allocation13 + $0x58] sm:$0xff] }
 0x405   :  { %1933 = vmatprep.subr.bf16.mxu1 %v1932_v35 }
 0x407   :  { %1963 = vmatpush3.bf16.msra.mxu0 %v1962_v30  ;;  %v1982_v30 = vpack.c.bf16 %v918_v12, %v914_v11 }
 0x408   :  { %1965 = vmatprep.subr.bf16.mxu0 %v1964_v36  ;;  %v920_v36 = vld [vmem:[#allocation13 + $0x40] sm:$0xff] }
 0x488   :  { %v591_v39 = vpop.xlane.xlu0 %590 }
 0x489   :  { %v592_v40 = vmul.f32 0.16666667, %v591_v39  ;;  %v665_v39 = vld [vmem:[#allocation10 + $0x160] sm:$0xff] }
 0x48b   :  { %v593_v41 = vsub.f32 %v2820_v17, %v592_v40  ;;  %v594_v42 = vsub.f32 %v2829_v19, %v592_v40  ;;  %v595_v43 = vsub.f32 %v2845_v24, %v592_v40  ;;  %v596_v44 = vsub.f32 %v2860_v28, %v592_v40 }
 0x48c   :  { %v1934_v40 = vpack.c.bf16 %v634_v38, %v633_v37  ;;  %v1976_v37 = vpack.c.bf16 %v925_v14, %v921_v13  ;;  %v1984_v38 = vpack.c.bf16 %v927_v21, %v923_v15  ;;  %v928_v15 = vld [vmem:[%s3076_s10] sm:$0xf]  ;;  %s2472_s10 = smov [#allocation18]  }
 0x48d   :  { %v2879_v45 = vsel %vm2814_vm9, %v593_v41, 0.0  ;;  %v2883_v46 = vsel %vm2823_vm14, %v594_v42, 0.0  ;;  %v2887_v47 = vsel %vm2832_vm2, %v595_v43, 0.0  ;;  %v2895_v24 = vsel %vm2839_vm6, %v596_v44, 0.0  ;;  %v666_v41 = vld [vmem:[#allocation10 + $0x168] sm:$0xff]  ;;  %v651_v42 = vld [vmem:[#allocation10 + $0xf0] sm:$0xff] }
 0x48e   :  { %v601_v17 = vmul.f32 %v2879_v45, %v2879_v45  ;;  %v602_v19 = vmul.f32 %v2883_v46, %v2883_v46  ;;  %v603_v16 = vmul.f32 %v2887_v47, %v2887_v47  ;;  %v604_v28 = vmul.f32 %v2895_v24, %v2895_v24  ;;  %v652_v43 = vld [vmem:[#allocation10 + $0xf8] sm:$0xff]  ;;  %1935 = vmatpush3.bf16.msra.mxu1 %v1934_v40  ;;  %v922_v40 = vld [vmem:[#allocation13 + $0x50] sm:$0xff]  ;;  %s1445_s5 = sshll.u32 %s2472_s10, 4  ;;  %s1446_s5 = int_to_ptr.vmem [resolvable:$true] %s1445_s5 }
 0x48f   :  { %v1966_v44 = vpack.c.bf16 %v666_v41, %v665_v39  ;;  %v924_v39 = vld [vmem:[#allocation13 + $0x60] sm:$0xff]  ;;  %v926_v41 = vld [vmem:[#allocation13 + $0x70] sm:$0xff]  ;;  %s2305_s27 = scalar_lea.vmem %s1446_s5, 128  ;;  %p2310_p3 = scmp.lt.s32.totalorder %s1446_s5, %s1446_s5 }
 0x490   :  { %v605_v18 = vadd.f32 %v602_v19, %v601_v17  ;;  %v1936_v17 = vpack.c.bf16 %v652_v43, %v651_v42  ;;  %v683_v19 = vld [vmem:[#allocation10 + $0x1f0] sm:$0xff]  ;;  %p2306_p2 = scmp.ne.s32.totalorder %s1446_s5, %s2305_s27  ;;  %p2311_p4 = scmp.lt.s32.totalorder %s2305_s27, %s2305_s27 }
 0x491   :  { %1967 = vmatpush3.bf16.msra.mxu0 %v1966_v44 }
 0x492   :  { %v606_v20 = vadd.f32 %v605_v18, %v603_v16  ;;  %v684_v16 = vld [vmem:[#allocation10 + $0x1f8] sm:$0xff]  ;;  %v635_v18 = vld [vmem:[#allocation10 + $0x70] sm:$0xff]  ;;  %1937 = vmatprep.subr.bf16.mxu1 %v1936_v17  ;;  %p2312_p5 = por %p2311_p4, %p2310_p3 }
 0x494   :  { %v607_v48 = vadd.f32 %v606_v20, %v604_v28  ;;  %v1968_v28 = vpack.c.bf16 %v684_v16, %v683_v19  ;;  %v636_v20 = vld [vmem:[#allocation10 + $0x78] sm:$0xff]  ;;  %v1204_v19 = vld [vmem:[#allocation16 + $0x10] sm:$0xff]  ;;  %p2313_p6 = pnand %p2312_p5, %p2306_p2 }
 0x495   :  { %v1938_v50 = vpack.c.bf16 %v636_v20, %v635_v18  ;;  %v1205_v16 = vld [vmem:[#allocation16 + $0x18] sm:$0xff]  ;;  %v1207_v20 = vld [vmem:[#allocation16 + $0x28] sm:$0xff] }
 0x496   :  { %608 = vadd.xlane.f32.xlu1 %v607_v48  ;;  %v667_v48 = vld [vmem:[#allocation10 + $0x170] sm:$0xff]  ;;  %1969 = vmatprep.subr.bf16.mxu0 %v1968_v28  ;;  %v1992_v18 = vpack.c.bf16 %v1205_v16, %v1204_v19  ;;  %v1206_v28 = vld [vmem:[#allocation16 + $0x20] sm:$0xff]  ;;  %v1171_v16 = vld [vmem:[#allocation14 + $0x108] sm:$0xff] }
 0x497   :  { %v1970_v52 = vpack.c.bf16 %v668_v49, %v667_v48  ;;  %1939 = vmatpush3.bf16.msra.mxu1 %v1938_v50  ;;  %v1995_v48 = vpack.c.bf16 %v1207_v20, %v1206_v28  ;;  %v1208_v49 = vld [vmem:[#allocation16 + $0x30] sm:$0xff]  ;;  %v1209_v50 = vld [vmem:[#allocation16 + $0x38] sm:$0xff]  ;;  %v1170_v19 = vld [vmem:[#allocation14 + $0x100] sm:$0xff] }
 0x498   :  { %1981 = vmatprep.subr.bf16.mxu1 %v1980_v9  ;;  %v1215_v9 = vld [vmem:[#allocation16 + $0x68] sm:$0xff]  ;;  %v2046_v28 = vpack.c.bf16 %v1171_v16, %v1170_v19  ;;  %v1157_v20 = vld [vmem:[#allocation14 + $0x98] sm:$0xff] }
 0x499   :  { %1971 = vmatpush3.bf16.msra.mxu0 %v1970_v52  ;;  %v1998_v52 = vpack.c.bf16 %v1209_v50, %v1208_v49  ;;  %v1189_v49 = vld [vmem:[#allocation14 + $0x198] sm:$0xff]  ;;  %v1147_v19 = vld [vmem:[#allocation14 + $0x48] sm:$0xff] }
 0x49a   :  { %1973 = vmatprep.subr.bf16.mxu0 %v1972_v60 }
 0x4c1   :  { %v2901_v61 = vpop.f32.mrb[6].mxu0 }
 0x4c2   :  { %v1802_v62 = vpop.f32.mrb[7].mxu0 }
 0x4c3   :  { %v2007_v62 = vpack.c.bf16 %v1215_v9, %v1214_v23  ;;  %v1159_v23 = vld [vmem:[#allocation14 + $0xa8] sm:$0xff] }
 0x523   :  { %v609_v63 = vpop.xlane.xlu1 %608 }
 0x524   :  { %v610_v3 = vmul.f32 0.16666667, %v609_v63  ;;  %v1216_v63 = vld [vmem:[#allocation16 + $0x70] sm:$0xff] }
 0x526   :  { %v611_v5 = vadd.f32 1e-05, %v610_v3  ;;  %v1217_v3 = vld [vmem:[#allocation16 + $0x78] sm:$0xff] }
 0x528   :  { %2103 = vrsqrt.f32 %v611_v5  ;;  %v2010_v5 = vpack.c.bf16 %v1217_v3, %v1216_v63  ;;  %v1190_v63 = vld [vmem:[#allocation14 + $0x1a0] sm:$0xff]  ;;  %v1191_v3 = vld [vmem:[#allocation14 + $0x1a8] sm:$0xff] }
 0x532   :  { %v2104_v22 = vpop.eup %2103 }
 0x533   :  { %v613_v32 = vmul.f32 %v2104_v22, %v2879_v45  ;;  %v614_v33 = vmul.f32 %v2104_v22, %v2883_v46  ;;  %v615_v34 = vmul.f32 %v2104_v22, %v2887_v47  ;;  %v616_v35 = vmul.f32 %v2104_v22, %v2895_v24  ;;  %v1202_v47 = vld [vmem:[#allocation16] sm:$0xff]  ;;  %v1203_v24 = vld [vmem:[#allocation16 + $0x8] sm:$0xff] }
 0x534   :  { %v1978_v45 = vpack.c.bf16 %v924_v39, %v920_v36  ;;  %v1986_v46 = vpack.c.bf16 %v926_v41, %v922_v40  ;;  %v1989_v17 = vpack.c.bf16 %v1203_v24, %v1202_v47  ;;  %v1154_v41 = vld [vmem:[#allocation14 + $0x80] sm:$0xff]  ;;  %v1139_v47 = vld [vmem:[#allocation14 + $0x8] sm:$0xff] }
 0x535   :  { %v617_v42 = vadd.f32 %v614_v33, %v613_v32  ;;  %835 = vmatprep.mubr.f32.mxu1 %v614_v33  ;;  %v618_v43 = vadd.f32 %v616_v35, %v615_v34  ;;  %905 = vmatprep.mubr.f32.mxu0 %v616_v35 }
 0x536   :  { %836 = vmatmul.mubr.f32.vlgmr.msra.gmra.mrb[2].mxu1 %v613_v32  ;;  %906 = vmatmul.mubr.f32.vlgmr.msra.gmra.mrb[8].mxu0 %v615_v34 }
 0x537   :  { %1975 = vmatpush1.bf16.msra.mxu0 %v1974_v26  ;;  %1983 = vmatpush1.bf16.msra.mxu1 %v1982_v30  ;;  %v619_v44 = vadd.f32 %v618_v43, %v617_v42  ;;  %v945_v30 = vrot.slane %v928_v15, %v415_v2  ;;  %v1155_v42 = vld [vmem:[#allocation14 + $0x88] sm:$0xff]  ;;  %v1186_v43 = vld [vmem:[#allocation14 + $0x180] sm:$0xff] }
 0x538   :  { %1977 = vmatprep.subr.bf16.mxu0 %v1976_v37  ;;  %1985 = vmatprep.subr.bf16.mxu1 %v1984_v38 }
 0x539   :  { %1014 = vmatprep.mubr.f32.mxu0 %v2470_v1  ;;  %1085 = vmatprep.mubr.f32.mxu1 %v2470_v1  ;;  %620 = vst [vmem:[#allocation20] sm:$0xff] %v619_v44  ;;  %v1138_v44 = vld [vmem:[#allocation14] sm:$0xff] }
 0x53b   :  { %1979 = vmatpush1.bf16.msra.mxu0 %v1978_v45  ;;  %1987 = vmatpush1.bf16.msra.mxu1 %v1986_v46  ;;  %v2012_v45 = vpack.c.bf16 %v1155_v42, %v1154_v41  ;;  %v1187_v46 = vld [vmem:[#allocation14 + $0x188] sm:$0xff] }
 0x53c   :  { %1988 = vmatprep.subr.bf16.mxu1 %v2468_v0  ;;  %v2044_v24 = vpack.c.bf16 %v1187_v46, %v1186_v43  ;;  %v1163_v46 = vld [vmem:[#allocation14 + $0xc8] sm:$0xff] }
 0x53d   :  { %2013 = vmatprep.subr.bf16.mxu0 %v2012_v45  ;;  %v1162_v45 = vld [vmem:[#allocation14 + $0xc0] sm:$0xff] }
 0x53e   :  { %1523 = vmatmul.mubr.msk.f32.vlgmr.msra.gmra.mrb[10].mxu0 %vm186_vm1, %v2733_v8  ;;  %1524 = vmatmul.mubr.msk.f32.vlgmr.msra.gmra.mrb[4].mxu1 %vm186_vm1, %v2733_v8  ;;  %v1210_v8 = vld [vmem:[#allocation16 + $0x40] sm:$0xff]  ;;  %vm3122_vm1 = vcmp.eq.s32.totalorder %v2739_v10, %v2792_v59  ;;  %v941_v10 = vrot.slane %v928_v15, %v411_v55  ;;  %v937_v59 = vrot.slane %v928_v15, %v407_v54 }
 0x53f   :  { %1990 = vmatpush3.bf16.msra.mxu1 %v1989_v17  ;;  %1835 = vmatprep.mubr.msk.f32.mxu1 %vm3121_vm4, %v2470_v1  ;;  %v2001_v57 = vpack.c.bf16 %v1211_v56, %v1210_v8  ;;  %v1212_v1 = vld [vmem:[#allocation16 + $0x50] sm:$0xff]  ;;  %v2014_v17 = vpack.c.bf16 %v1139_v47, %v1138_v44  ;;  %v1141_v56 = vld [vmem:[#allocation14 + $0x18] sm:$0xff]  ;;  %v1194_v44 = vld [vmem:[#allocation14 + $0x1c0] sm:$0xff]  ;;  %v2028_v47 = vpack.c.bf16 %v1163_v46, %v1162_v45 }
 0x540   :  { %1991 = vmatprep.subr.bf16.mxu1 %v2468_v0  ;;  %v2004_v60 = vpack.c.bf16 %v1213_v58, %v1212_v1  ;;  %v1140_v8 = vld [vmem:[#allocation14 + $0x10] sm:$0xff]  ;;  %v1173_v58 = vld [vmem:[#allocation14 + $0x118] sm:$0xff] }
 0x541   :  { %2015 = vmatpush3.bf16.msra.mxu0 %v2014_v17  ;;  %v2018_v1 = vpack.c.bf16 %v1141_v56, %v1140_v8  ;;  %v1146_v17 = vld [vmem:[#allocation14 + $0x40] sm:$0xff] }
 0x542   :  { %v2030_v16 = vpack.c.bf16 %v1147_v19, %v1146_v17 }
 0x543   :  { %1993 = vmatpush3.bf16.msra.mxu1 %v1992_v18  ;;  %v1156_v18 = vld [vmem:[#allocation14 + $0x90] sm:$0xff] }
 0x544   :  { %1994 = vmatprep.subr.bf16.mxu1 %v2468_v0  ;;  %v2016_v50 = vpack.c.bf16 %v1157_v20, %v1156_v18  ;;  %v1178_v18 = vld [vmem:[#allocation14 + $0x140] sm:$0xff]  ;;  %v1164_v20 = vld [vmem:[#allocation14 + $0xd0] sm:$0xff] }
 0x546   :  { %2017 = vmatprep.subr.bf16.mxu0 %v2016_v50  ;;  %v1196_v50 = vld [vmem:[#allocation14 + $0x1d0] sm:$0xff] }
 0x547   :  { %1996 = vmatpush3.bf16.msra.mxu1 %v1995_v48  ;;  %v1188_v48 = vld [vmem:[#allocation14 + $0x190] sm:$0xff]  ;;  %2019 = vmatpush3.bf16.msra.mxu0 %v2018_v1  ;;  %v1149_v1 = vld [vmem:[#allocation14 + $0x58] sm:$0xff] }
 0x548   :  { %1997 = vmatprep.subr.bf16.mxu1 %v2468_v0 }
 0x54b   :  { %1999 = vmatpush3.bf16.msra.mxu1 %v1998_v52  ;;  %v2048_v52 = vpack.c.bf16 %v1189_v49, %v1188_v48  ;;  %v1165_v49 = vld [vmem:[#allocation14 + $0xd8] sm:$0xff] }
 0x54c   :  { %2000 = vmatprep.subr.bf16.mxu1 %v2468_v0  ;;  %v2032_v8 = vpack.c.bf16 %v1165_v49, %v1164_v20 }
 0x54f   :  { %2002 = vmatpush3.bf16.msra.mxu1 %v2001_v57  ;;  %v1172_v57 = vld [vmem:[#allocation14 + $0x110] sm:$0xff] }
 0x550   :  { %2003 = vmatprep.subr.bf16.mxu1 %v2468_v0  ;;  %v2050_v9 = vpack.c.bf16 %v1173_v58, %v1172_v57  ;;  %v1148_v57 = vld [vmem:[#allocation14 + $0x50] sm:$0xff] }
 0x551   :  { %v1180_v58 = vld [vmem:[#allocation14 + $0x150] sm:$0xff] }
 0x553   :  { %2005 = vmatpush3.bf16.msra.mxu1 %v2004_v60  ;;  %v1158_v60 = vld [vmem:[#allocation14 + $0xa0] sm:$0xff] }
 0x554   :  { %2006 = vmatprep.subr.bf16.mxu1 %v2468_v0 }
 0x557   :  { %2008 = vmatpush3.bf16.msra.mxu1 %v2007_v62  ;;  %v2020_v62 = vpack.c.bf16 %v1159_v23, %v1158_v60  ;;  %v2034_v60 = vpack.c.bf16 %v1149_v1, %v1148_v57  ;;  %v1181_v23 = vld [vmem:[#allocation14 + $0x158] sm:$0xff] }
 0x558   :  { %2009 = vmatprep.subr.bf16.mxu1 %v2468_v0  ;;  %v933_v0 = vrot.slane %v928_v15, %v403_v53  ;;  %v1161_v15 = vld [vmem:[#allocation14 + $0xb8] sm:$0xff] }
 0x559   :  { %2021 = vmatprep.subr.bf16.mxu0 %v2020_v62  ;;  %v1167_v62 = vld [vmem:[#allocation14 + $0xe8] sm:$0xff] }
 0x55b   :  { %2011 = vmatpush3.bf16.msra.mxu1 %v2010_v5  ;;  %v1142_v5 = vld [vmem:[#allocation14 + $0x20] sm:$0xff] }
 0x55c   :  { %2045 = vmatprep.subr.bf16.mxu1 %v2044_v24  ;;  %v1195_v24 = vld [vmem:[#allocation14 + $0x1c8] sm:$0xff] }
 0x55d   :  { %v2060_v31 = vpack.c.bf16 %v1195_v24, %v1194_v44 }
 0x55e   :  { %1836 = vmatmul.mubr.msk.f32.vlgmr.msra.gmra.mrb[6].mxu1 %vm3122_vm1, %v2471_v4 }
 0x55f   :  { %2047 = vmatpush3.bf16.msra.mxu1 %v2046_v28  ;;  %v1179_v28 = vld [vmem:[#allocation14 + $0x148] sm:$0xff] }
 0x560   :  { %2049 = vmatprep.subr.bf16.mxu1 %v2048_v52  ;;  %v2062_v48 = vpack.c.bf16 %v1179_v28, %v1178_v18  ;;  %v1197_v52 = vld [vmem:[#allocation14 + $0x1d8] sm:$0xff] }
 0x561   :  { %v2064_v56 = vpack.c.bf16 %v1197_v52, %v1196_v50 }
 0x563   :  { %2051 = vmatpush3.bf16.msra.mxu1 %v2050_v9  ;;  %v1166_v9 = vld [vmem:[#allocation14 + $0xe0] sm:$0xff] }
 0x609   :  { %v1597_v6 = vpop.f32.mrb[2].mxu1  ;;  %v1632_v7 = vpop.f32.mrb[8].mxu0 }
 0x60a   :  { %v1598_v11 = vpop.f32.mrb[3].mxu1  ;;  %v1633_v12 = vpop.f32.mrb[9].mxu0 }
 0x60b   :  { %v1599_v13 = vadd.f32 %v1598_v11, %v1597_v6  ;;  %v1634_v14 = vadd.f32 %v1633_v12, %v1632_v7  ;;  %v2052_v6 = vpack.c.bf16 %v1191_v3, %v1190_v63  ;;  %v1143_v7 = vld [vmem:[#allocation14 + $0x28] sm:$0xff]  ;;  %v1174_v11 = vld [vmem:[#allocation14 + $0x120] sm:$0xff]  ;;  %v2066_v63 = vpack.c.bf16 %v1181_v23, %v1180_v58 }
 0x60c   :  { %v1175_v12 = vld [vmem:[#allocation14 + $0x128] sm:$0xff]  ;;  %v2036_v3 = vpack.c.bf16 %v1167_v62, %v1166_v9 }
 0x60d   :  { %v838_v21 = vadd.f32 %v1599_v13, %v2901_v61  ;;  %v2022_v13 = vpack.c.bf16 %v1143_v7, %v1142_v5  ;;  %2053 = vmatprep.subr.bf16.mxu1 %v2052_v6  ;;  %v1198_v5 = vld [vmem:[#allocation14 + $0x1e0] sm:$0xff]  ;;  %v1199_v6 = vld [vmem:[#allocation14 + $0x1e8] sm:$0xff] }
 0x60e   :  { %v1150_v7 = vld [vmem:[#allocation14 + $0x60] sm:$0xff] }
 0x60f   :  { %v908_v22 = vadd.f32 %v1634_v14, %v838_v21  ;;  %v1160_v14 = vld [vmem:[#allocation14 + $0xb0] sm:$0xff]  ;;  %2023 = vmatpush3.bf16.msra.mxu0 %v2022_v13  ;;  %v1182_v13 = vld [vmem:[#allocation14 + $0x160] sm:$0xff] }
 0x610   :  { %v1192_v21 = vld [vmem:[#allocation14 + $0x1b0] sm:$0xff] }
 0x611   :  { %911 = vst [vmem:[#allocation21] sm:$0xff] %v908_v22  ;;  %v1016_v4 = vpop.f32.mrb[10].mxu0  ;;  %v1087_v26 = vpop.f32.mrb[4].mxu1  ;;  %v2024_v22 = vpack.c.bf16 %v1161_v15, %v1160_v14  ;;  %v1183_v14 = vld [vmem:[#allocation14 + $0x168] sm:$0xff] }
 0x612   :  { %v1017_v32 = vadd.f32 %v1016_v4, %v933_v0  ;;  %v1018_v33 = vpop.f32.mrb[11].mxu0  ;;  %v1089_v34 = vpop.f32.mrb[5].mxu1  ;;  %v1088_v61 = vadd.f32 %v1087_v26, %v941_v10  ;;  %v2054_v0 = vpack.c.bf16 %v1175_v12, %v1174_v11  ;;  %v1193_v10 = vld [vmem:[#allocation14 + $0x1b8] sm:$0xff]  ;;  %v2068_v11 = vpack.c.bf16 %v1199_v6, %v1198_v5  ;;  %v1151_v12 = vld [vmem:[#allocation14 + $0x68] sm:$0xff] }
 0x613   :  { %v1019_v35 = vadd.f32 %v1018_v33, %v937_v59  ;;  %v1090_v54 = vadd.f32 %v1089_v34, %v945_v30  ;;  %v1144_v59 = vld [vmem:[#allocation14 + $0x30] sm:$0xff]  ;;  %v1145_v4 = vld [vmem:[#allocation14 + $0x38] sm:$0xff]  ;;  %v2056_v26 = vpack.c.bf16 %v1193_v10, %v1192_v21  ;;  %2025 = vmatprep.subr.bf16.mxu0 %v2024_v22  ;;  %v2038_v15 = vpack.c.bf16 %v1151_v12, %v1150_v7 }
 0x614   :  { %v2941_v53 = vsel %vm2848_vm11, %v1017_v32, 0.0  ;;  %v2951_v51 = vsel %vm2854_vm0, %v1088_v61, 0.0  ;;  %v1176_v30 = vld [vmem:[#allocation14 + $0x130] sm:$0xff]  ;;  %v1177_v32 = vld [vmem:[#allocation14 + $0x138] sm:$0xff]  ;;  %v2026_v33 = vpack.c.bf16 %v1145_v4, %v1144_v59  ;;  %2055 = vmatpush3.bf16.msra.mxu1 %v2054_v0  ;;  %v2070_v10 = vpack.c.bf16 %v1183_v14, %v1182_v13 }
 0x615   :  { %v2945_v55 = vsel %vm2863_vm13, %v1019_v35, 0.0  ;;  %v2956_v37 = vsel %vm2869_vm5, %v1090_v54, 0.0  ;;  %v2058_v34 = vpack.c.bf16 %v1177_v32, %v1176_v30  ;;  %2057 = vmatprep.subr.bf16.mxu1 %v2056_v26  ;;  %v1168_v21 = vld [vmem:[#allocation14 + $0xf0] sm:$0xff]  ;;  %v1169_v0 = vld [vmem:[#allocation14 + $0xf8] sm:$0xff] }
 0x616   :  { %v1104_v36 = vadd.f32 %v2945_v55, %v2941_v53  ;;  %2027 = vmatpush3.bf16.msra.mxu0 %v2026_v33  ;;  %v1200_v22 = vld [vmem:[#allocation14 + $0x1f0] sm:$0xff]  ;;  %v2040_v59 = vpack.c.bf16 %v1169_v0, %v1168_v21  ;;  %v1201_v4 = vld [vmem:[#allocation14 + $0x1f8] sm:$0xff] }
 0x617   :  { %2029 = vmatprep.subr.bf16.mxu0 %v2028_v47  ;;  %v1152_v26 = vld [vmem:[#allocation14 + $0x70] sm:$0xff]  ;;  %v1153_v30 = vld [vmem:[#allocation14 + $0x78] sm:$0xff]  ;;  %v2072_v32 = vpack.c.bf16 %v1201_v4, %v1200_v22 }
 0x618   :  { %v1105_v2 = vadd.f32 %v1104_v36, %v2951_v51  ;;  %2059 = vmatpush3.bf16.msra.mxu1 %v2058_v34  ;;  %v1184_v33 = vld [vmem:[#allocation14 + $0x170] sm:$0xff]  ;;  %v1185_v34 = vld [vmem:[#allocation14 + $0x178] sm:$0xff] }
 0x619   :  { %2061 = vmatprep.subr.bf16.mxu1 %v2060_v31 }
 0x61a   :  { %v1106_v38 = vadd.f32 %v1105_v2, %v2956_v37  ;;  %2031 = vmatpush3.bf16.msra.mxu0 %v2030_v16 }
 0x61b   :  { %2033 = vmatprep.subr.bf16.mxu0 %v2032_v8 }
 0x61c   :  { %1107 = vadd.xlane.f32.xlu0 %v1106_v38  ;;  %2063 = vmatpush3.bf16.msra.mxu1 %v2062_v48 }
 0x61d   :  { %2065 = vmatprep.subr.bf16.mxu1 %v2064_v56 }
 0x61e   :  { %2035 = vmatpush3.bf16.msra.mxu0 %v2034_v60 }
 0x61f   :  { %2037 = vmatprep.subr.bf16.mxu0 %v2036_v3 }
 0x620   :  { %2067 = vmatpush3.bf16.msra.mxu1 %v2066_v63 }
 0x621   :  { %2069 = vmatprep.subr.bf16.mxu1 %v2068_v11 }
 0x622   :  { %2039 = vmatpush3.bf16.msra.mxu0 %v2038_v15 }
 0x623   :  { %2041 = vmatprep.subr.bf16.mxu0 %v2040_v59 }
 0x624   :  { %2071 = vmatpush3.bf16.msra.mxu1 %v2070_v10 }
 0x625   :  { %2073 = vmatprep.subr.bf16.mxu1 %v2072_v32 }
 0x631   :  { %v2959_v39 = vpop.f32.mrb[6].mxu1 }
 0x632   :  { %v1837_v40 = vpop.f32.mrb[7].mxu1 }
 0x6a9   :  { %v1108_v61 = vpop.xlane.xlu0 %1107 }
 0x6aa   :  { %v1109_v35 = vmul.f32 0.1, %v1108_v61  ;;  %v2042_v61 = vpack.c.bf16 %v1153_v30, %v1152_v26 }
 0x6ac   :  { %v1110_v54 = vsub.f32 %v2941_v53, %v1109_v35  ;;  %v1111_v36 = vsub.f32 %v2945_v55, %v1109_v35  ;;  %v1112_v2 = vsub.f32 %v2951_v51, %v1109_v35  ;;  %v1113_v38 = vsub.f32 %v2956_v37, %v1109_v35  ;;  %2043 = vmatpush3.bf16.msra.mxu0 %v2042_v61 }
 0x6ad   :  { %v2074_v35 = vpack.c.bf16 %v1185_v34, %v1184_v33 }
 0x6ae   :  { %v2967_v40 = vsel %vm2848_vm11, %v1110_v54, 0.0  ;;  %v2971_v41 = vsel %vm2863_vm13, %v1111_v36, 0.0  ;;  %v2975_v42 = vsel %vm2854_vm0, %v1112_v2, 0.0  ;;  %v2983_v51 = vsel %vm2869_vm5, %v1113_v38, 0.0 }
 0x6af   :  { %v1118_v53 = vmul.f32 %v2967_v40, %v2967_v40  ;;  %v1119_v55 = vmul.f32 %v2971_v41, %v2971_v41  ;;  %v1120_v25 = vmul.f32 %v2975_v42, %v2975_v42  ;;  %v1121_v37 = vmul.f32 %v2983_v51, %v2983_v51  ;;  %2075 = vmatpush3.bf16.msra.mxu1 %v2074_v35 }
 0x6b1   :  { %v1122_v29 = vadd.f32 %v1119_v55, %v1118_v53 }
 0x6b3   :  { %v1123_v27 = vadd.f32 %v1122_v29, %v1120_v25 }
 0x6b5   :  { %v1124_v43 = vadd.f32 %v1123_v27, %v1121_v37 }
 0x6b7   :  { %1125 = vadd.xlane.f32.xlu1 %v1124_v43 }
 0x744   :  { %v1126_v54 = vpop.xlane.xlu1 %1125 }
 0x745   :  { %v1127_v36 = vmul.f32 0.1, %v1126_v54 }
 0x747   :  { %v1128_v2 = vadd.f32 1e-05, %v1127_v36 }
 0x749   :  { %2105 = vrsqrt.f32 %v1128_v2 }
 0x753   :  { %v2106_v38 = vpop.eup %2105 }
 0x754   :  { %v1130_v53 = vmul.f32 %v2106_v38, %v2967_v40  ;;  %v1131_v55 = vmul.f32 %v2106_v38, %v2971_v41  ;;  %v1132_v25 = vmul.f32 %v2106_v38, %v2975_v42  ;;  %v1133_v29 = vmul.f32 %v2106_v38, %v2983_v51 }
 0x756   :  { %v1134_v37 = vadd.f32 %v1131_v55, %v1130_v53  ;;  %1352 = vmatprep.mubr.f32.mxu0 %v1131_v55  ;;  %v1135_v27 = vadd.f32 %v1133_v29, %v1132_v25  ;;  %1422 = vmatprep.mubr.f32.mxu1 %v1133_v29 }
 0x757   :  { %1353 = vmatmul.mubr.f32.vlgmr.msra.gmra.mrb[12].mxu0 %v1130_v53  ;;  %1423 = vmatmul.mubr.f32.vlgmr.msra.gmra.mrb[8].mxu1 %v1132_v25 }
 0x758   :  { %v1136_v43 = vadd.f32 %v1135_v27, %v1134_v37 }
 0x75a   :  { %1137 = vst [vmem:[#allocation23] sm:$0xff] %v1136_v43 }
 0x75b   :  { %2316 = shalt.err (!%p2313_p6)
}
 0x75c   :  { %s2317_s23 = scalar_lea.hbm %s3080_s14, 128 }
 0x75d   :  { %p2318_p7 = scmp.ne.s32.totalorder %s3080_s14, %s2317_s23  ;;  %p2321_p8 = scmp.lt.u32.totalorder %s2317_s23, %s3080_s14 }
 0x75f   :  { %p2323_p9 = pnand %p2321_p8, %p2318_p7 }
 0x761   :  { %2326 = shalt.err (!%p2323_p9)
}
 0x762   :  { %1448 = dma.vmem_to_hbm [thread:$0]  %s1446_s5, 128, %s3080_s14, [#allocation19]  }
 0x763   :  { %s2327_s22 = scalar_lea.vmem %s1466_s2, 128  ;;  %p2332_p11 = scmp.lt.s32.totalorder %s1466_s2, %s1466_s2 }
 0x764   :  { %p2328_p10 = scmp.ne.s32.totalorder %s1466_s2, %s2327_s22  ;;  %p2333_p12 = scmp.lt.s32.totalorder %s2327_s22, %s2327_s22 }
 0x766   :  { %p2334_p13 = por %p2333_p12, %p2332_p11 }
 0x768   :  { %p2335_p0 = pnand %p2334_p13, %p2328_p10 }
 0x76a   :  { %2338 = shalt.err (!%p2335_p0)
}
 0x76b   :  { %s2339_s12 = scalar_lea.hbm %s3082_s16, 128 }
 0x76c   :  { %p2340_p1 = scmp.ne.s32.totalorder %s3082_s16, %s2339_s12  ;;  %p2343_p2 = scmp.lt.u32.totalorder %s2339_s12, %s3082_s16 }
 0x76e   :  { %p2345_p3 = pnand %p2343_p2, %p2340_p1 }
 0x770   :  { %2348 = shalt.err (!%p2345_p3)
}
 0x771   :  { %1468 = dma.vmem_to_hbm [thread:$0]  %s1466_s2, 128, %s3082_s16, [#allocation22]  }
 0x772   :  { %s2474_s30 = smov [#allocation17]   ;;  %s2475_s6 = smov [#allocation20]  }
 0x773   :  { %s1435_s4 = sshll.u32 %s2474_s30, 4  ;;  %s1455_s10 = sshll.u32 %s2475_s6, 4  ;;  %s1436_s4 = int_to_ptr.vmem [resolvable:$true] %s1435_s4  ;;  %s1456_s10 = int_to_ptr.vmem [resolvable:$true] %s1455_s10 }
 0x774   :  { %s2349_s5 = scalar_lea.vmem %s1436_s4, 128  ;;  %p2354_p5 = scmp.lt.s32.totalorder %s1436_s4, %s1436_s4 }
 0x775   :  { %p2350_p4 = scmp.ne.s32.totalorder %s1436_s4, %s2349_s5  ;;  %p2355_p6 = scmp.lt.s32.totalorder %s2349_s5, %s2349_s5 }
 0x777   :  { %p2356_p7 = por %p2355_p6, %p2354_p5 }
 0x779   :  { %p2357_p8 = pnand %p2356_p7, %p2350_p4 }
 0x77b   :  { %2360 = shalt.err (!%p2357_p8)
}
 0x77c   :  { %s2361_s18 = scalar_lea.hbm %s3079_s13, 128 }
 0x77d   :  { %p2362_p9 = scmp.ne.s32.totalorder %s3079_s13, %s2361_s18  ;;  %p2365_p10 = scmp.lt.u32.totalorder %s2361_s18, %s3079_s13 }
 0x77f   :  { %p2367_p11 = pnand %p2365_p10, %p2362_p9 }
 0x781   :  { %2370 = shalt.err (!%p2367_p11)
}
 0x782   :  { %1438 = dma.vmem_to_hbm [thread:$0]  %s1436_s4, 128, %s3079_s13, [#allocation4]  }
 0x783   :  { %s2371_s20 = scalar_lea.vmem %s1456_s10, 128  ;;  %p2376_p13 = scmp.lt.s32.totalorder %s1456_s10, %s1456_s10 }
 0x784   :  { %p2372_p12 = scmp.ne.s32.totalorder %s1456_s10, %s2371_s20  ;;  %p2377_p0 = scmp.lt.s32.totalorder %s2371_s20, %s2371_s20 }
 0x786   :  { %p2378_p1 = por %p2377_p0, %p2376_p13 }
 0x788   :  { %p2379_p2 = pnand %p2378_p1, %p2372_p12 }
 0x78a   :  { %2382 = shalt.err (!%p2379_p2)
}
 0x78b   :  { %s2383_s24 = scalar_lea.hbm %s3081_s15, 128 }
 0x78c   :  { %p2384_p3 = scmp.ne.s32.totalorder %s3081_s15, %s2383_s24  ;;  %p2387_p4 = scmp.lt.u32.totalorder %s2383_s24, %s3081_s15 }
 0x78e   :  { %p2389_p5 = pnand %p2387_p4, %p2384_p3 }
 0x790   :  { %2392 = shalt.err (!%p2389_p5)
}
 0x791   :  { %1458 = dma.vmem_to_hbm [thread:$0]  %s1456_s10, 128, %s3081_s15, [#allocation19]  }
 0x792   :  { %s2476_s25 = smov [#allocation23]  }
 0x793   :  { %s1475_s1 = sshll.u32 %s2476_s25, 4  ;;  %s1476_s1 = int_to_ptr.vmem [resolvable:$true] %s1475_s1 }
 0x794   :  { %s2393_s11 = scalar_lea.vmem %s1476_s1, 128  ;;  %p2398_p7 = scmp.lt.s32.totalorder %s1476_s1, %s1476_s1 }
 0x795   :  { %p2394_p6 = scmp.ne.s32.totalorder %s1476_s1, %s2393_s11  ;;  %p2399_p8 = scmp.lt.s32.totalorder %s2393_s11, %s2393_s11 }
 0x797   :  { %p2400_p9 = por %p2399_p8, %p2398_p7 }
 0x799   :  { %p2401_p10 = pnand %p2400_p9, %p2394_p6 }
 0x79b   :  { %2404 = shalt.err (!%p2401_p10)
}
 0x79c   :  { %s2405_s30 = scalar_lea.hbm %s3083_s17, 128 }
 0x79d   :  { %p2406_p11 = scmp.ne.s32.totalorder %s3083_s17, %s2405_s30  ;;  %p2409_p12 = scmp.lt.u32.totalorder %s2405_s30, %s3083_s17 }
 0x79f   :  { %p2411_p13 = pnand %p2409_p12, %p2406_p11 }
 0x7a1   :  { %2414 = shalt.err (!%p2411_p13)
}
 0x7a2   :  { %1478 = dma.vmem_to_hbm [thread:$0]  %s1476_s1, 128, %s3083_s17, [#allocation22]  }
 0x7a3   :  { %s2477_s27 = smov [#allocation24]  }
 0x7a4   :  { %s1485_s18 = sshll.u32 %s2477_s27, 4  ;;  %s1486_s18 = int_to_ptr.vmem [resolvable:$true] %s1485_s18 }
 0x7a5   :  { %s2415_s28 = scalar_lea.vmem %s1486_s18, 128  ;;  %p2420_p1 = scmp.lt.s32.totalorder %s1486_s18, %s1486_s18 }
 0x7a6   :  { %p2416_p0 = scmp.ne.s32.totalorder %s1486_s18, %s2415_s28  ;;  %p2421_p2 = scmp.lt.s32.totalorder %s2415_s28, %s2415_s28 }
 0x7a8   :  { %p2422_p3 = por %p2421_p2, %p2420_p1 }
 0x7aa   :  { %p2423_p4 = pnand %p2422_p3, %p2416_p0 }
 0x82a   :  { %v1684_v40 = vpop.f32.mrb[12].mxu0  ;;  %v1719_v41 = vpop.f32.mrb[8].mxu1 }
 0x82b   :  { %v1685_v42 = vpop.f32.mrb[13].mxu0  ;;  %v1720_v51 = vpop.f32.mrb[9].mxu1 }
 0x82c   :  { %v1686_v45 = vadd.f32 %v1685_v42, %v1684_v40  ;;  %v1721_v46 = vadd.f32 %v1720_v51, %v1719_v41 }
 0x82e   :  { %v1355_v44 = vadd.f32 %v1686_v45, %v2959_v39 }
 0x830   :  { %v1425_v47 = vadd.f32 %v1721_v46, %v1355_v44 }
 0x832   :  { %1428 = vst [vmem:[#allocation24] sm:$0xff] %v1425_v47 }
 0x833   :  { %2426 = shalt.err (!%p2423_p4)
}
 0x834   :  { %s3123_s16 = sld [smem:[#allocation38_spill]] }
 0x83a   :  { %s2427_s2 = scalar_lea.hbm %s3123_s16, 128 }
 0x83b   :  { %p2428_p5 = scmp.ne.s32.totalorder %s3123_s16, %s2427_s2  ;;  %p2431_p6 = scmp.lt.u32.totalorder %s2427_s2, %s3123_s16 }
 0x83d   :  { %p2433_p7 = pnand %p2431_p6, %p2428_p5 }
 0x83f   :  { %2436 = shalt.err (!%p2433_p7)
}
 0x840   :  { %1488 = dma.vmem_to_hbm [thread:$0]  %s1486_s18, 128, %s3123_s16, [#allocation25]  }
 0x841   :  { %2447 = dma.done.wait [#allocation4], 128  }
 0x842   :  { %2448 = vsyncadd [#allocation4], 4294967168 }
 0x843   :  { %2449 = dma.done.wait [#allocation19], 256  }
 0x844   :  { %2450 = vsyncadd [#allocation19], 4294967040 }
 0x845   :  { %2451 = dma.done.wait [#allocation22], 256  }
 0x846   :  { %2452 = vsyncadd [#allocation22], 4294967040 }
 0x847   :  { %2453 = dma.done.wait [#allocation25], 128  }
 0x848   :  { %2454 = vsyncadd [#allocation25], 4294967168 }
 0x849   :  { %1507 = vsyncpa [#allocation3], 1 }
 0x84a   :  { %1508 = vsyncpa [#allocation6], 1 }
 0x84b   :  { %1509 = vsyncpa [#allocation9], 1 }
 0x84c   :  { %1510 = vsyncpa [#allocation12], 1 }
 0x84d   :  { %1511 = vsyncpa [#allocation15], 1 }
 0x84e   :  { %1512 = vsyncpa [#allocation4], 1 }
 0x84f   :  { %1513 = vsyncpa [#allocation19], 1 }
 0x850   :  { %1514 = vsyncpa [#allocation22], 1 }
 0x851   :  { %1515 = vsyncpa [#allocation25], 1 }

</bundles_post_ra>
